<compile_context>
chip_gen: v6e
topology: v6e:2x2x1
jax: 0.10.0
libtpu: 0.0.40
codegen_flags: <defaults>
</compile_context>

<pallas_src>
import functools

import jax
import jax.numpy as jnp
from jax.experimental import pallas as pl
from jax.experimental.pallas import tpu as pltpu

BN_EPS = 1e-5

_VMEM = pl.BlockSpec(memory_space=pltpu.MemorySpace.VMEM)


# ----------------------------------------------------------------------------
# Kernel helpers
# ----------------------------------------------------------------------------
def _bn_relu(y, gamma, beta):
    """Train-mode BatchNorm2d (per-channel batch stats over lanes, biased var)
    + ReLU, computed in a single elementwise pass (var = E[y^2] - mean^2,
    normalization folded to y*scale + shift)."""
    inv_n = 1.0 / y.shape[1]
    mean = jnp.sum(y, axis=1, keepdims=True) * inv_n          # XLU lane reduce
    ex2 = jnp.sum(y * y, axis=1, keepdims=True) * inv_n
    var = ex2 - mean * mean
    scale = gamma * jax.lax.rsqrt(var + BN_EPS)               # EUP rsqrt
    shift = beta - mean * scale
    return jnp.maximum(y * scale + shift, 0.0)


# ----------------------------------------------------------------------------
# Pallas kernels
# ----------------------------------------------------------------------------
def conv_bn_relu_kernel(p_ref, w_ref, g_ref, beta_ref, o_ref):
    """Fused im2col-matmul conv + BatchNorm(batch stats) + ReLU (conv1/conv2).

    p_ref:    (K, N)      patches (K = c_in*kh*kw, N = Ho*Wo in lanes)
    w_ref:    (C_out, K)  bf16 conv weight, torch flatten order (c_in, kh, kw)
    g_ref:    (C_out, 1)  BN gamma;   beta_ref: (C_out, 1) BN beta
    o_ref:    (C_out, N)  bf16 output, already in (C, Ho, Wo) flat order
    """
    y = jnp.dot(w_ref[...], p_ref[...].astype(jnp.bfloat16),
                preferred_element_type=jnp.float32)
    o_ref[...] = _bn_relu(y, g_ref[...], beta_ref[...]).astype(o_ref.dtype)


def conv3_rollout_kernel(p3_ref, w3_ref, g3_ref, beta3_ref, wenc_ref, benc_ref,
                         oh_ref, wpc_ref, bpc_ref,
                         wl1_ref, bl1_ref, wl2_ref, bl2_ref, wl3_ref, bl3_ref,
                         wh_ref, bh_ref, heads_ref, hs_ref):
    """conv3 + Flatten + encoder Linear + `L` RNN steps + packed reward heads.

    p3_ref:    (800, 49)     conv3 im2col patches (bf16)
    w3_ref:    (32, 800)     bf16 conv3 weight
    wenc_ref:  (49, 32, 128) f32 encoder weight, [n, c, :] = W.T[c*49+n, :]
    oh_ref:    (L, 6)        bf16 one-hot actions
    wpc_ref:   (6, 384)      bf16 [Wp1 | Wp2 | Wp3]
    wh_ref:    (128, 2)      bf16 [w_reward | w_rem_reward]
    heads_ref: (L, 2)        heads[t,0]=reward(h_{t+1}), heads[L-1,1]=rem_reward
    hs_ref:    (L, 128)      VMEM scratch holding every hidden state
    """
    H = 128

    # ---- conv3 (5x5, stride 2) as matmul + BN + ReLU -----------------------
    y3 = jnp.dot(w3_ref[...], p3_ref[...].astype(jnp.bfloat16),
                 preferred_element_type=jnp.float32)              # (32, 49)
    a3 = _bn_relu(y3, g3_ref[...], beta3_ref[...])                # (32, 49) f32

    # ---- Flatten(start_dim=0) + Linear(1568, 128), folded ------------------
    # h[j] = sum_{c,n} a3[c,n] * Wenc[c*49+n, j]  ==  49 rank-1 VPU updates of
    # a (32,128) accumulator followed by one sublane reduction.
    n_sp = a3.shape[1]                                            # 49 (static)
    acc = jnp.zeros((a3.shape[0], H), jnp.float32)
    for s in range(n_sp):
        acc = acc + a3[:, s:s + 1] * wenc_ref[s]                  # (32,1)*(32,128)
    h = jnp.sum(acc, axis=0, keepdims=True) + benc_ref[...]       # (1, 128)

    # ---- hoisted one-hot action projections (one matmul for all steps) -----
    proj = (jnp.dot(oh_ref[...], wpc_ref[...], preferred_element_type=jnp.float32)
            + bpc_ref[...])                                       # (L, 384)

    # ---- unrolled RNN steps (serial MXU chain, bf16 operands) --------------
    L = heads_ref.shape[0]
    for t in range(L):
        h = jnp.maximum(
            jnp.dot(h.astype(jnp.bfloat16), wl1_ref[...],
                    preferred_element_type=jnp.float32)
            + bl1_ref[...] + proj[t:t + 1, 0:H], 0.0)
        h = jnp.maximum(
            jnp.dot(h.astype(jnp.bfloat16), wl2_ref[...],
                    preferred_element_type=jnp.float32)
            + bl2_ref[...] + proj[t:t + 1, H:2 * H], 0.0)
        h = jnp.maximum(
            jnp.dot(h.astype(jnp.bfloat16), wl3_ref[...],
                    preferred_element_type=jnp.float32)
            + bl3_ref[...] + proj[t:t + 1, 2 * H:3 * H], 0.0)
        hs_ref[t:t + 1, :] = h

    # ---- deferred heads: one (L,128)@(128,2) matmul for every reward -------
    heads_ref[...] = (jnp.dot(hs_ref[...].astype(jnp.bfloat16), wh_ref[...],
                              preferred_element_type=jnp.float32) + bh_ref[...])


# ----------------------------------------------------------------------------
# Wrappers (minimal XLA glue, all under one jit)
# ----------------------------------------------------------------------------
def conv_bn_relu(patches, w, gamma, beta):
    return pl.pallas_call(
        conv_bn_relu_kernel,
        out_shape=jax.ShapeDtypeStruct((w.shape[0], patches.shape[1]), jnp.bfloat16),
        in_specs=[_VMEM] * 4,
        out_specs=_VMEM,
    )(patches, w, gamma, beta)


def _extract_patches(x_chw, k, s):
    """x: (C, H, W) -> patches (C*k*k, Ho*Wo); feature order (c_in, kh, kw)."""
    c, h, w = x_chw.shape
    ho = (h - k) // s + 1
    wo = (w - k) // s + 1
    p = jax.lax.conv_general_dilated_patches(
        x_chw[None], (k, k), (s, s), "VALID")          # (1, C*k*k, Ho, Wo)
    return p.reshape(c * k * k, ho * wo), ho, wo


@functools.partial(jax.jit, static_argnames=("length",))
def rollout_forward(params, observation, actions, length):
    """observation: (1, 1, 80, 80) float32 (NCHW); actions: (>=length,) int32."""
    x = observation[0]                                  # (1, 80, 80)

    # conv1 / conv2: one patch-extraction op + one fused Pallas kernel each.
    for name in ("conv1", "conv2"):
        w, g, b = params[name]
        p, ho, wo = _extract_patches(x, 5, 2)
        x = conv_bn_relu(p, w, g, b).reshape(w.shape[0], ho, wo)

    # conv3 + Flatten + encoder Linear + RNN rollout + heads: one pallas_call.
    p3, _, _ = _extract_patches(x, 5, 2)                # (800, 49) bf16

    one_hot = jax.nn.one_hot(actions[:length], 6, dtype=jnp.bfloat16)   # (L, 6)

    w3, g3, b3 = params["conv3"]
    wenc3, benc = params["enc_lin"]
    wl1, bl1 = params["l1"]
    wl2, bl2 = params["l2"]
    wl3, bl3 = params["l3"]
    wpc, bpc = params["p_cat"]
    wh, bh = params["heads"]

    heads = pl.pallas_call(
        conv3_rollout_kernel,
        out_shape=jax.ShapeDtypeStruct((length, 2), jnp.float32),
        in_specs=[_VMEM] * 17,
        out_specs=_VMEM,
        scratch_shapes=[pltpu.VMEM((length, 128), jnp.float32)],
    )(p3, w3, g3, b3, wenc3, benc, one_hot, wpc, bpc,
      wl1, bl1, wl2, bl2, wl3, bl3, wh, bh)

    rewards = heads[:, 0].reshape(1, length)            # == torch.stack(rewards, dim=1)
    rem = heads[length - 1, 1].reshape(1)                # == rem_reward(h_final)
    return rewards, rem


# ----------------------------------------------------------------------------
# Deterministic parameter construction
# ----------------------------------------------------------------------------
def make_params(key):
    ks = iter(jax.random.split(key, 32))

    def _n(shape):
        return jax.random.normal(next(ks), shape, dtype=jnp.float32)

    def lin(fan_in, fan_out):
        # torch nn.Linear computes x @ W.T + b; we store W.T as (fan_in, fan_out),
        # pre-cast to bf16 for single-pass MXU matmuls (f32 accumulation).
        s = 1.0 / jnp.sqrt(fan_in)
        return ((s * _n((fan_in, fan_out))).astype(jnp.bfloat16),
                (s * _n((1, fan_out))).astype(jnp.float32))

    def conv(c_in, c_out, k=5):
        # Conv2d weight (c_out, c_in, k, k) flattened to (c_out, c_in*k*k):
        # same row order as torch `w.reshape(c_out, -1)` and as the feature
        # order of jax.lax.conv_general_dilated_patches.
        # Conv bias omitted: exactly cancelled by train-mode BatchNorm mean.
        kk = c_in * k * k
        s = 1.0 / jnp.sqrt(kk)
        w = (s * _n((c_out, kk))).astype(jnp.bfloat16)
        gamma = (1.0 + 0.1 * _n((c_out, 1))).astype(jnp.float32)
        beta = (0.1 * _n((c_out, 1))).astype(jnp.float32)
        return w, gamma, beta

    # encoder Linear(1568, 128): W.T is (1568, 128), row index = c*49 + spatial.
    # Pre-reshaped once to (49, 32, 128) so the kernel folds Flatten(start_dim=0)
    # into rank-1 VPU updates; kept f32 (VPU path, works on all generations).
    se = 1.0 / jnp.sqrt(1568.0)
    wenc = se * _n((1568, 128))
    wenc3 = wenc.reshape(32, 49, 128).transpose(1, 0, 2).astype(jnp.float32)
    benc = (se * _n((1, 128))).astype(jnp.float32)

    p1, p2, p3 = lin(6, 128), lin(6, 128), lin(6, 128)
    wr, br = lin(128, 1)
    wrr, brr = lin(128, 1)

    return {
        "conv1": conv(1, 16),
        "conv2": conv(16, 32),
        "conv3": conv(32, 32),
        "enc_lin": (wenc3, benc),
        "l1": lin(128, 128), "l2": lin(128, 128), "l3": lin(128, 128),
        # action projections packed for one hoisted (L,6)@(6,384) matmul
        "p_cat": (jnp.concatenate([p1[0], p2[0], p3[0]], axis=1),
                  jnp.concatenate([p1[1], p2[1], p3[1]], axis=1)),
        # reward / rem_reward heads packed into one (128, 2) matmul
        "heads": (jnp.concatenate([wr, wrr], axis=1),
                  jnp.concatenate([br, brr], axis=1)),
    }


# ----------------------------------------------------------------------------
if __name__ == "__main__":
    LENGTH = 6

    key = jax.random.PRNGKey(0)
    k_obs, k_act, k_par = jax.random.split(key, 3)

    # encoder hard-codes Linear(1568, 128) => observation must be (1, 1, 80, 80)
    observation = jax.random.normal(k_obs, (1, 1, 80, 80), dtype=jnp.float32)
    actions = jax.random.randint(k_act, (LENGTH,), 0, 6, dtype=jnp.int32)

    params = make_params(k_par)

    rewards, rem = jax.block_until_ready(
        rollout_forward(params, observation, actions, LENGTH))

    assert rewards.shape == (1, LENGTH) and rem.shape == (1,)
    assert jnp.all(jnp.isfinite(rewards)) and jnp.all(jnp.isfinite(rem))
    print("KERNEL_OK")
</pallas_src>

<mosaic_0001>
module attributes {stable_mosaic.version = 11 : i64} {
  func.func @conv_bn_relu_kernel(%arg0: memref<25x1444xf32, #tpu.memory_space<vmem>>, %arg1: memref<16x25xbf16, #tpu.memory_space<vmem>>, %arg2: memref<16x1xf32, #tpu.memory_space<vmem>>, %arg3: memref<16x1xf32, #tpu.memory_space<vmem>>, %arg4: memref<16x1444xbf16, #tpu.memory_space<vmem>>) attributes {dimension_semantics = [], scalar_prefetch = 0 : i64, scratch_operands = 0 : i64, tpu.core_type = #tpu.core_type<tc>} {
    %c0 = arith.constant 0 : index
    %c0_0 = arith.constant 0 : index
    %0 = vector.load %arg1[%c0, %c0_0] : memref<16x25xbf16, #tpu.memory_space<vmem>>, vector<16x25xbf16>
    %c0_1 = arith.constant 0 : index
    %c0_2 = arith.constant 0 : index
    %1 = vector.load %arg0[%c0_1, %c0_2] : memref<25x1444xf32, #tpu.memory_space<vmem>>, vector<25x1444xf32>
    %2 = arith.truncf %1 : vector<25x1444xf32> to vector<25x1444xbf16>
    %cst = arith.constant dense<0.000000e+00> : vector<16x1444xf32>
    %3 = tpu.matmul %0, %2, %cst {dimension_numbers = #tpu.dot_dimension_numbers<[1], [0], [0], [1], [0, 0, 1, 1], [], []>} : vector<16x25xbf16>, vector<25x1444xbf16>, vector<16x1444xf32> -> vector<16x1444xf32>
    %c0_3 = arith.constant 0 : index
    %c0_4 = arith.constant 0 : index
    %4 = vector.load %arg2[%c0_3, %c0_4] : memref<16x1xf32, #tpu.memory_space<vmem>>, vector<16x1xf32>
    %c0_5 = arith.constant 0 : index
    %c0_6 = arith.constant 0 : index
    %5 = vector.load %arg3[%c0_5, %c0_6] : memref<16x1xf32, #tpu.memory_space<vmem>>, vector<16x1xf32>
    %cst_7 = arith.constant dense<0.000000e+00> : vector<16xf32>
    %6 = vector.multi_reduction <add>, %3, %cst_7 [1] : vector<16x1444xf32> to vector<16xf32>
    %7 = vector.shape_cast %6 : vector<16xf32> to vector<16x1xf32>
    %cst_8 = arith.constant 6.92520756E-4 : f32
    %8 = vector.broadcast %cst_8 : f32 to vector<16x1xf32>
    %9 = arith.mulf %7, %8 : vector<16x1xf32>
    %10 = arith.mulf %3, %3 : vector<16x1444xf32>
    %cst_9 = arith.constant dense<0.000000e+00> : vector<16xf32>
    %11 = vector.multi_reduction <add>, %10, %cst_9 [1] : vector<16x1444xf32> to vector<16xf32>
    %12 = vector.shape_cast %11 : vector<16xf32> to vector<16x1xf32>
    %cst_10 = arith.constant 6.92520756E-4 : f32
    %13 = vector.broadcast %cst_10 : f32 to vector<16x1xf32>
    %14 = arith.mulf %12, %13 : vector<16x1xf32>
    %15 = arith.mulf %9, %9 : vector<16x1xf32>
    %16 = arith.subf %14, %15 : vector<16x1xf32>
    %cst_11 = arith.constant 9.99999974E-6 : f32
    %17 = vector.broadcast %cst_11 : f32 to vector<16x1xf32>
    %18 = arith.addf %16, %17 : vector<16x1xf32>
    %19 = math.rsqrt %18 : vector<16x1xf32>
    %20 = arith.mulf %4, %19 : vector<16x1xf32>
    %21 = arith.mulf %9, %20 : vector<16x1xf32>
    %22 = arith.subf %5, %21 : vector<16x1xf32>
    %23 = vector.broadcast %20 : vector<16x1xf32> to vector<16x1444xf32>
    %24 = arith.mulf %3, %23 : vector<16x1444xf32>
    %25 = vector.broadcast %22 : vector<16x1xf32> to vector<16x1444xf32>
    %26 = arith.addf %24, %25 : vector<16x1444xf32>
    %cst_12 = arith.constant 0.000000e+00 : f32
    %27 = vector.broadcast %cst_12 : f32 to vector<16x1444xf32>
    %28 = arith.maximumf %26, %27 : vector<16x1444xf32>
    %29 = arith.truncf %28 : vector<16x1444xf32> to vector<16x1444xbf16>
    %c0_13 = arith.constant 0 : index
    %c0_14 = arith.constant 0 : index
    %30 = vector.load %arg4[%c0_13, %c0_14] : memref<16x1444xbf16, #tpu.memory_space<vmem>>, vector<16x1444xbf16>
    tpu.vector_store %arg4[%c0_13, %c0_14], %29 {strides = array<i32>} : memref<16x1444xbf16, #tpu.memory_space<vmem>>, vector<16x1444xbf16>,
    return
  }
}

module attributes {stable_mosaic.version = 11 : i64} {
  func.func @conv_bn_relu_kernel(%arg0: memref<400x289xbf16, #tpu.memory_space<vmem>>, %arg1: memref<32x400xbf16, #tpu.memory_space<vmem>>, %arg2: memref<32x1xf32, #tpu.memory_space<vmem>>, %arg3: memref<32x1xf32, #tpu.memory_space<vmem>>, %arg4: memref<32x289xbf16, #tpu.memory_space<vmem>>) attributes {dimension_semantics = [], scalar_prefetch = 0 : i64, scratch_operands = 0 : i64, tpu.core_type = #tpu.core_type<tc>} {
    %c0 = arith.constant 0 : index
    %c0_0 = arith.constant 0 : index
    %0 = vector.load %arg1[%c0, %c0_0] : memref<32x400xbf16, #tpu.memory_space<vmem>>, vector<32x400xbf16>
    %c0_1 = arith.constant 0 : index
    %c0_2 = arith.constant 0 : index
    %1 = vector.load %arg0[%c0_1, %c0_2] : memref<400x289xbf16, #tpu.memory_space<vmem>>, vector<400x289xbf16>
    %cst = arith.constant dense<0.000000e+00> : vector<32x289xf32>
    %2 = tpu.matmul %0, %1, %cst {dimension_numbers = #tpu.dot_dimension_numbers<[1], [0], [0], [1], [0, 0, 1, 1], [], []>} : vector<32x400xbf16>, vector<400x289xbf16>, vector<32x289xf32> -> vector<32x289xf32>
    %c0_3 = arith.constant 0 : index
    %c0_4 = arith.constant 0 : index
    %3 = vector.load %arg2[%c0_3, %c0_4] : memref<32x1xf32, #tpu.memory_space<vmem>>, vector<32x1xf32>
    %c0_5 = arith.constant 0 : index
    %c0_6 = arith.constant 0 : index
    %4 = vector.load %arg3[%c0_5, %c0_6] : memref<32x1xf32, #tpu.memory_space<vmem>>, vector<32x1xf32>
    %cst_7 = arith.constant dense<0.000000e+00> : vector<32xf32>
    %5 = vector.multi_reduction <add>, %2, %cst_7 [1] : vector<32x289xf32> to vector<32xf32>
    %6 = vector.shape_cast %5 : vector<32xf32> to vector<32x1xf32>
    %cst_8 = arith.constant 0.00346020772 : f32
    %7 = vector.broadcast %cst_8 : f32 to vector<32x1xf32>
    %8 = arith.mulf %6, %7 : vector<32x1xf32>
    %9 = arith.mulf %2, %2 : vector<32x289xf32>
    %cst_9 = arith.constant dense<0.000000e+00> : vector<32xf32>
    %10 = vector.multi_reduction <add>, %9, %cst_9 [1] : vector<32x289xf32> to vector<32xf32>
    %11 = vector.shape_cast %10 : vector<32xf32> to vector<32x1xf32>
    %cst_10 = arith.constant 0.00346020772 : f32
    %12 = vector.broadcast %cst_10 : f32 to vector<32x1xf32>
    %13 = arith.mulf %11, %12 : vector<32x1xf32>
    %14 = arith.mulf %8, %8 : vector<32x1xf32>
    %15 = arith.subf %13, %14 : vector<32x1xf32>
    %cst_11 = arith.constant 9.99999974E-6 : f32
    %16 = vector.broadcast %cst_11 : f32 to vector<32x1xf32>
    %17 = arith.addf %15, %16 : vector<32x1xf32>
    %18 = math.rsqrt %17 : vector<32x1xf32>
    %19 = arith.mulf %3, %18 : vector<32x1xf32>
    %20 = arith.mulf %8, %19 : vector<32x1xf32>
    %21 = arith.subf %4, %20 : vector<32x1xf32>
    %22 = vector.broadcast %19 : vector<32x1xf32> to vector<32x289xf32>
    %23 = arith.mulf %2, %22 : vector<32x289xf32>
    %24 = vector.broadcast %21 : vector<32x1xf32> to vector<32x289xf32>
    %25 = arith.addf %23, %24 : vector<32x289xf32>
    %cst_12 = arith.constant 0.000000e+00 : f32
    %26 = vector.broadcast %cst_12 : f32 to vector<32x289xf32>
    %27 = arith.maximumf %25, %26 : vector<32x289xf32>
    %28 = arith.truncf %27 : vector<32x289xf32> to vector<32x289xbf16>
    %c0_13 = arith.constant 0 : index
    %c0_14 = arith.constant 0 : index
    %29 = vector.load %arg4[%c0_13, %c0_14] : memref<32x289xbf16, #tpu.memory_space<vmem>>, vector<32x289xbf16>
    tpu.vector_store %arg4[%c0_13, %c0_14], %28 {strides = array<i32>} : memref<32x289xbf16, #tpu.memory_space<vmem>>, vector<32x289xbf16>,
    return
  }
}

module attributes {stable_mosaic.version = 11 : i64} {
  func.func @conv3_rollout_kernel(%arg0: memref<800x49xbf16, #tpu.memory_space<vmem>>, %arg1: memref<32x800xbf16, #tpu.memory_space<vmem>>, %arg2: memref<32x1xf32, #tpu.memory_space<vmem>>, %arg3: memref<32x1xf32, #tpu.memory_space<vmem>>, %arg4: memref<49x32x128xf32, #tpu.memory_space<vmem>>, %arg5: memref<1x128xf32, #tpu.memory_space<vmem>>, %arg6: memref<6x6xbf16, #tpu.memory_space<vmem>>, %arg7: memref<6x384xbf16, #tpu.memory_space<vmem>>, %arg8: memref<1x384xf32, #tpu.memory_space<vmem>>, %arg9: memref<128x128xbf16, #tpu.memory_space<vmem>>, %arg10: memref<1x128xf32, #tpu.memory_space<vmem>>, %arg11: memref<128x128xbf16, #tpu.memory_space<vmem>>, %arg12: memref<1x128xf32, #tpu.memory_space<vmem>>, %arg13: memref<128x128xbf16, #tpu.memory_space<vmem>>, %arg14: memref<1x128xf32, #tpu.memory_space<vmem>>, %arg15: memref<128x2xbf16, #tpu.memory_space<vmem>>, %arg16: memref<1x2xf32, #tpu.memory_space<vmem>>, %arg17: memref<6x2xf32, #tpu.memory_space<vmem>>, %arg18: memref<6x128xf32, #tpu.memory_space<vmem>>) attributes {dimension_semantics = [], scalar_prefetch = 0 : i64, scratch_operands = 1 : i64, tpu.core_type = #tpu.core_type<tc>} {
    %c0 = arith.constant 0 : index
    %c0_0 = arith.constant 0 : index
    %0 = vector.load %arg1[%c0, %c0_0] : memref<32x800xbf16, #tpu.memory_space<vmem>>, vector<32x800xbf16>
    %c0_1 = arith.constant 0 : index
    %c0_2 = arith.constant 0 : index
    %1 = vector.load %arg0[%c0_1, %c0_2] : memref<800x49xbf16, #tpu.memory_space<vmem>>, vector<800x49xbf16>
    %cst = arith.constant dense<0.000000e+00> : vector<32x49xf32>
    %2 = tpu.matmul %0, %1, %cst {dimension_numbers = #tpu.dot_dimension_numbers<[1], [0], [0], [1], [0, 0, 1, 1], [], []>} : vector<32x800xbf16>, vector<800x49xbf16>, vector<32x49xf32> -> vector<32x49xf32>
    %c0_3 = arith.constant 0 : index
    %c0_4 = arith.constant 0 : index
    %3 = vector.load %arg2[%c0_3, %c0_4] : memref<32x1xf32, #tpu.memory_space<vmem>>, vector<32x1xf32>
    %c0_5 = arith.constant 0 : index
    %c0_6 = arith.constant 0 : index
    %4 = vector.load %arg3[%c0_5, %c0_6] : memref<32x1xf32, #tpu.memory_space<vmem>>, vector<32x1xf32>
    %cst_7 = arith.constant dense<0.000000e+00> : vector<32xf32>
    %5 = vector.multi_reduction <add>, %2, %cst_7 [1] : vector<32x49xf32> to vector<32xf32>
    %6 = vector.shape_cast %5 : vector<32xf32> to vector<32x1xf32>
    %cst_8 = arith.constant 0.0204081628 : f32
    %7 = vector.broadcast %cst_8 : f32 to vector<32x1xf32>
    %8 = arith.mulf %6, %7 : vector<32x1xf32>
    %9 = arith.mulf %2, %2 : vector<32x49xf32>
    %cst_9 = arith.constant dense<0.000000e+00> : vector<32xf32>
    %10 = vector.multi_reduction <add>, %9, %cst_9 [1] : vector<32x49xf32> to vector<32xf32>
    %11 = vector.shape_cast %10 : vector<32xf32> to vector<32x1xf32>
    %cst_10 = arith.constant 0.0204081628 : f32
    %12 = vector.broadcast %cst_10 : f32 to vector<32x1xf32>
    %13 = arith.mulf %11, %12 : vector<32x1xf32>
    %14 = arith.mulf %8, %8 : vector<32x1xf32>
    %15 = arith.subf %13, %14 : vector<32x1xf32>
    %cst_11 = arith.constant 9.99999974E-6 : f32
    %16 = vector.broadcast %cst_11 : f32 to vector<32x1xf32>
    %17 = arith.addf %15, %16 : vector<32x1xf32>
    %18 = math.rsqrt %17 : vector<32x1xf32>
    %19 = arith.mulf %3, %18 : vector<32x1xf32>
    %20 = arith.mulf %8, %19 : vector<32x1xf32>
    %21 = arith.subf %4, %20 : vector<32x1xf32>
    %22 = vector.broadcast %19 : vector<32x1xf32> to vector<32x49xf32>
    %23 = arith.mulf %2, %22 : vector<32x49xf32>
    %24 = vector.broadcast %21 : vector<32x1xf32> to vector<32x49xf32>
    %25 = arith.addf %23, %24 : vector<32x49xf32>
    %cst_12 = arith.constant 0.000000e+00 : f32
    %26 = vector.broadcast %cst_12 : f32 to vector<32x49xf32>
    %27 = arith.maximumf %25, %26 : vector<32x49xf32>
    %cst_13 = arith.constant 0.000000e+00 : f32
    %28 = vector.broadcast %cst_13 : f32 to vector<32x128xf32>
    %29 = vector.extract_strided_slice %27 {offsets = [0, 0], sizes = [32, 1], strides = [1, 1]} : vector<32x49xf32> to vector<32x1xf32>
    %c0_14 = arith.constant 0 : index
    %c0_15 = arith.constant 0 : index
    %c0_16 = arith.constant 0 : index
    %30 = vector.load %arg4[%c0_14, %c0_15, %c0_16] : memref<49x32x128xf32, #tpu.memory_space<vmem>>, vector<1x32x128xf32>
    %31 = vector.shape_cast %30 : vector<1x32x128xf32> to vector<32x128xf32>
    %32 = vector.broadcast %29 : vector<32x1xf32> to vector<32x128xf32>
    %33 = arith.mulf %32, %31 : vector<32x128xf32>
    %34 = arith.addf %28, %33 : vector<32x128xf32>
    %35 = vector.extract_strided_slice %27 {offsets = [0, 1], sizes = [32, 1], strides = [1, 1]} : vector<32x49xf32> to vector<32x1xf32>
    %c1 = arith.constant 1 : index
    %c0_17 = arith.constant 0 : index
    %c0_18 = arith.constant 0 : index
    %36 = vector.load %arg4[%c1, %c0_17, %c0_18] : memref<49x32x128xf32, #tpu.memory_space<vmem>>, vector<1x32x128xf32>
    %37 = vector.shape_cast %36 : vector<1x32x128xf32> to vector<32x128xf32>
    %38 = vector.broadcast %35 : vector<32x1xf32> to vector<32x128xf32>
    %39 = arith.mulf %38, %37 : vector<32x128xf32>
    %40 = arith.addf %34, %39 : vector<32x128xf32>
    %41 = vector.extract_strided_slice %27 {offsets = [0, 2], sizes = [32, 1], strides = [1, 1]} : vector<32x49xf32> to vector<32x1xf32>
    %c2 = arith.constant 2 : index
    %c0_19 = arith.constant 0 : index
    %c0_20 = arith.constant 0 : index
    %42 = vector.load %arg4[%c2, %c0_19, %c0_20] : memref<49x32x128xf32, #tpu.memory_space<vmem>>, vector<1x32x128xf32>
    %43 = vector.shape_cast %42 : vector<1x32x128xf32> to vector<32x128xf32>
    %44 = vector.broadcast %41 : vector<32x1xf32> to vector<32x128xf32>
    %45 = arith.mulf %44, %43 : vector<32x128xf32>
    %46 = arith.addf %40, %45 : vector<32x128xf32>
    %47 = vector.extract_strided_slice %27 {offsets = [0, 3], sizes = [32, 1], strides = [1, 1]} : vector<32x49xf32> to vector<32x1xf32>
    %c3 = arith.constant 3 : index
    %c0_21 = arith.constant 0 : index
    %c0_22 = arith.constant 0 : index
    %48 = vector.load %arg4[%c3, %c0_21, %c0_22] : memref<49x32x128xf32, #tpu.memory_space<vmem>>, vector<1x32x128xf32>
    %49 = vector.shape_cast %48 : vector<1x32x128xf32> to vector<32x128xf32>
    %50 = vector.broadcast %47 : vector<32x1xf32> to vector<32x128xf32>
    %51 = arith.mulf %50, %49 : vector<32x128xf32>
    %52 = arith.addf %46, %51 : vector<32x128xf32>
    %53 = vector.extract_strided_slice %27 {offsets = [0, 4], sizes = [32, 1], strides = [1, 1]} : vector<32x49xf32> to vector<32x1xf32>
    %c4 = arith.constant 4 : index
    %c0_23 = arith.constant 0 : index
    %c0_24 = arith.constant 0 : index
    %54 = vector.load %arg4[%c4, %c0_23, %c0_24] : memref<49x32x128xf32, #tpu.memory_space<vmem>>, vector<1x32x128xf32>
    %55 = vector.shape_cast %54 : vector<1x32x128xf32> to vector<32x128xf32>
    %56 = vector.broadcast %53 : vector<32x1xf32> to vector<32x128xf32>
    %57 = arith.mulf %56, %55 : vector<32x128xf32>
    %58 = arith.addf %52, %57 : vector<32x128xf32>
    %59 = vector.extract_strided_slice %27 {offsets = [0, 5], sizes = [32, 1], strides = [1, 1]} : vector<32x49xf32> to vector<32x1xf32>
    %c5 = arith.constant 5 : index
    %c0_25 = arith.constant 0 : index
    %c0_26 = arith.constant 0 : index
    %60 = vector.load %arg4[%c5, %c0_25, %c0_26] : memref<49x32x128xf32, #tpu.memory_space<vmem>>, vector<1x32x128xf32>
    %61 = vector.shape_cast %60 : vector<1x32x128xf32> to vector<32x128xf32>
    %62 = vector.broadcast %59 : vector<32x1xf32> to vector<32x128xf32>
    %63 = arith.mulf %62, %61 : vector<32x128xf32>
    %64 = arith.addf %58, %63 : vector<32x128xf32>
    %65 = vector.extract_strided_slice %27 {offsets = [0, 6], sizes = [32, 1], strides = [1, 1]} : vector<32x49xf32> to vector<32x1xf32>
    %c6 = arith.constant 6 : index
    %c0_27 = arith.constant 0 : index
    %c0_28 = arith.constant 0 : index
    %66 = vector.load %arg4[%c6, %c0_27, %c0_28] : memref<49x32x128xf32, #tpu.memory_space<vmem>>, vector<1x32x128xf32>
    %67 = vector.shape_cast %66 : vector<1x32x128xf32> to vector<32x128xf32>
    %68 = vector.broadcast %65 : vector<32x1xf32> to vector<32x128xf32>
    %69 = arith.mulf %68, %67 : vector<32x128xf32>
    %70 = arith.addf %64, %69 : vector<32x128xf32>
    %71 = vector.extract_strided_slice %27 {offsets = [0, 7], sizes = [32, 1], strides = [1, 1]} : vector<32x49xf32> to vector<32x1xf32>
    %c7 = arith.constant 7 : index
    %c0_29 = arith.constant 0 : index
    %c0_30 = arith.constant 0 : index
    %72 = vector.load %arg4[%c7, %c0_29, %c0_30] : memref<49x32x128xf32, #tpu.memory_space<vmem>>, vector<1x32x128xf32>
    %73 = vector.shape_cast %72 : vector<1x32x128xf32> to vector<32x128xf32>
    %74 = vector.broadcast %71 : vector<32x1xf32> to vector<32x128xf32>
    %75 = arith.mulf %74, %73 : vector<32x128xf32>
    %76 = arith.addf %70, %75 : vector<32x128xf32>
    %77 = vector.extract_strided_slice %27 {offsets = [0, 8], sizes = [32, 1], strides = [1, 1]} : vector<32x49xf32> to vector<32x1xf32>
    %c8 = arith.constant 8 : index
    %c0_31 = arith.constant 0 : index
    %c0_32 = arith.constant 0 : index
    %78 = vector.load %arg4[%c8, %c0_31, %c0_32] : memref<49x32x128xf32, #tpu.memory_space<vmem>>, vector<1x32x128xf32>
    %79 = vector.shape_cast %78 : vector<1x32x128xf32> to vector<32x128xf32>
    %80 = vector.broadcast %77 : vector<32x1xf32> to vector<32x128xf32>
    %81 = arith.mulf %80, %79 : vector<32x128xf32>
    %82 = arith.addf %76, %81 : vector<32x128xf32>
    %83 = vector.extract_strided_slice %27 {offsets = [0, 9], sizes = [32, 1], strides = [1, 1]} : vector<32x49xf32> to vector<32x1xf32>
    %c9 = arith.constant 9 : index
    %c0_33 = arith.constant 0 : index
    %c0_34 = arith.constant 0 : index
    %84 = vector.load %arg4[%c9, %c0_33, %c0_34] : memref<49x32x128xf32, #tpu.memory_space<vmem>>, vector<1x32x128xf32>
    %85 = vector.shape_cast %84 : vector<1x32x128xf32> to vector<32x128xf32>
    %86 = vector.broadcast %83 : vector<32x1xf32> to vector<32x128xf32>
    %87 = arith.mulf %86, %85 : vector<32x128xf32>
    %88 = arith.addf %82, %87 : vector<32x128xf32>
    %89 = vector.extract_strided_slice %27 {offsets = [0, 10], sizes = [32, 1], strides = [1, 1]} : vector<32x49xf32> to vector<32x1xf32>
    %c10 = arith.constant 10 : index
    %c0_35 = arith.constant 0 : index
    %c0_36 = arith.constant 0 : index
    %90 = vector.load %arg4[%c10, %c0_35, %c0_36] : memref<49x32x128xf32, #tpu.memory_space<vmem>>, vector<1x32x128xf32>
    %91 = vector.shape_cast %90 : vector<1x32x128xf32> to vector<32x128xf32>
    %92 = vector.broadcast %89 : vector<32x1xf32> to vector<32x128xf32>
    %93 = arith.mulf %92, %91 : vector<32x128xf32>
    %94 = arith.addf %88, %93 : vector<32x128xf32>
    %95 = vector.extract_strided_slice %27 {offsets = [0, 11], sizes = [32, 1], strides = [1, 1]} : vector<32x49xf32> to vector<32x1xf32>
    %c11 = arith.constant 11 : index
    %c0_37 = arith.constant 0 : index
    %c0_38 = arith.constant 0 : index
    %96 = vector.load %arg4[%c11, %c0_37, %c0_38] : memref<49x32x128xf32, #tpu.memory_space<vmem>>, vector<1x32x128xf32>
    %97 = vector.shape_cast %96 : vector<1x32x128xf32> to vector<32x128xf32>
    %98 = vector.broadcast %95 : vector<32x1xf32> to vector<32x128xf32>
    %99 = arith.mulf %98, %97 : vector<32x128xf32>
    %100 = arith.addf %94, %99 : vector<32x128xf32>
    %101 = vector.extract_strided_slice %27 {offsets = [0, 12], sizes = [32, 1], strides = [1, 1]} : vector<32x49xf32> to vector<32x1xf32>
    %c12 = arith.constant 12 : index
    %c0_39 = arith.constant 0 : index
    %c0_40 = arith.constant 0 : index
    %102 = vector.load %arg4[%c12, %c0_39, %c0_40] : memref<49x32x128xf32, #tpu.memory_space<vmem>>, vector<1x32x128xf32>
    %103 = vector.shape_cast %102 : vector<1x32x128xf32> to vector<32x128xf32>
    %104 = vector.broadcast %101 : vector<32x1xf32> to vector<32x128xf32>
    %105 = arith.mulf %104, %103 : vector<32x128xf32>
    %106 = arith.addf %100, %105 : vector<32x128xf32>
    %107 = vector.extract_strided_slice %27 {offsets = [0, 13], sizes = [32, 1], strides = [1, 1]} : vector<32x49xf32> to vector<32x1xf32>
    %c13 = arith.constant 13 : index
    %c0_41 = arith.constant 0 : index
    %c0_42 = arith.constant 0 : index
    %108 = vector.load %arg4[%c13, %c0_41, %c0_42] : memref<49x32x128xf32, #tpu.memory_space<vmem>>, vector<1x32x128xf32>
    %109 = vector.shape_cast %108 : vector<1x32x128xf32> to vector<32x128xf32>
    %110 = vector.broadcast %107 : vector<32x1xf32> to vector<32x128xf32>
    %111 = arith.mulf %110, %109 : vector<32x128xf32>
    %112 = arith.addf %106, %111 : vector<32x128xf32>
    %113 = vector.extract_strided_slice %27 {offsets = [0, 14], sizes = [32, 1], strides = [1, 1]} : vector<32x49xf32> to vector<32x1xf32>
    %c14 = arith.constant 14 : index
    %c0_43 = arith.constant 0 : index
    %c0_44 = arith.constant 0 : index
    %114 = vector.load %arg4[%c14, %c0_43, %c0_44] : memref<49x32x128xf32, #tpu.memory_space<vmem>>, vector<1x32x128xf32>
    %115 = vector.shape_cast %114 : vector<1x32x128xf32> to vector<32x128xf32>
    %116 = vector.broadcast %113 : vector<32x1xf32> to vector<32x128xf32>
    %117 = arith.mulf %116, %115 : vector<32x128xf32>
    %118 = arith.addf %112, %117 : vector<32x128xf32>
    %119 = vector.extract_strided_slice %27 {offsets = [0, 15], sizes = [32, 1], strides = [1, 1]} : vector<32x49xf32> to vector<32x1xf32>
    %c15 = arith.constant 15 : index
    %c0_45 = arith.constant 0 : index
    %c0_46 = arith.constant 0 : index
    %120 = vector.load %arg4[%c15, %c0_45, %c0_46] : memref<49x32x128xf32, #tpu.memory_space<vmem>>, vector<1x32x128xf32>
    %121 = vector.shape_cast %120 : vector<1x32x128xf32> to vector<32x128xf32>
    %122 = vector.broadcast %119 : vector<32x1xf32> to vector<32x128xf32>
    %123 = arith.mulf %122, %121 : vector<32x128xf32>
    %124 = arith.addf %118, %123 : vector<32x128xf32>
    %125 = vector.extract_strided_slice %27 {offsets = [0, 16], sizes = [32, 1], strides = [1, 1]} : vector<32x49xf32> to vector<32x1xf32>
    %c16 = arith.constant 16 : index
    %c0_47 = arith.constant 0 : index
    %c0_48 = arith.constant 0 : index
    %126 = vector.load %arg4[%c16, %c0_47, %c0_48] : memref<49x32x128xf32, #tpu.memory_space<vmem>>, vector<1x32x128xf32>
    %127 = vector.shape_cast %126 : vector<1x32x128xf32> to vector<32x128xf32>
    %128 = vector.broadcast %125 : vector<32x1xf32> to vector<32x128xf32>
    %129 = arith.mulf %128, %127 : vector<32x128xf32>
    %130 = arith.addf %124, %129 : vector<32x128xf32>
    %131 = vector.extract_strided_slice %27 {offsets = [0, 17], sizes = [32, 1], strides = [1, 1]} : vector<32x49xf32> to vector<32x1xf32>
    %c17 = arith.constant 17 : index
    %c0_49 = arith.constant 0 : index
    %c0_50 = arith.constant 0 : index
    %132 = vector.load %arg4[%c17, %c0_49, %c0_50] : memref<49x32x128xf32, #tpu.memory_space<vmem>>, vector<1x32x128xf32>
    %133 = vector.shape_cast %132 : vector<1x32x128xf32> to vector<32x128xf32>
    %134 = vector.broadcast %131 : vector<32x1xf32> to vector<32x128xf32>
    %135 = arith.mulf %134, %133 : vector<32x128xf32>
    %136 = arith.addf %130, %135 : vector<32x128xf32>
    %137 = vector.extract_strided_slice %27 {offsets = [0, 18], sizes = [32, 1], strides = [1, 1]} : vector<32x49xf32> to vector<32x1xf32>
    %c18 = arith.constant 18 : index
    %c0_51 = arith.constant 0 : index
    %c0_52 = arith.constant 0 : index
    %138 = vector.load %arg4[%c18, %c0_51, %c0_52] : memref<49x32x128xf32, #tpu.memory_space<vmem>>, vector<1x32x128xf32>
    %139 = vector.shape_cast %138 : vector<1x32x128xf32> to vector<32x128xf32>
    %140 = vector.broadcast %137 : vector<32x1xf32> to vector<32x128xf32>
    %141 = arith.mulf %140, %139 : vector<32x128xf32>
    %142 = arith.addf %136, %141 : vector<32x128xf32>
    %143 = vector.extract_strided_slice %27 {offsets = [0, 19], sizes = [32, 1], strides = [1, 1]} : vector<32x49xf32> to vector<32x1xf32>
    %c19 = arith.constant 19 : index
    %c0_53 = arith.constant 0 : index
    %c0_54 = arith.constant 0 : index
    %144 = vector.load %arg4[%c19, %c0_53, %c0_54] : memref<49x32x128xf32, #tpu.memory_space<vmem>>, vector<1x32x128xf32>
    %145 = vector.shape_cast %144 : vector<1x32x128xf32> to vector<32x128xf32>
    %146 = vector.broadcast %143 : vector<32x1xf32> to vector<32x128xf32>
    %147 = arith.mulf %146, %145 : vector<32x128xf32>
    %148 = arith.addf %142, %147 : vector<32x128xf32>
    %149 = vector.extract_strided_slice %27 {offsets = [0, 20], sizes = [32, 1], strides = [1, 1]} : vector<32x49xf32> to vector<32x1xf32>
    %c20 = arith.constant 20 : index
    %c0_55 = arith.constant 0 : index
    %c0_56 = arith.constant 0 : index
    %150 = vector.load %arg4[%c20, %c0_55, %c0_56] : memref<49x32x128xf32, #tpu.memory_space<vmem>>, vector<1x32x128xf32>
    %151 = vector.shape_cast %150 : vector<1x32x128xf32> to vector<32x128xf32>
    %152 = vector.broadcast %149 : vector<32x1xf32> to vector<32x128xf32>
    %153 = arith.mulf %152, %151 : vector<32x128xf32>
    %154 = arith.addf %148, %153 : vector<32x128xf32>
    %155 = vector.extract_strided_slice %27 {offsets = [0, 21], sizes = [32, 1], strides = [1, 1]} : vector<32x49xf32> to vector<32x1xf32>
    %c21 = arith.constant 21 : index
    %c0_57 = arith.constant 0 : index
    %c0_58 = arith.constant 0 : index
    %156 = vector.load %arg4[%c21, %c0_57, %c0_58] : memref<49x32x128xf32, #tpu.memory_space<vmem>>, vector<1x32x128xf32>
    %157 = vector.shape_cast %156 : vector<1x32x128xf32> to vector<32x128xf32>
    %158 = vector.broadcast %155 : vector<32x1xf32> to vector<32x128xf32>
    %159 = arith.mulf %158, %157 : vector<32x128xf32>
    %160 = arith.addf %154, %159 : vector<32x128xf32>
    %161 = vector.extract_strided_slice %27 {offsets = [0, 22], sizes = [32, 1], strides = [1, 1]} : vector<32x49xf32> to vector<32x1xf32>
    %c22 = arith.constant 22 : index
    %c0_59 = arith.constant 0 : index
    %c0_60 = arith.constant 0 : index
    %162 = vector.load %arg4[%c22, %c0_59, %c0_60] : memref<49x32x128xf32, #tpu.memory_space<vmem>>, vector<1x32x128xf32>
    %163 = vector.shape_cast %162 : vector<1x32x128xf32> to vector<32x128xf32>
    %164 = vector.broadcast %161 : vector<32x1xf32> to vector<32x128xf32>
    %165 = arith.mulf %164, %163 : vector<32x128xf32>
    %166 = arith.addf %160, %165 : vector<32x128xf32>
    %167 = vector.extract_strided_slice %27 {offsets = [0, 23], sizes = [32, 1], strides = [1, 1]} : vector<32x49xf32> to vector<32x1xf32>
    %c23 = arith.constant 23 : index
    %c0_61 = arith.constant 0 : index
    %c0_62 = arith.constant 0 : index
    %168 = vector.load %arg4[%c23, %c0_61, %c0_62] : memref<49x32x128xf32, #tpu.memory_space<vmem>>, vector<1x32x128xf32>
    %169 = vector.shape_cast %168 : vector<1x32x128xf32> to vector<32x128xf32>
    %170 = vector.broadcast %167 : vector<32x1xf32> to vector<32x128xf32>
    %171 = arith.mulf %170, %169 : vector<32x128xf32>
    %172 = arith.addf %166, %171 : vector<32x128xf32>
    %173 = vector.extract_strided_slice %27 {offsets = [0, 24], sizes = [32, 1], strides = [1, 1]} : vector<32x49xf32> to vector<32x1xf32>
    %c24 = arith.constant 24 : index
    %c0_63 = arith.constant 0 : index
    %c0_64 = arith.constant 0 : index
    %174 = vector.load %arg4[%c24, %c0_63, %c0_64] : memref<49x32x128xf32, #tpu.memory_space<vmem>>, vector<1x32x128xf32>
    %175 = vector.shape_cast %174 : vector<1x32x128xf32> to vector<32x128xf32>
    %176 = vector.broadcast %173 : vector<32x1xf32> to vector<32x128xf32>
    %177 = arith.mulf %176, %175 : vector<32x128xf32>
    %178 = arith.addf %172, %177 : vector<32x128xf32>
    %179 = vector.extract_strided_slice %27 {offsets = [0, 25], sizes = [32, 1], strides = [1, 1]} : vector<32x49xf32> to vector<32x1xf32>
    %c25 = arith.constant 25 : index
    %c0_65 = arith.constant 0 : index
    %c0_66 = arith.constant 0 : index
    %180 = vector.load %arg4[%c25, %c0_65, %c0_66] : memref<49x32x128xf32, #tpu.memory_space<vmem>>, vector<1x32x128xf32>
    %181 = vector.shape_cast %180 : vector<1x32x128xf32> to vector<32x128xf32>
    %182 = vector.broadcast %179 : vector<32x1xf32> to vector<32x128xf32>
    %183 = arith.mulf %182, %181 : vector<32x128xf32>
    %184 = arith.addf %178, %183 : vector<32x128xf32>
    %185 = vector.extract_strided_slice %27 {offsets = [0, 26], sizes = [32, 1], strides = [1, 1]} : vector<32x49xf32> to vector<32x1xf32>
    %c26 = arith.constant 26 : index
    %c0_67 = arith.constant 0 : index
    %c0_68 = arith.constant 0 : index
    %186 = vector.load %arg4[%c26, %c0_67, %c0_68] : memref<49x32x128xf32, #tpu.memory_space<vmem>>, vector<1x32x128xf32>
    %187 = vector.shape_cast %186 : vector<1x32x128xf32> to vector<32x128xf32>
    %188 = vector.broadcast %185 : vector<32x1xf32> to vector<32x128xf32>
    %189 = arith.mulf %188, %187 : vector<32x128xf32>
    %190 = arith.addf %184, %189 : vector<32x128xf32>
    %191 = vector.extract_strided_slice %27 {offsets = [0, 27], sizes = [32, 1], strides = [1, 1]} : vector<32x49xf32> to vector<32x1xf32>
    %c27 = arith.constant 27 : index
    %c0_69 = arith.constant 0 : index
    %c0_70 = arith.constant 0 : index
    %192 = vector.load %arg4[%c27, %c0_69, %c0_70] : memref<49x32x128xf32, #tpu.memory_space<vmem>>, vector<1x32x128xf32>
    %193 = vector.shape_cast %192 : vector<1x32x128xf32> to vector<32x128xf32>
    %194 = vector.broadcast %191 : vector<32x1xf32> to vector<32x128xf32>
    %195 = arith.mulf %194, %193 : vector<32x128xf32>
    %196 = arith.addf %190, %195 : vector<32x128xf32>
    %197 = vector.extract_strided_slice %27 {offsets = [0, 28], sizes = [32, 1], strides = [1, 1]} : vector<32x49xf32> to vector<32x1xf32>
    %c28 = arith.constant 28 : index
    %c0_71 = arith.constant 0 : index
    %c0_72 = arith.constant 0 : index
    %198 = vector.load %arg4[%c28, %c0_71, %c0_72] : memref<49x32x128xf32, #tpu.memory_space<vmem>>, vector<1x32x128xf32>
    %199 = vector.shape_cast %198 : vector<1x32x128xf32> to vector<32x128xf32>
    %200 = vector.broadcast %197 : vector<32x1xf32> to vector<32x128xf32>
    %201 = arith.mulf %200, %199 : vector<32x128xf32>
    %202 = arith.addf %196, %201 : vector<32x128xf32>
    %203 = vector.extract_strided_slice %27 {offsets = [0, 29], sizes = [32, 1], strides = [1, 1]} : vector<32x49xf32> to vector<32x1xf32>
    %c29 = arith.constant 29 : index
    %c0_73 = arith.constant 0 : index
    %c0_74 = arith.constant 0 : index
    %204 = vector.load %arg4[%c29, %c0_73, %c0_74] : memref<49x32x128xf32, #tpu.memory_space<vmem>>, vector<1x32x128xf32>
    %205 = vector.shape_cast %204 : vector<1x32x128xf32> to vector<32x128xf32>
    %206 = vector.broadcast %203 : vector<32x1xf32> to vector<32x128xf32>
    %207 = arith.mulf %206, %205 : vector<32x128xf32>
    %208 = arith.addf %202, %207 : vector<32x128xf32>
    %209 = vector.extract_strided_slice %27 {offsets = [0, 30], sizes = [32, 1], strides = [1, 1]} : vector<32x49xf32> to vector<32x1xf32>
    %c30 = arith.constant 30 : index
    %c0_75 = arith.constant 0 : index
    %c0_76 = arith.constant 0 : index
    %210 = vector.load %arg4[%c30, %c0_75, %c0_76] : memref<49x32x128xf32, #tpu.memory_space<vmem>>, vector<1x32x128xf32>
    %211 = vector.shape_cast %210 : vector<1x32x128xf32> to vector<32x128xf32>
    %212 = vector.broadcast %209 : vector<32x1xf32> to vector<32x128xf32>
    %213 = arith.mulf %212, %211 : vector<32x128xf32>
    %214 = arith.addf %208, %213 : vector<32x128xf32>
    %215 = vector.extract_strided_slice %27 {offsets = [0, 31], sizes = [32, 1], strides = [1, 1]} : vector<32x49xf32> to vector<32x1xf32>
    %c31 = arith.constant 31 : index
    %c0_77 = arith.constant 0 : index
    %c0_78 = arith.constant 0 : index
    %216 = vector.load %arg4[%c31, %c0_77, %c0_78] : memref<49x32x128xf32, #tpu.memory_space<vmem>>, vector<1x32x128xf32>
    %217 = vector.shape_cast %216 : vector<1x32x128xf32> to vector<32x128xf32>
    %218 = vector.broadcast %215 : vector<32x1xf32> to vector<32x128xf32>
    %219 = arith.mulf %218, %217 : vector<32x128xf32>
    %220 = arith.addf %214, %219 : vector<32x128xf32>
    %221 = vector.extract_strided_slice %27 {offsets = [0, 32], sizes = [32, 1], strides = [1, 1]} : vector<32x49xf32> to vector<32x1xf32>
    %c32 = arith.constant 32 : index
    %c0_79 = arith.constant 0 : index
    %c0_80 = arith.constant 0 : index
    %222 = vector.load %arg4[%c32, %c0_79, %c0_80] : memref<49x32x128xf32, #tpu.memory_space<vmem>>, vector<1x32x128xf32>
    %223 = vector.shape_cast %222 : vector<1x32x128xf32> to vector<32x128xf32>
    %224 = vector.broadcast %221 : vector<32x1xf32> to vector<32x128xf32>
    %225 = arith.mulf %224, %223 : vector<32x128xf32>
    %226 = arith.addf %220, %225 : vector<32x128xf32>
    %227 = vector.extract_strided_slice %27 {offsets = [0, 33], sizes = [32, 1], strides = [1, 1]} : vector<32x49xf32> to vector<32x1xf32>
    %c33 = arith.constant 33 : index
    %c0_81 = arith.constant 0 : index
    %c0_82 = arith.constant 0 : index
    %228 = vector.load %arg4[%c33, %c0_81, %c0_82] : memref<49x32x128xf32, #tpu.memory_space<vmem>>, vector<1x32x128xf32>
    %229 = vector.shape_cast %228 : vector<1x32x128xf32> to vector<32x128xf32>
    %230 = vector.broadcast %227 : vector<32x1xf32> to vector<32x128xf32>
    %231 = arith.mulf %230, %229 : vector<32x128xf32>
    %232 = arith.addf %226, %231 : vector<32x128xf32>
    %233 = vector.extract_strided_slice %27 {offsets = [0, 34], sizes = [32, 1], strides = [1, 1]} : vector<32x49xf32> to vector<32x1xf32>
    %c34 = arith.constant 34 : index
    %c0_83 = arith.constant 0 : index
    %c0_84 = arith.constant 0 : index
    %234 = vector.load %arg4[%c34, %c0_83, %c0_84] : memref<49x32x128xf32, #tpu.memory_space<vmem>>, vector<1x32x128xf32>
    %235 = vector.shape_cast %234 : vector<1x32x128xf32> to vector<32x128xf32>
    %236 = vector.broadcast %233 : vector<32x1xf32> to vector<32x128xf32>
    %237 = arith.mulf %236, %235 : vector<32x128xf32>
    %238 = arith.addf %232, %237 : vector<32x128xf32>
    %239 = vector.extract_strided_slice %27 {offsets = [0, 35], sizes = [32, 1], strides = [1, 1]} : vector<32x49xf32> to vector<32x1xf32>
    %c35 = arith.constant 35 : index
    %c0_85 = arith.constant 0 : index
    %c0_86 = arith.constant 0 : index
    %240 = vector.load %arg4[%c35, %c0_85, %c0_86] : memref<49x32x128xf32, #tpu.memory_space<vmem>>, vector<1x32x128xf32>
    %241 = vector.shape_cast %240 : vector<1x32x128xf32> to vector<32x128xf32>
    %242 = vector.broadcast %239 : vector<32x1xf32> to vector<32x128xf32>
    %243 = arith.mulf %242, %241 : vector<32x128xf32>
    %244 = arith.addf %238, %243 : vector<32x128xf32>
    %245 = vector.extract_strided_slice %27 {offsets = [0, 36], sizes = [32, 1], strides = [1, 1]} : vector<32x49xf32> to vector<32x1xf32>
    %c36 = arith.constant 36 : index
    %c0_87 = arith.constant 0 : index
    %c0_88 = arith.constant 0 : index
    %246 = vector.load %arg4[%c36, %c0_87, %c0_88] : memref<49x32x128xf32, #tpu.memory_space<vmem>>, vector<1x32x128xf32>
    %247 = vector.shape_cast %246 : vector<1x32x128xf32> to vector<32x128xf32>
    %248 = vector.broadcast %245 : vector<32x1xf32> to vector<32x128xf32>
    %249 = arith.mulf %248, %247 : vector<32x128xf32>
    %250 = arith.addf %244, %249 : vector<32x128xf32>
    %251 = vector.extract_strided_slice %27 {offsets = [0, 37], sizes = [32, 1], strides = [1, 1]} : vector<32x49xf32> to vector<32x1xf32>
    %c37 = arith.constant 37 : index
    %c0_89 = arith.constant 0 : index
    %c0_90 = arith.constant 0 : index
    %252 = vector.load %arg4[%c37, %c0_89, %c0_90] : memref<49x32x128xf32, #tpu.memory_space<vmem>>, vector<1x32x128xf32>
    %253 = vector.shape_cast %252 : vector<1x32x128xf32> to vector<32x128xf32>
    %254 = vector.broadcast %251 : vector<32x1xf32> to vector<32x128xf32>
    %255 = arith.mulf %254, %253 : vector<32x128xf32>
    %256 = arith.addf %250, %255 : vector<32x128xf32>
    %257 = vector.extract_strided_slice %27 {offsets = [0, 38], sizes = [32, 1], strides = [1, 1]} : vector<32x49xf32> to vector<32x1xf32>
    %c38 = arith.constant 38 : index
    %c0_91 = arith.constant 0 : index
    %c0_92 = arith.constant 0 : index
    %258 = vector.load %arg4[%c38, %c0_91, %c0_92] : memref<49x32x128xf32, #tpu.memory_space<vmem>>, vector<1x32x128xf32>
    %259 = vector.shape_cast %258 : vector<1x32x128xf32> to vector<32x128xf32>
    %260 = vector.broadcast %257 : vector<32x1xf32> to vector<32x128xf32>
    %261 = arith.mulf %260, %259 : vector<32x128xf32>
    %262 = arith.addf %256, %261 : vector<32x128xf32>
    %263 = vector.extract_strided_slice %27 {offsets = [0, 39], sizes = [32, 1], strides = [1, 1]} : vector<32x49xf32> to vector<32x1xf32>
    %c39 = arith.constant 39 : index
    %c0_93 = arith.constant 0 : index
    %c0_94 = arith.constant 0 : index
    %264 = vector.load %arg4[%c39, %c0_93, %c0_94] : memref<49x32x128xf32, #tpu.memory_space<vmem>>, vector<1x32x128xf32>
    %265 = vector.shape_cast %264 : vector<1x32x128xf32> to vector<32x128xf32>
    %266 = vector.broadcast %263 : vector<32x1xf32> to vector<32x128xf32>
    %267 = arith.mulf %266, %265 : vector<32x128xf32>
    %268 = arith.addf %262, %267 : vector<32x128xf32>
    %269 = vector.extract_strided_slice %27 {offsets = [0, 40], sizes = [32, 1], strides = [1, 1]} : vector<32x49xf32> to vector<32x1xf32>
    %c40 = arith.constant 40 : index
    %c0_95 = arith.constant 0 : index
    %c0_96 = arith.constant 0 : index
    %270 = vector.load %arg4[%c40, %c0_95, %c0_96] : memref<49x32x128xf32, #tpu.memory_space<vmem>>, vector<1x32x128xf32>
    %271 = vector.shape_cast %270 : vector<1x32x128xf32> to vector<32x128xf32>
    %272 = vector.broadcast %269 : vector<32x1xf32> to vector<32x128xf32>
    %273 = arith.mulf %272, %271 : vector<32x128xf32>
    %274 = arith.addf %268, %273 : vector<32x128xf32>
    %275 = vector.extract_strided_slice %27 {offsets = [0, 41], sizes = [32, 1], strides = [1, 1]} : vector<32x49xf32> to vector<32x1xf32>
    %c41 = arith.constant 41 : index
    %c0_97 = arith.constant 0 : index
    %c0_98 = arith.constant 0 : index
    %276 = vector.load %arg4[%c41, %c0_97, %c0_98] : memref<49x32x128xf32, #tpu.memory_space<vmem>>, vector<1x32x128xf32>
    %277 = vector.shape_cast %276 : vector<1x32x128xf32> to vector<32x128xf32>
    %278 = vector.broadcast %275 : vector<32x1xf32> to vector<32x128xf32>
    %279 = arith.mulf %278, %277 : vector<32x128xf32>
    %280 = arith.addf %274, %279 : vector<32x128xf32>
    %281 = vector.extract_strided_slice %27 {offsets = [0, 42], sizes = [32, 1], strides = [1, 1]} : vector<32x49xf32> to vector<32x1xf32>
    %c42 = arith.constant 42 : index
    %c0_99 = arith.constant 0 : index
    %c0_100 = arith.constant 0 : index
    %282 = vector.load %arg4[%c42, %c0_99, %c0_100] : memref<49x32x128xf32, #tpu.memory_space<vmem>>, vector<1x32x128xf32>
    %283 = vector.shape_cast %282 : vector<1x32x128xf32> to vector<32x128xf32>
    %284 = vector.broadcast %281 : vector<32x1xf32> to vector<32x128xf32>
    %285 = arith.mulf %284, %283 : vector<32x128xf32>
    %286 = arith.addf %280, %285 : vector<32x128xf32>
    %287 = vector.extract_strided_slice %27 {offsets = [0, 43], sizes = [32, 1], strides = [1, 1]} : vector<32x49xf32> to vector<32x1xf32>
    %c43 = arith.constant 43 : index
    %c0_101 = arith.constant 0 : index
    %c0_102 = arith.constant 0 : index
    %288 = vector.load %arg4[%c43, %c0_101, %c0_102] : memref<49x32x128xf32, #tpu.memory_space<vmem>>, vector<1x32x128xf32>
    %289 = vector.shape_cast %288 : vector<1x32x128xf32> to vector<32x128xf32>
    %290 = vector.broadcast %287 : vector<32x1xf32> to vector<32x128xf32>
    %291 = arith.mulf %290, %289 : vector<32x128xf32>
    %292 = arith.addf %286, %291 : vector<32x128xf32>
    %293 = vector.extract_strided_slice %27 {offsets = [0, 44], sizes = [32, 1], strides = [1, 1]} : vector<32x49xf32> to vector<32x1xf32>
    %c44 = arith.constant 44 : index
    %c0_103 = arith.constant 0 : index
    %c0_104 = arith.constant 0 : index
    %294 = vector.load %arg4[%c44, %c0_103, %c0_104] : memref<49x32x128xf32, #tpu.memory_space<vmem>>, vector<1x32x128xf32>
    %295 = vector.shape_cast %294 : vector<1x32x128xf32> to vector<32x128xf32>
    %296 = vector.broadcast %293 : vector<32x1xf32> to vector<32x128xf32>
    %297 = arith.mulf %296, %295 : vector<32x128xf32>
    %298 = arith.addf %292, %297 : vector<32x128xf32>
    %299 = vector.extract_strided_slice %27 {offsets = [0, 45], sizes = [32, 1], strides = [1, 1]} : vector<32x49xf32> to vector<32x1xf32>
    %c45 = arith.constant 45 : index
    %c0_105 = arith.constant 0 : index
    %c0_106 = arith.constant 0 : index
    %300 = vector.load %arg4[%c45, %c0_105, %c0_106] : memref<49x32x128xf32, #tpu.memory_space<vmem>>, vector<1x32x128xf32>
    %301 = vector.shape_cast %300 : vector<1x32x128xf32> to vector<32x128xf32>
    %302 = vector.broadcast %299 : vector<32x1xf32> to vector<32x128xf32>
    %303 = arith.mulf %302, %301 : vector<32x128xf32>
    %304 = arith.addf %298, %303 : vector<32x128xf32>
    %305 = vector.extract_strided_slice %27 {offsets = [0, 46], sizes = [32, 1], strides = [1, 1]} : vector<32x49xf32> to vector<32x1xf32>
    %c46 = arith.constant 46 : index
    %c0_107 = arith.constant 0 : index
    %c0_108 = arith.constant 0 : index
    %306 = vector.load %arg4[%c46, %c0_107, %c0_108] : memref<49x32x128xf32, #tpu.memory_space<vmem>>, vector<1x32x128xf32>
    %307 = vector.shape_cast %306 : vector<1x32x128xf32> to vector<32x128xf32>
    %308 = vector.broadcast %305 : vector<32x1xf32> to vector<32x128xf32>
    %309 = arith.mulf %308, %307 : vector<32x128xf32>
    %310 = arith.addf %304, %309 : vector<32x128xf32>
    %311 = vector.extract_strided_slice %27 {offsets = [0, 47], sizes = [32, 1], strides = [1, 1]} : vector<32x49xf32> to vector<32x1xf32>
    %c47 = arith.constant 47 : index
    %c0_109 = arith.constant 0 : index
    %c0_110 = arith.constant 0 : index
    %312 = vector.load %arg4[%c47, %c0_109, %c0_110] : memref<49x32x128xf32, #tpu.memory_space<vmem>>, vector<1x32x128xf32>
    %313 = vector.shape_cast %312 : vector<1x32x128xf32> to vector<32x128xf32>
    %314 = vector.broadcast %311 : vector<32x1xf32> to vector<32x128xf32>
    %315 = arith.mulf %314, %313 : vector<32x128xf32>
    %316 = arith.addf %310, %315 : vector<32x128xf32>
    %317 = vector.extract_strided_slice %27 {offsets = [0, 48], sizes = [32, 1], strides = [1, 1]} : vector<32x49xf32> to vector<32x1xf32>
    %c48 = arith.constant 48 : index
    %c0_111 = arith.constant 0 : index
    %c0_112 = arith.constant 0 : index
    %318 = vector.load %arg4[%c48, %c0_111, %c0_112] : memref<49x32x128xf32, #tpu.memory_space<vmem>>, vector<1x32x128xf32>
    %319 = vector.shape_cast %318 : vector<1x32x128xf32> to vector<32x128xf32>
    %320 = vector.broadcast %317 : vector<32x1xf32> to vector<32x128xf32>
    %321 = arith.mulf %320, %319 : vector<32x128xf32>
    %322 = arith.addf %316, %321 : vector<32x128xf32>
    %cst_113 = arith.constant dense<0.000000e+00> : vector<128xf32>
    %323 = vector.multi_reduction <add>, %322, %cst_113 [0] : vector<32x128xf32> to vector<128xf32>
    %324 = vector.shape_cast %323 : vector<128xf32> to vector<1x128xf32>
    %c0_114 = arith.constant 0 : index
    %c0_115 = arith.constant 0 : index
    %325 = vector.load %arg5[%c0_114, %c0_115] : memref<1x128xf32, #tpu.memory_space<vmem>>, vector<1x128xf32>
    %326 = arith.addf %324, %325 : vector<1x128xf32>
    %c0_116 = arith.constant 0 : index
    %c0_117 = arith.constant 0 : index
    %327 = vector.load %arg6[%c0_116, %c0_117] : memref<6x6xbf16, #tpu.memory_space<vmem>>, vector<6x6xbf16>
    %c0_118 = arith.constant 0 : index
    %c0_119 = arith.constant 0 : index
    %328 = vector.load %arg7[%c0_118, %c0_119] : memref<6x384xbf16, #tpu.memory_space<vmem>>, vector<6x384xbf16>
    %cst_120 = arith.constant dense<0.000000e+00> : vector<6x384xf32>
    %329 = tpu.matmul %327, %328, %cst_120 {dimension_numbers = #tpu.dot_dimension_numbers<[1], [0], [0], [1], [0, 0, 1, 1], [], []>} : vector<6x6xbf16>, vector<6x384xbf16>, vector<6x384xf32> -> vector<6x384xf32>
    %c0_121 = arith.constant 0 : index
    %c0_122 = arith.constant 0 : index
    %330 = vector.load %arg8[%c0_121, %c0_122] : memref<1x384xf32, #tpu.memory_space<vmem>>, vector<1x384xf32>
    %331 = vector.broadcast %330 : vector<1x384xf32> to vector<6x384xf32>
    %332 = arith.addf %329, %331 : vector<6x384xf32>
    %333 = arith.truncf %326 : vector<1x128xf32> to vector<1x128xbf16>
    %c0_123 = arith.constant 0 : index
    %c0_124 = arith.constant 0 : index
    %334 = vector.load %arg9[%c0_123, %c0_124] : memref<128x128xbf16, #tpu.memory_space<vmem>>, vector<128x128xbf16>
    %cst_125 = arith.constant dense<0.000000e+00> : vector<1x128xf32>
    %335 = tpu.matmul %333, %334, %cst_125 {dimension_numbers = #tpu.dot_dimension_numbers<[1], [0], [0], [1], [0, 0, 1, 1], [], []>} : vector<1x128xbf16>, vector<128x128xbf16>, vector<1x128xf32> -> vector<1x128xf32>
    %c0_126 = arith.constant 0 : index
    %c0_127 = arith.constant 0 : index
    %336 = vector.load %arg10[%c0_126, %c0_127] : memref<1x128xf32, #tpu.memory_space<vmem>>, vector<1x128xf32>
    %337 = arith.addf %335, %336 : vector<1x128xf32>
    %338 = vector.extract_strided_slice %332 {offsets = [0, 0], sizes = [1, 128], strides = [1, 1]} : vector<6x384xf32> to vector<1x128xf32>
    %339 = arith.addf %337, %338 : vector<1x128xf32>
    %cst_128 = arith.constant 0.000000e+00 : f32
    %340 = vector.broadcast %cst_128 : f32 to vector<1x128xf32>
    %341 = arith.maximumf %339, %340 : vector<1x128xf32>
    %342 = arith.truncf %341 : vector<1x128xf32> to vector<1x128xbf16>
    %c0_129 = arith.constant 0 : index
    %c0_130 = arith.constant 0 : index
    %343 = vector.load %arg11[%c0_129, %c0_130] : memref<128x128xbf16, #tpu.memory_space<vmem>>, vector<128x128xbf16>
    %cst_131 = arith.constant dense<0.000000e+00> : vector<1x128xf32>
    %344 = tpu.matmul %342, %343, %cst_131 {dimension_numbers = #tpu.dot_dimension_numbers<[1], [0], [0], [1], [0, 0, 1, 1], [], []>} : vector<1x128xbf16>, vector<128x128xbf16>, vector<1x128xf32> -> vector<1x128xf32>
    %c0_132 = arith.constant 0 : index
    %c0_133 = arith.constant 0 : index
    %345 = vector.load %arg12[%c0_132, %c0_133] : memref<1x128xf32, #tpu.memory_space<vmem>>, vector<1x128xf32>
    %346 = arith.addf %344, %345 : vector<1x128xf32>
    %347 = vector.extract_strided_slice %332 {offsets = [0, 128], sizes = [1, 128], strides = [1, 1]} : vector<6x384xf32> to vector<1x128xf32>
    %348 = arith.addf %346, %347 : vector<1x128xf32>
    %cst_134 = arith.constant 0.000000e+00 : f32
    %349 = vector.broadcast %cst_134 : f32 to vector<1x128xf32>
    %350 = arith.maximumf %348, %349 : vector<1x128xf32>
    %351 = arith.truncf %350 : vector<1x128xf32> to vector<1x128xbf16>
    %c0_135 = arith.constant 0 : index
    %c0_136 = arith.constant 0 : index
    %352 = vector.load %arg13[%c0_135, %c0_136] : memref<128x128xbf16, #tpu.memory_space<vmem>>, vector<128x128xbf16>
    %cst_137 = arith.constant dense<0.000000e+00> : vector<1x128xf32>
    %353 = tpu.matmul %351, %352, %cst_137 {dimension_numbers = #tpu.dot_dimension_numbers<[1], [0], [0], [1], [0, 0, 1, 1], [], []>} : vector<1x128xbf16>, vector<128x128xbf16>, vector<1x128xf32> -> vector<1x128xf32>
    %c0_138 = arith.constant 0 : index
    %c0_139 = arith.constant 0 : index
    %354 = vector.load %arg14[%c0_138, %c0_139] : memref<1x128xf32, #tpu.memory_space<vmem>>, vector<1x128xf32>
    %355 = arith.addf %353, %354 : vector<1x128xf32>
    %356 = vector.extract_strided_slice %332 {offsets = [0, 256], sizes = [1, 128], strides = [1, 1]} : vector<6x384xf32> to vector<1x128xf32>
    %357 = arith.addf %355, %356 : vector<1x128xf32>
    %cst_140 = arith.constant 0.000000e+00 : f32
    %358 = vector.broadcast %cst_140 : f32 to vector<1x128xf32>
    %359 = arith.maximumf %357, %358 : vector<1x128xf32>
    %c0_141 = arith.constant 0 : index
    %c0_142 = arith.constant 0 : index
    %360 = vector.load %arg18[%c0_141, %c0_142] : memref<6x128xf32, #tpu.memory_space<vmem>>, vector<1x128xf32>
    tpu.vector_store %arg18[%c0_141, %c0_142], %359 {strides = array<i32>} : memref<6x128xf32, #tpu.memory_space<vmem>>, vector<1x128xf32>,
    %361 = arith.truncf %359 : vector<1x128xf32> to vector<1x128xbf16>
    %c0_143 = arith.constant 0 : index
    %c0_144 = arith.constant 0 : index
    %362 = vector.load %arg9[%c0_143, %c0_144] : memref<128x128xbf16, #tpu.memory_space<vmem>>, vector<128x128xbf16>
    %cst_145 = arith.constant dense<0.000000e+00> : vector<1x128xf32>
    %363 = tpu.matmul %361, %362, %cst_145 {dimension_numbers = #tpu.dot_dimension_numbers<[1], [0], [0], [1], [0, 0, 1, 1], [], []>} : vector<1x128xbf16>, vector<128x128xbf16>, vector<1x128xf32> -> vector<1x128xf32>
    %c0_146 = arith.constant 0 : index
    %c0_147 = arith.constant 0 : index
    %364 = vector.load %arg10[%c0_146, %c0_147] : memref<1x128xf32, #tpu.memory_space<vmem>>, vector<1x128xf32>
    %365 = arith.addf %363, %364 : vector<1x128xf32>
    %366 = vector.extract_strided_slice %332 {offsets = [1, 0], sizes = [1, 128], strides = [1, 1]} : vector<6x384xf32> to vector<1x128xf32>
    %367 = arith.addf %365, %366 : vector<1x128xf32>
    %cst_148 = arith.constant 0.000000e+00 : f32
    %368 = vector.broadcast %cst_148 : f32 to vector<1x128xf32>
    %369 = arith.maximumf %367, %368 : vector<1x128xf32>
    %370 = arith.truncf %369 : vector<1x128xf32> to vector<1x128xbf16>
    %c0_149 = arith.constant 0 : index
    %c0_150 = arith.constant 0 : index
    %371 = vector.load %arg11[%c0_149, %c0_150] : memref<128x128xbf16, #tpu.memory_space<vmem>>, vector<128x128xbf16>
    %cst_151 = arith.constant dense<0.000000e+00> : vector<1x128xf32>
    %372 = tpu.matmul %370, %371, %cst_151 {dimension_numbers = #tpu.dot_dimension_numbers<[1], [0], [0], [1], [0, 0, 1, 1], [], []>} : vector<1x128xbf16>, vector<128x128xbf16>, vector<1x128xf32> -> vector<1x128xf32>
    %c0_152 = arith.constant 0 : index
    %c0_153 = arith.constant 0 : index
    %373 = vector.load %arg12[%c0_152, %c0_153] : memref<1x128xf32, #tpu.memory_space<vmem>>, vector<1x128xf32>
    %374 = arith.addf %372, %373 : vector<1x128xf32>
    %375 = vector.extract_strided_slice %332 {offsets = [1, 128], sizes = [1, 128], strides = [1, 1]} : vector<6x384xf32> to vector<1x128xf32>
    %376 = arith.addf %374, %375 : vector<1x128xf32>
    %cst_154 = arith.constant 0.000000e+00 : f32
    %377 = vector.broadcast %cst_154 : f32 to vector<1x128xf32>
    %378 = arith.maximumf %376, %377 : vector<1x128xf32>
    %379 = arith.truncf %378 : vector<1x128xf32> to vector<1x128xbf16>
    %c0_155 = arith.constant 0 : index
    %c0_156 = arith.constant 0 : index
    %380 = vector.load %arg13[%c0_155, %c0_156] : memref<128x128xbf16, #tpu.memory_space<vmem>>, vector<128x128xbf16>
    %cst_157 = arith.constant dense<0.000000e+00> : vector<1x128xf32>
    %381 = tpu.matmul %379, %380, %cst_157 {dimension_numbers = #tpu.dot_dimension_numbers<[1], [0], [0], [1], [0, 0, 1, 1], [], []>} : vector<1x128xbf16>, vector<128x128xbf16>, vector<1x128xf32> -> vector<1x128xf32>
    %c0_158 = arith.constant 0 : index
    %c0_159 = arith.constant 0 : index
    %382 = vector.load %arg14[%c0_158, %c0_159] : memref<1x128xf32, #tpu.memory_space<vmem>>, vector<1x128xf32>
    %383 = arith.addf %381, %382 : vector<1x128xf32>
    %384 = vector.extract_strided_slice %332 {offsets = [1, 256], sizes = [1, 128], strides = [1, 1]} : vector<6x384xf32> to vector<1x128xf32>
    %385 = arith.addf %383, %384 : vector<1x128xf32>
    %cst_160 = arith.constant 0.000000e+00 : f32
    %386 = vector.broadcast %cst_160 : f32 to vector<1x128xf32>
    %387 = arith.maximumf %385, %386 : vector<1x128xf32>
    %c1_161 = arith.constant 1 : index
    %c0_162 = arith.constant 0 : index
    %388 = vector.load %arg18[%c1_161, %c0_162] : memref<6x128xf32, #tpu.memory_space<vmem>>, vector<1x128xf32>
    tpu.vector_store %arg18[%c1_161, %c0_162], %387 {strides = array<i32>} : memref<6x128xf32, #tpu.memory_space<vmem>>, vector<1x128xf32>,
    %389 = arith.truncf %387 : vector<1x128xf32> to vector<1x128xbf16>
    %c0_163 = arith.constant 0 : index
    %c0_164 = arith.constant 0 : index
    %390 = vector.load %arg9[%c0_163, %c0_164] : memref<128x128xbf16, #tpu.memory_space<vmem>>, vector<128x128xbf16>
    %cst_165 = arith.constant dense<0.000000e+00> : vector<1x128xf32>
    %391 = tpu.matmul %389, %390, %cst_165 {dimension_numbers = #tpu.dot_dimension_numbers<[1], [0], [0], [1], [0, 0, 1, 1], [], []>} : vector<1x128xbf16>, vector<128x128xbf16>, vector<1x128xf32> -> vector<1x128xf32>
    %c0_166 = arith.constant 0 : index
    %c0_167 = arith.constant 0 : index
    %392 = vector.load %arg10[%c0_166, %c0_167] : memref<1x128xf32, #tpu.memory_space<vmem>>, vector<1x128xf32>
    %393 = arith.addf %391, %392 : vector<1x128xf32>
    %394 = vector.extract_strided_slice %332 {offsets = [2, 0], sizes = [1, 128], strides = [1, 1]} : vector<6x384xf32> to vector<1x128xf32>
    %395 = arith.addf %393, %394 : vector<1x128xf32>
    %cst_168 = arith.constant 0.000000e+00 : f32
    %396 = vector.broadcast %cst_168 : f32 to vector<1x128xf32>
    %397 = arith.maximumf %395, %396 : vector<1x128xf32>
    %398 = arith.truncf %397 : vector<1x128xf32> to vector<1x128xbf16>
    %c0_169 = arith.constant 0 : index
    %c0_170 = arith.constant 0 : index
    %399 = vector.load %arg11[%c0_169, %c0_170] : memref<128x128xbf16, #tpu.memory_space<vmem>>, vector<128x128xbf16>
    %cst_171 = arith.constant dense<0.000000e+00> : vector<1x128xf32>
    %400 = tpu.matmul %398, %399, %cst_171 {dimension_numbers = #tpu.dot_dimension_numbers<[1], [0], [0], [1], [0, 0, 1, 1], [], []>} : vector<1x128xbf16>, vector<128x128xbf16>, vector<1x128xf32> -> vector<1x128xf32>
    %c0_172 = arith.constant 0 : index
    %c0_173 = arith.constant 0 : index
    %401 = vector.load %arg12[%c0_172, %c0_173] : memref<1x128xf32, #tpu.memory_space<vmem>>, vector<1x128xf32>
    %402 = arith.addf %400, %401 : vector<1x128xf32>
    %403 = vector.extract_strided_slice %332 {offsets = [2, 128], sizes = [1, 128], strides = [1, 1]} : vector<6x384xf32> to vector<1x128xf32>
    %404 = arith.addf %402, %403 : vector<1x128xf32>
    %cst_174 = arith.constant 0.000000e+00 : f32
    %405 = vector.broadcast %cst_174 : f32 to vector<1x128xf32>
    %406 = arith.maximumf %404, %405 : vector<1x128xf32>
    %407 = arith.truncf %406 : vector<1x128xf32> to vector<1x128xbf16>
    %c0_175 = arith.constant 0 : index
    %c0_176 = arith.constant 0 : index
    %408 = vector.load %arg13[%c0_175, %c0_176] : memref<128x128xbf16, #tpu.memory_space<vmem>>, vector<128x128xbf16>
    %cst_177 = arith.constant dense<0.000000e+00> : vector<1x128xf32>
    %409 = tpu.matmul %407, %408, %cst_177 {dimension_numbers = #tpu.dot_dimension_numbers<[1], [0], [0], [1], [0, 0, 1, 1], [], []>} : vector<1x128xbf16>, vector<128x128xbf16>, vector<1x128xf32> -> vector<1x128xf32>
    %c0_178 = arith.constant 0 : index
    %c0_179 = arith.constant 0 : index
    %410 = vector.load %arg14[%c0_178, %c0_179] : memref<1x128xf32, #tpu.memory_space<vmem>>, vector<1x128xf32>
    %411 = arith.addf %409, %410 : vector<1x128xf32>
    %412 = vector.extract_strided_slice %332 {offsets = [2, 256], sizes = [1, 128], strides = [1, 1]} : vector<6x384xf32> to vector<1x128xf32>
    %413 = arith.addf %411, %412 : vector<1x128xf32>
    %cst_180 = arith.constant 0.000000e+00 : f32
    %414 = vector.broadcast %cst_180 : f32 to vector<1x128xf32>
    %415 = arith.maximumf %413, %414 : vector<1x128xf32>
    %c2_181 = arith.constant 2 : index
    %c0_182 = arith.constant 0 : index
    %416 = vector.load %arg18[%c2_181, %c0_182] : memref<6x128xf32, #tpu.memory_space<vmem>>, vector<1x128xf32>
    tpu.vector_store %arg18[%c2_181, %c0_182], %415 {strides = array<i32>} : memref<6x128xf32, #tpu.memory_space<vmem>>, vector<1x128xf32>,
    %417 = arith.truncf %415 : vector<1x128xf32> to vector<1x128xbf16>
    %c0_183 = arith.constant 0 : index
    %c0_184 = arith.constant 0 : index
    %418 = vector.load %arg9[%c0_183, %c0_184] : memref<128x128xbf16, #tpu.memory_space<vmem>>, vector<128x128xbf16>
    %cst_185 = arith.constant dense<0.000000e+00> : vector<1x128xf32>
    %419 = tpu.matmul %417, %418, %cst_185 {dimension_numbers = #tpu.dot_dimension_numbers<[1], [0], [0], [1], [0, 0, 1, 1], [], []>} : vector<1x128xbf16>, vector<128x128xbf16>, vector<1x128xf32> -> vector<1x128xf32>
    %c0_186 = arith.constant 0 : index
    %c0_187 = arith.constant 0 : index
    %420 = vector.load %arg10[%c0_186, %c0_187] : memref<1x128xf32, #tpu.memory_space<vmem>>, vector<1x128xf32>
    %421 = arith.addf %419, %420 : vector<1x128xf32>
    %422 = vector.extract_strided_slice %332 {offsets = [3, 0], sizes = [1, 128], strides = [1, 1]} : vector<6x384xf32> to vector<1x128xf32>
    %423 = arith.addf %421, %422 : vector<1x128xf32>
    %cst_188 = arith.constant 0.000000e+00 : f32
    %424 = vector.broadcast %cst_188 : f32 to vector<1x128xf32>
    %425 = arith.maximumf %423, %424 : vector<1x128xf32>
    %426 = arith.truncf %425 : vector<1x128xf32> to vector<1x128xbf16>
    %c0_189 = arith.constant 0 : index
    %c0_190 = arith.constant 0 : index
    %427 = vector.load %arg11[%c0_189, %c0_190] : memref<128x128xbf16, #tpu.memory_space<vmem>>, vector<128x128xbf16>
    %cst_191 = arith.constant dense<0.000000e+00> : vector<1x128xf32>
    %428 = tpu.matmul %426, %427, %cst_191 {dimension_numbers = #tpu.dot_dimension_numbers<[1], [0], [0], [1], [0, 0, 1, 1], [], []>} : vector<1x128xbf16>, vector<128x128xbf16>, vector<1x128xf32> -> vector<1x128xf32>
    %c0_192 = arith.constant 0 : index
    %c0_193 = arith.constant 0 : index
    %429 = vector.load %arg12[%c0_192, %c0_193] : memref<1x128xf32, #tpu.memory_space<vmem>>, vector<1x128xf32>
    %430 = arith.addf %428, %429 : vector<1x128xf32>
    %431 = vector.extract_strided_slice %332 {offsets = [3, 128], sizes = [1, 128], strides = [1, 1]} : vector<6x384xf32> to vector<1x128xf32>
    %432 = arith.addf %430, %431 : vector<1x128xf32>
    %cst_194 = arith.constant 0.000000e+00 : f32
    %433 = vector.broadcast %cst_194 : f32 to vector<1x128xf32>
    %434 = arith.maximumf %432, %433 : vector<1x128xf32>
    %435 = arith.truncf %434 : vector<1x128xf32> to vector<1x128xbf16>
    %c0_195 = arith.constant 0 : index
    %c0_196 = arith.constant 0 : index
    %436 = vector.load %arg13[%c0_195, %c0_196] : memref<128x128xbf16, #tpu.memory_space<vmem>>, vector<128x128xbf16>
    %cst_197 = arith.constant dense<0.000000e+00> : vector<1x128xf32>
    %437 = tpu.matmul %435, %436, %cst_197 {dimension_numbers = #tpu.dot_dimension_numbers<[1], [0], [0], [1], [0, 0, 1, 1], [], []>} : vector<1x128xbf16>, vector<128x128xbf16>, vector<1x128xf32> -> vector<1x128xf32>
    %c0_198 = arith.constant 0 : index
    %c0_199 = arith.constant 0 : index
    %438 = vector.load %arg14[%c0_198, %c0_199] : memref<1x128xf32, #tpu.memory_space<vmem>>, vector<1x128xf32>
    %439 = arith.addf %437, %438 : vector<1x128xf32>
    %440 = vector.extract_strided_slice %332 {offsets = [3, 256], sizes = [1, 128], strides = [1, 1]} : vector<6x384xf32> to vector<1x128xf32>
    %441 = arith.addf %439, %440 : vector<1x128xf32>
    %cst_200 = arith.constant 0.000000e+00 : f32
    %442 = vector.broadcast %cst_200 : f32 to vector<1x128xf32>
    %443 = arith.maximumf %441, %442 : vector<1x128xf32>
    %c3_201 = arith.constant 3 : index
    %c0_202 = arith.constant 0 : index
    %444 = vector.load %arg18[%c3_201, %c0_202] : memref<6x128xf32, #tpu.memory_space<vmem>>, vector<1x128xf32>
    tpu.vector_store %arg18[%c3_201, %c0_202], %443 {strides = array<i32>} : memref<6x128xf32, #tpu.memory_space<vmem>>, vector<1x128xf32>,
    %445 = arith.truncf %443 : vector<1x128xf32> to vector<1x128xbf16>
    %c0_203 = arith.constant 0 : index
    %c0_204 = arith.constant 0 : index
    %446 = vector.load %arg9[%c0_203, %c0_204] : memref<128x128xbf16, #tpu.memory_space<vmem>>, vector<128x128xbf16>
    %cst_205 = arith.constant dense<0.000000e+00> : vector<1x128xf32>
    %447 = tpu.matmul %445, %446, %cst_205 {dimension_numbers = #tpu.dot_dimension_numbers<[1], [0], [0], [1], [0, 0, 1, 1], [], []>} : vector<1x128xbf16>, vector<128x128xbf16>, vector<1x128xf32> -> vector<1x128xf32>
    %c0_206 = arith.constant 0 : index
    %c0_207 = arith.constant 0 : index
    %448 = vector.load %arg10[%c0_206, %c0_207] : memref<1x128xf32, #tpu.memory_space<vmem>>, vector<1x128xf32>
    %449 = arith.addf %447, %448 : vector<1x128xf32>
    %450 = vector.extract_strided_slice %332 {offsets = [4, 0], sizes = [1, 128], strides = [1, 1]} : vector<6x384xf32> to vector<1x128xf32>
    %451 = arith.addf %449, %450 : vector<1x128xf32>
    %cst_208 = arith.constant 0.000000e+00 : f32
    %452 = vector.broadcast %cst_208 : f32 to vector<1x128xf32>
    %453 = arith.maximumf %451, %452 : vector<1x128xf32>
    %454 = arith.truncf %453 : vector<1x128xf32> to vector<1x128xbf16>
    %c0_209 = arith.constant 0 : index
    %c0_210 = arith.constant 0 : index
    %455 = vector.load %arg11[%c0_209, %c0_210] : memref<128x128xbf16, #tpu.memory_space<vmem>>, vector<128x128xbf16>
    %cst_211 = arith.constant dense<0.000000e+00> : vector<1x128xf32>
    %456 = tpu.matmul %454, %455, %cst_211 {dimension_numbers = #tpu.dot_dimension_numbers<[1], [0], [0], [1], [0, 0, 1, 1], [], []>} : vector<1x128xbf16>, vector<128x128xbf16>, vector<1x128xf32> -> vector<1x128xf32>
    %c0_212 = arith.constant 0 : index
    %c0_213 = arith.constant 0 : index
    %457 = vector.load %arg12[%c0_212, %c0_213] : memref<1x128xf32, #tpu.memory_space<vmem>>, vector<1x128xf32>
    %458 = arith.addf %456, %457 : vector<1x128xf32>
    %459 = vector.extract_strided_slice %332 {offsets = [4, 128], sizes = [1, 128], strides = [1, 1]} : vector<6x384xf32> to vector<1x128xf32>
    %460 = arith.addf %458, %459 : vector<1x128xf32>
    %cst_214 = arith.constant 0.000000e+00 : f32
    %461 = vector.broadcast %cst_214 : f32 to vector<1x128xf32>
    %462 = arith.maximumf %460, %461 : vector<1x128xf32>
    %463 = arith.truncf %462 : vector<1x128xf32> to vector<1x128xbf16>
    %c0_215 = arith.constant 0 : index
    %c0_216 = arith.constant 0 : index
    %464 = vector.load %arg13[%c0_215, %c0_216] : memref<128x128xbf16, #tpu.memory_space<vmem>>, vector<128x128xbf16>
    %cst_217 = arith.constant dense<0.000000e+00> : vector<1x128xf32>
    %465 = tpu.matmul %463, %464, %cst_217 {dimension_numbers = #tpu.dot_dimension_numbers<[1], [0], [0], [1], [0, 0, 1, 1], [], []>} : vector<1x128xbf16>, vector<128x128xbf16>, vector<1x128xf32> -> vector<1x128xf32>
    %c0_218 = arith.constant 0 : index
    %c0_219 = arith.constant 0 : index
    %466 = vector.load %arg14[%c0_218, %c0_219] : memref<1x128xf32, #tpu.memory_space<vmem>>, vector<1x128xf32>
    %467 = arith.addf %465, %466 : vector<1x128xf32>
    %468 = vector.extract_strided_slice %332 {offsets = [4, 256], sizes = [1, 128], strides = [1, 1]} : vector<6x384xf32> to vector<1x128xf32>
    %469 = arith.addf %467, %468 : vector<1x128xf32>
    %cst_220 = arith.constant 0.000000e+00 : f32
    %470 = vector.broadcast %cst_220 : f32 to vector<1x128xf32>
    %471 = arith.maximumf %469, %470 : vector<1x128xf32>
    %c4_221 = arith.constant 4 : index
    %c0_222 = arith.constant 0 : index
    %472 = vector.load %arg18[%c4_221, %c0_222] : memref<6x128xf32, #tpu.memory_space<vmem>>, vector<1x128xf32>
    tpu.vector_store %arg18[%c4_221, %c0_222], %471 {strides = array<i32>} : memref<6x128xf32, #tpu.memory_space<vmem>>, vector<1x128xf32>,
    %473 = arith.truncf %471 : vector<1x128xf32> to vector<1x128xbf16>
    %c0_223 = arith.constant 0 : index
    %c0_224 = arith.constant 0 : index
    %474 = vector.load %arg9[%c0_223, %c0_224] : memref<128x128xbf16, #tpu.memory_space<vmem>>, vector<128x128xbf16>
    %cst_225 = arith.constant dense<0.000000e+00> : vector<1x128xf32>
    %475 = tpu.matmul %473, %474, %cst_225 {dimension_numbers = #tpu.dot_dimension_numbers<[1], [0], [0], [1], [0, 0, 1, 1], [], []>} : vector<1x128xbf16>, vector<128x128xbf16>, vector<1x128xf32> -> vector<1x128xf32>
    %c0_226 = arith.constant 0 : index
    %c0_227 = arith.constant 0 : index
    %476 = vector.load %arg10[%c0_226, %c0_227] : memref<1x128xf32, #tpu.memory_space<vmem>>, vector<1x128xf32>
    %477 = arith.addf %475, %476 : vector<1x128xf32>
    %478 = vector.extract_strided_slice %332 {offsets = [5, 0], sizes = [1, 128], strides = [1, 1]} : vector<6x384xf32> to vector<1x128xf32>
    %479 = arith.addf %477, %478 : vector<1x128xf32>
    %cst_228 = arith.constant 0.000000e+00 : f32
    %480 = vector.broadcast %cst_228 : f32 to vector<1x128xf32>
    %481 = arith.maximumf %479, %480 : vector<1x128xf32>
    %482 = arith.truncf %481 : vector<1x128xf32> to vector<1x128xbf16>
    %c0_229 = arith.constant 0 : index
    %c0_230 = arith.constant 0 : index
    %483 = vector.load %arg11[%c0_229, %c0_230] : memref<128x128xbf16, #tpu.memory_space<vmem>>, vector<128x128xbf16>
    %cst_231 = arith.constant dense<0.000000e+00> : vector<1x128xf32>
    %484 = tpu.matmul %482, %483, %cst_231 {dimension_numbers = #tpu.dot_dimension_numbers<[1], [0], [0], [1], [0, 0, 1, 1], [], []>} : vector<1x128xbf16>, vector<128x128xbf16>, vector<1x128xf32> -> vector<1x128xf32>
    %c0_232 = arith.constant 0 : index
    %c0_233 = arith.constant 0 : index
    %485 = vector.load %arg12[%c0_232, %c0_233] : memref<1x128xf32, #tpu.memory_space<vmem>>, vector<1x128xf32>
    %486 = arith.addf %484, %485 : vector<1x128xf32>
    %487 = vector.extract_strided_slice %332 {offsets = [5, 128], sizes = [1, 128], strides = [1, 1]} : vector<6x384xf32> to vector<1x128xf32>
    %488 = arith.addf %486, %487 : vector<1x128xf32>
    %cst_234 = arith.constant 0.000000e+00 : f32
    %489 = vector.broadcast %cst_234 : f32 to vector<1x128xf32>
    %490 = arith.maximumf %488, %489 : vector<1x128xf32>
    %491 = arith.truncf %490 : vector<1x128xf32> to vector<1x128xbf16>
    %c0_235 = arith.constant 0 : index
    %c0_236 = arith.constant 0 : index
    %492 = vector.load %arg13[%c0_235, %c0_236] : memref<128x128xbf16, #tpu.memory_space<vmem>>, vector<128x128xbf16>
    %cst_237 = arith.constant dense<0.000000e+00> : vector<1x128xf32>
    %493 = tpu.matmul %491, %492, %cst_237 {dimension_numbers = #tpu.dot_dimension_numbers<[1], [0], [0], [1], [0, 0, 1, 1], [], []>} : vector<1x128xbf16>, vector<128x128xbf16>, vector<1x128xf32> -> vector<1x128xf32>
    %c0_238 = arith.constant 0 : index
    %c0_239 = arith.constant 0 : index
    %494 = vector.load %arg14[%c0_238, %c0_239] : memref<1x128xf32, #tpu.memory_space<vmem>>, vector<1x128xf32>
    %495 = arith.addf %493, %494 : vector<1x128xf32>
    %496 = vector.extract_strided_slice %332 {offsets = [5, 256], sizes = [1, 128], strides = [1, 1]} : vector<6x384xf32> to vector<1x128xf32>
    %497 = arith.addf %495, %496 : vector<1x128xf32>
    %cst_240 = arith.constant 0.000000e+00 : f32
    %498 = vector.broadcast %cst_240 : f32 to vector<1x128xf32>
    %499 = arith.maximumf %497, %498 : vector<1x128xf32>
    %c5_241 = arith.constant 5 : index
    %c0_242 = arith.constant 0 : index
    %500 = vector.load %arg18[%c5_241, %c0_242] : memref<6x128xf32, #tpu.memory_space<vmem>>, vector<1x128xf32>
    tpu.vector_store %arg18[%c5_241, %c0_242], %499 {strides = array<i32>} : memref<6x128xf32, #tpu.memory_space<vmem>>, vector<1x128xf32>,
    %c0_243 = arith.constant 0 : index
    %c0_244 = arith.constant 0 : index
    %501 = vector.load %arg18[%c0_243, %c0_244] : memref<6x128xf32, #tpu.memory_space<vmem>>, vector<6x128xf32>
    %502 = arith.truncf %501 : vector<6x128xf32> to vector<6x128xbf16>
    %c0_245 = arith.constant 0 : index
    %c0_246 = arith.constant 0 : index
    %503 = vector.load %arg15[%c0_245, %c0_246] : memref<128x2xbf16, #tpu.memory_space<vmem>>, vector<128x2xbf16>
    %cst_247 = arith.constant dense<0.000000e+00> : vector<6x2xf32>
    %504 = tpu.matmul %502, %503, %cst_247 {dimension_numbers = #tpu.dot_dimension_numbers<[1], [0], [0], [1], [0, 0, 1, 1], [], []>} : vector<6x128xbf16>, vector<128x2xbf16>, vector<6x2xf32> -> vector<6x2xf32>
    %c0_248 = arith.constant 0 : index
    %c0_249 = arith.constant 0 : index
    %505 = vector.load %arg16[%c0_248, %c0_249] : memref<1x2xf32, #tpu.memory_space<vmem>>, vector<1x2xf32>
    %506 = vector.broadcast %505 : vector<1x2xf32> to vector<6x2xf32>
    %507 = arith.addf %504, %506 : vector<6x2xf32>
    %c0_250 = arith.constant 0 : index
    %c0_251 = arith.constant 0 : index
    %508 = vector.load %arg17[%c0_250, %c0_251] : memref<6x2xf32, #tpu.memory_space<vmem>>, vector<6x2xf32>
    tpu.vector_store %arg17[%c0_250, %c0_251], %507 {strides = array<i32>} : memref<6x2xf32, #tpu.memory_space<vmem>>, vector<6x2xf32>,
    return
  }
}

</mosaic_0001>

<bundles_post_ra>
// kernel: rollout_forward.3
= control target key start
LH: loop header
LB: loop body
LE: loop exit
PB: predicated region body
PF: predicated region fallthrough
CT: control target
= control target key end

     0   :  { %vm101_vm0 = vcmask 1043456   ;;  %vm102_vm1 = vcmask 1044480   ;;  %v724_v2 = vmov 65535   ;;  %v725_v9 = vmov 0   ;;  %s1141_s0 = inlined_call_operand.vmem [shape: f32[25,1444], index: 0, kind: input, shape index: {}]   ;;  %s1142_s1 = inlined_call_operand.vmem [shape: bf16[16,25], index: 1, kind: input, shape index: {}]   ;;  %s1143_s2 = inlined_call_operand.vmem [shape: f32[16,1], index: 2, kind: input, shape index: {}]   ;;  %s1144_s3 = inlined_call_operand.vmem [shape: f32[16,1], index: 3, kind: input, shape index: {}]   ;;  %s1145_s4 = inlined_call_operand.vmem [shape: bf16[16,1444], index: 4, kind: output, shape index: {}]  }
   0x1   :  { %v45_v0 = vld [vmem:[%s1141_s0 + $0xc8] sm:$0xff]  ;;  %v103_v3 = vsel %vm101_vm0, 4294967295, %v724_v2  ;;  %v47_v6 = vld [vmem:[%s1141_s0 + $0xd8] sm:$0xff]  ;;  %v44_v8 = vld [vmem:[%s1141_s0 + $0xc0] sm:$0xff]  ;;  %173 = vmatprep.mubr.bf16.mxu0 %v725_v9  ;;  %216 = vmatprep.mubr.bf16.mxu1 %v725_v9  ;;  %vm97_vm2 = vcmask 203776   ;;  %vm413_vm3 = vcmask 293888  }
   0x2   :  { %v57_v1 = vld [vmem:[%s1141_s0 + $0x128] sm:$0x1]  ;;  %v758_v5 = vsel %vm102_vm1, %v103_v3, 0  ;;  %v59_v7 = vld [vmem:[%s1141_s0 + $0x138] sm:$0x1]  ;;  %v46_v12 = vld [vmem:[%s1141_s0 + $0xd0] sm:$0xff]  ;;  %717 = vset.pattern.permute.xlu0 %v725_v9  ;;  %718 = vset.pattern.permute.xlu1 %v725_v9 }
   0x3   :  { %v81_v4 = vpack.c.bf16 %v57_v1, %v45_v0  ;;  %v83_v10 = vpack.c.bf16 %v59_v7, %v47_v6  ;;  %v56_v11 = vld [vmem:[%s1141_s0 + $0x120] sm:$0x1]  ;;  %v58_v13 = vld [vmem:[%s1141_s0 + $0x130] sm:$0x1]  ;;  %v21_v17 = vld [vmem:[%s1141_s0 + $0x8] sm:$0xff]  ;;  %vm671_vm4 = vcmask 293892  }
   0x4   :  { %v80_v15 = vpack.c.bf16 %v56_v11, %v44_v8  ;;  %v82_v16 = vpack.c.bf16 %v58_v13, %v46_v12  ;;  %v33_v18 = vld [vmem:[%s1141_s0 + $0x68] sm:$0xff]  ;;  %v23_v19 = vld [vmem:[%s1141_s0 + $0x18] sm:$0xff]  ;;  %v20_v23 = vld [vmem:[%s1141_s0] sm:$0xff] }
   0x5   :  { %v109_v14 = vand.u32 %v758_v5, %v81_v4  ;;  %v115_v20 = vand.u32 %v758_v5, %v83_v10  ;;  %v69_v21 = vpack.c.bf16 %v33_v18, %v21_v17  ;;  %v35_v22 = vld [vmem:[%s1141_s0 + $0x78] sm:$0xff]  ;;  %v32_v24 = vld [vmem:[%s1141_s0 + $0x60] sm:$0xff]  ;;  %v22_v28 = vld [vmem:[%s1141_s0 + $0x10] sm:$0xff] }
   0x6   :  { %v106_v25 = vand.u32 %v758_v5, %v80_v15  ;;  %v112_v26 = vand.u32 %v758_v5, %v82_v16  ;;  %v71_v27 = vpack.c.bf16 %v35_v22, %v23_v19  ;;  %v34_v29 = vld [vmem:[%s1141_s0 + $0x70] sm:$0xff]  ;;  %v49_v30 = vld [vmem:[%s1141_s0 + $0xe8] sm:$0xff]  ;;  %v68_v31 = vpack.c.bf16 %v32_v24, %v20_v23  ;;  %v51_v34 = vld [vmem:[%s1141_s0 + $0xf8] sm:$0xff] }
   0x7   :  { %153 = vmatprep.subr.bf16.mxu0 %v109_v14  ;;  %196 = vmatprep.subr.bf16.mxu1 %v115_v20  ;;  %v70_v32 = vpack.c.bf16 %v34_v29, %v22_v28  ;;  %v61_v33 = vld [vmem:[%s1141_s0 + $0x148] sm:$0x1]  ;;  %v63_v35 = vld [vmem:[%s1141_s0 + $0x158] sm:$0x1]  ;;  %v825_v36 = vld [vmem:[%s1142_s1] sm:$0xff]  }
   0x8   :  { %154 = vmatpush1.bf16.msra.mxu0 %v106_v25  ;;  %197 = vmatpush1.bf16.msra.mxu1 %v112_v26  ;;  %v85_v37 = vpack.c.bf16 %v61_v33, %v49_v30  ;;  %v87_v38 = vpack.c.bf16 %v63_v35, %v51_v34  ;;  %v48_v39 = vld [vmem:[%s1141_s0 + $0xe0] sm:$0xff]  ;;  %v50_v41 = vld [vmem:[%s1141_s0 + $0xf0] sm:$0xff]  ;;  %v25_v44 = vld [vmem:[%s1141_s0 + $0x28] sm:$0xff] }
   0x9   :  { %155 = vmatprep.subr.bf16.mxu0 %v69_v21  ;;  %198 = vmatprep.subr.bf16.mxu1 %v71_v27  ;;  %v60_v40 = vld [vmem:[%s1141_s0 + $0x140] sm:$0x1]  ;;  %v62_v43 = vld [vmem:[%s1141_s0 + $0x150] sm:$0x1]  ;;  %v37_v45 = vld [vmem:[%s1141_s0 + $0x88] sm:$0xff] }
   0xa   :  { %v84_v42 = vpack.c.bf16 %v60_v40, %v48_v39  ;;  %v121_v46 = vand.u32 %v758_v5, %v85_v37  ;;  %v127_v47 = vand.u32 %v758_v5, %v87_v38  ;;  %v86_v48 = vpack.c.bf16 %v62_v43, %v50_v41  ;;  %v27_v49 = vld [vmem:[%s1141_s0 + $0x38] sm:$0xff]  ;;  %v24_v51 = vld [vmem:[%s1141_s0 + $0x20] sm:$0xff]  ;;  %v26_v54 = vld [vmem:[%s1141_s0 + $0x30] sm:$0xff] }
   0xb   :  { %v39_v50 = vld [vmem:[%s1141_s0 + $0x98] sm:$0xff]  ;;  %v36_v53 = vld [vmem:[%s1141_s0 + $0x80] sm:$0xff]  ;;  %v38_v55 = vld [vmem:[%s1141_s0 + $0x90] sm:$0xff]  ;;  %v73_v57 = vpack.c.bf16 %v37_v45, %v25_v44 }
   0xc   :  { %156 = vmatpush1.bf16.msra.mxu0 %v68_v31  ;;  %199 = vmatpush1.bf16.msra.mxu1 %v70_v32  ;;  %v118_v52 = vand.u32 %v758_v5, %v84_v42  ;;  %v124_v56 = vand.u32 %v758_v5, %v86_v48  ;;  %v75_v58 = vpack.c.bf16 %v39_v50, %v27_v49  ;;  %v53_v59 = vld [vmem:[%s1141_s0 + $0x108] sm:$0xff]  ;;  %v55_v61 = vld [vmem:[%s1141_s0 + $0x118] sm:$0xff]  ;;  %v52_v0 = vld [vmem:[%s1141_s0 + $0x100] sm:$0xff] }
   0xd   :  { %239 = vmatprep.subr.bf16.mxu0 %v121_v46  ;;  %282 = vmatprep.subr.bf16.mxu1 %v127_v47  ;;  %v65_v60 = vld [vmem:[%s1141_s0 + $0x168] sm:$0x1]  ;;  %v67_v63 = vld [vmem:[%s1141_s0 + $0x178] sm:$0x1]  ;;  %v64_v1 = vld [vmem:[%s1141_s0 + $0x160] sm:$0x1]  ;;  %v72_v2 = vpack.c.bf16 %v36_v53, %v24_v51  ;;  %v74_v7 = vpack.c.bf16 %v38_v55, %v26_v54 }
   0xe   :  { %v89_v62 = vpack.c.bf16 %v65_v60, %v53_v59  ;;  %v91_v3 = vpack.c.bf16 %v67_v63, %v55_v61  ;;  %v54_v4 = vld [vmem:[%s1141_s0 + $0x110] sm:$0xff]  ;;  %v88_v8 = vpack.c.bf16 %v64_v1, %v52_v0  ;;  %v29_v13 = vld [vmem:[%s1141_s0 + $0x48] sm:$0xff]  ;;  %v31_v15 = vld [vmem:[%s1141_s0 + $0x58] sm:$0xff] }
   0xf   :  { %685 = vmatmul.mubr.msk.bf16.vlgmr.msra.gmra.mxu0 %vm97_vm2, %v825_v36  ;;  %686 = vmatmul.mubr.msk.bf16.vlgmr.msra.gmra.mxu1 %vm97_vm2, %v825_v36  ;;  %v66_v6 = vld [vmem:[%s1141_s0 + $0x170] sm:$0x1]  ;;  %v41_v14 = vld [vmem:[%s1141_s0 + $0xa8] sm:$0xff]  ;;  %v43_v16 = vld [vmem:[%s1141_s0 + $0xb8] sm:$0xff] }
  0x10   :  { %240 = vmatpush1.bf16.msra.mxu0 %v118_v52  ;;  %283 = vmatpush1.bf16.msra.mxu1 %v124_v56  ;;  %v90_v10 = vpack.c.bf16 %v66_v6, %v54_v4  ;;  %v133_v11 = vand.u32 %v758_v5, %v89_v62  ;;  %v139_v12 = vand.u32 %v758_v5, %v91_v3  ;;  %v28_v19 = vld [vmem:[%s1141_s0 + $0x40] sm:$0xff]  ;;  %v30_v23 = vld [vmem:[%s1141_s0 + $0x50] sm:$0xff]  ;;  %vm1097_vm5 = vmor %vm671_vm4, %vm101_vm0 }
  0x11   :  { %241 = vmatprep.subr.bf16.mxu0 %v73_v57  ;;  %284 = vmatprep.subr.bf16.mxu1 %v75_v58  ;;  %v130_v17 = vand.u32 %v758_v5, %v88_v8  ;;  %v77_v20 = vpack.c.bf16 %v41_v14, %v29_v13  ;;  %v79_v21 = vpack.c.bf16 %v43_v16, %v31_v15  ;;  %v40_v22 = vld [vmem:[%s1141_s0 + $0xa0] sm:$0xff] }
  0x12   :  { %259 = vmatprep.mubr.bf16.mxu0 %v725_v9  ;;  %302 = vmatprep.mubr.bf16.mxu1 %v725_v9  ;;  %v136_v18 = vand.u32 %v758_v5, %v90_v10  ;;  %v42_v5 = vld [vmem:[%s1141_s0 + $0xb0] sm:$0xff]  ;;  %v76_v24 = vpack.c.bf16 %v40_v22, %v28_v19 }
  0x13   :  { %v78_v25 = vpack.c.bf16 %v42_v5, %v30_v23 }
  0x14   :  { %242 = vmatpush1.bf16.msra.mxu0 %v72_v2  ;;  %285 = vmatpush1.bf16.msra.mxu1 %v74_v7 }
  0x15   :  { %325 = vmatprep.subr.bf16.mxu0 %v133_v11  ;;  %368 = vmatprep.subr.bf16.mxu1 %v139_v12 }
  0x17   :  { %687 = vmatmul.mubr.msk.bf16.vlgmr.msra.gmra.mxu0 %vm97_vm2, %v825_v36  ;;  %688 = vmatmul.mubr.msk.bf16.vlgmr.msra.gmra.mxu1 %vm97_vm2, %v825_v36 }
  0x18   :  { %326 = vmatpush1.bf16.msra.mxu0 %v130_v17  ;;  %369 = vmatpush1.bf16.msra.mxu1 %v136_v18 }
  0x19   :  { %327 = vmatprep.subr.bf16.mxu0 %v77_v20  ;;  %370 = vmatprep.subr.bf16.mxu1 %v79_v21 }
  0x1a   :  { %345 = vmatprep.mubr.bf16.mxu0 %v725_v9  ;;  %388 = vmatprep.mubr.bf16.mxu1 %v725_v9 }
  0x1c   :  { %328 = vmatpush1.bf16.msra.mxu0 %v76_v24  ;;  %371 = vmatpush1.bf16.msra.mxu1 %v78_v25 }
  0x1f   :  { %689 = vmatmul.mubr.msk.bf16.vlgmr.msra.gmra.mxu0 %vm97_vm2, %v825_v36  ;;  %690 = vmatmul.mubr.msk.bf16.vlgmr.msra.gmra.mxu1 %vm97_vm2, %v825_v36 }
  0xcf   :  { %v935_v26 = vpop.f32.mrf.mxu0  ;;  %v937_v27 = vpop.f32.mrf.mxu1 }
  0xd0   :  { %v434_v30 = vmul.f32 %v935_v26, %v935_v26  ;;  %v436_v9 = vmul.f32 %v937_v27, %v937_v27 }
  0xd1   :  { %v939_v28 = vpop.f32.mrf.mxu0  ;;  %v941_v29 = vpop.f32.mrf.mxu1 }
  0xd2   :  { %v403_v31 = vadd.f32 %v939_v28, %v935_v26  ;;  %v435_v32 = vmul.f32 %v939_v28, %v939_v28  ;;  %v437_v37 = vmul.f32 %v941_v29, %v941_v29 }
  0xd3   :  { %v951_v33 = vpop.f32.mrf.mxu0  ;;  %v953_v34 = vpop.f32.mrf.mxu1 }
  0xd4   :  { %v458_v35 = vadd.f32 %v435_v32, %v434_v30  ;;  %v404_v36 = vadd.f32 %v403_v31, %v937_v27  ;;  %v446_v38 = vmul.f32 %v951_v33, %v951_v33  ;;  %v448_v45 = vmul.f32 %v953_v34, %v953_v34 }
  0xd5   :  { %v960_v39 = vpop.f32.mrf.mxu0  ;;  %v962_v40 = vpop.f32.mrf.mxu1 }
  0xd6   :  { %v405_v41 = vadd.f32 %v404_v36, %v941_v29  ;;  %v459_v42 = vadd.f32 %v458_v35, %v436_v9  ;;  %v418_v43 = vadd.f32 %v960_v39, %v951_v33  ;;  %v447_v44 = vmul.f32 %v960_v39, %v960_v39 }
  0xd7   :  { %v971_v46 = vpop.f32.mrf.mxu0  ;;  %v973_v47 = vpop.f32.mrf.mxu1  ;;  %v449_v52 = vmul.f32 %v962_v40, %v962_v40 }
  0xd8   :  { %v460_v48 = vadd.f32 %v459_v42, %v437_v37  ;;  %v472_v49 = vadd.f32 %v447_v44, %v446_v38  ;;  %v419_v50 = vadd.f32 %v418_v43, %v953_v34  ;;  %v406_v51 = vadd.f32 %v405_v41, %v971_v46 }
  0xd9   :  { %v438_v53 = vmul.f32 %v971_v46, %v971_v46  ;;  %v981_v54 = vpop.f32.mrf.mxu0  ;;  %v983_v55 = vpop.f32.mrf.mxu1  ;;  %v440_v61 = vmul.f32 %v973_v47, %v973_v47 }
  0xda   :  { %v420_v56 = vadd.f32 %v419_v50, %v962_v40  ;;  %v473_v57 = vadd.f32 %v472_v49, %v448_v45  ;;  %v407_v58 = vadd.f32 %v406_v51, %v981_v54  ;;  %v439_v59 = vmul.f32 %v981_v54, %v981_v54 }
  0xdb   :  { %v461_v60 = vadd.f32 %v460_v48, %v438_v53  ;;  %v991_v62 = vpop.f32.mrf.mxu0  ;;  %v993_v63 = vpop.f32.mrf.mxu1  ;;  %v441_v13 = vmul.f32 %v983_v55, %v983_v55 }
  0xdc   :  { %v474_v0 = vadd.f32 %v473_v57, %v449_v52  ;;  %v408_v1 = vadd.f32 %v407_v58, %v973_v47  ;;  %v421_v2 = vadd.f32 %v420_v56, %v991_v62  ;;  %v450_v3 = vmul.f32 %v991_v62, %v991_v62 }
  0xdd   :  { %v462_v4 = vadd.f32 %v461_v60, %v439_v59  ;;  %v999_v6 = vpop.f32.mrf.mxu0  ;;  %v1001_v7 = vpop.f32.mrf.mxu1  ;;  %v452_v15 = vmul.f32 %v993_v63, %v993_v63 }
  0xde   :  { %v409_v8 = vadd.f32 %v408_v1, %v983_v55  ;;  %v475_v10 = vadd.f32 %v474_v0, %v450_v3  ;;  %v422_v11 = vadd.f32 %v421_v2, %v999_v6  ;;  %v451_v12 = vmul.f32 %v999_v6, %v999_v6 }
  0xdf   :  { %v463_v14 = vadd.f32 %v462_v4, %v440_v61  ;;  %v1011_v16 = vpop.f32.mrf.mxu0  ;;  %v1013_v17 = vpop.f32.mrf.mxu1  ;;  %v453_v23 = vmul.f32 %v1001_v7, %v1001_v7 }
  0xe0   :  { %v476_v18 = vadd.f32 %v475_v10, %v451_v12  ;;  %v423_v19 = vadd.f32 %v422_v11, %v993_v63  ;;  %v410_v20 = vadd.f32 %v409_v8, %v1011_v16  ;;  %v442_v21 = vmul.f32 %v1011_v16, %v1011_v16 }
  0xe1   :  { %v464_v22 = vadd.f32 %v463_v14, %v441_v13  ;;  %v1021_v5 = vpop.f32.mrf.mxu0  ;;  %v1023_v24 = vpop.f32.mrf.mxu1  ;;  %v444_v35 = vmul.f32 %v1013_v17, %v1013_v17 }
  0xe2   :  { %v424_v25 = vadd.f32 %v423_v19, %v1001_v7  ;;  %v477_v30 = vadd.f32 %v476_v18, %v452_v15  ;;  %v411_v9 = vadd.f32 %v410_v20, %v1021_v5  ;;  %v443_v31 = vmul.f32 %v1021_v5, %v1021_v5 }
  0xe3   :  { %v465_v32 = vadd.f32 %v464_v22, %v442_v21  ;;  %v1031_v36 = vpop.f32.mrf.mxu0  ;;  %v1033_v37 = vpop.f32.mrf.mxu1  ;;  %v445_v43 = vmul.f32 %v1023_v24, %v1023_v24  ;;  %v414_v53 = vsel %vm413_vm3, %v1023_v24, 0.0 }
  0xe4   :  { %v478_v38 = vadd.f32 %v477_v30, %v453_v23  ;;  %v425_v41 = vadd.f32 %v424_v25, %v1031_v36  ;;  %v454_v42 = vmul.f32 %v1031_v36, %v1031_v36  ;;  %v412_v48 = vadd.f32 %v411_v9, %v1013_v17 }
  0xe5   :  { %v1040_v44 = vpop.f32.mrf.mxu0  ;;  %v1042_v45 = vpop.f32.mrf.mxu1  ;;  %v466_v49 = vadd.f32 %v465_v32, %v443_v31  ;;  %v456_v59 = vmul.f32 %v1033_v37, %v1033_v37  ;;  %v468_v61 = vsel %vm413_vm3, %v445_v43, 0.0  ;;  %v399_v31 = vld [vmem:[%s1143_s2] sm:$0xff] }
  0xe6   :  { %v479_v50 = vadd.f32 %v478_v38, %v454_v42  ;;  %v426_v51 = vadd.f32 %v425_v41, %v1040_v44  ;;  %v455_v52 = vmul.f32 %v1040_v44, %v1040_v44  ;;  %v457_v56 = vmul.f32 %v1042_v45, %v1042_v45  ;;  %v400_v38 = vld [vmem:[%s1143_s2 + $0x8] sm:$0xff] }
  0xe7   :  { %v415_v57 = vadd.f32 %v414_v53, %v412_v48  ;;  %v467_v58 = vadd.f32 %v466_v49, %v444_v35  ;;  %v428_v1 = vsel %vm413_vm3, %v1042_v45, 0.0  ;;  %v401_v48 = vld [vmem:[%s1144_s3] sm:$0xff] }
  0xe8   :  { %v480_v60 = vadd.f32 %v479_v50, %v455_v52  ;;  %v427_v0 = vadd.f32 %v426_v51, %v1033_v37  ;;  %v482_v8 = vsel %vm413_vm3, %v457_v56, 0.0  ;;  %v402_v51 = vld [vmem:[%s1144_s3 + $0x8] sm:$0xff] }
  0xe9   :  { %416 = vadd.xlane.f32.xlu0 %v415_v57  ;;  %v469_v2 = vadd.f32 %v468_v61, %v467_v58 }
  0xea   :  { %v429_v3 = vadd.f32 %v428_v1, %v427_v0  ;;  %v481_v4 = vadd.f32 %v480_v60, %v456_v59 }
  0xeb   :  { %470 = vadd.xlane.f32.xlu1 %v469_v2 }
  0xec   :  { %v483_v10 = vadd.f32 %v482_v8, %v481_v4 }
  0xed   :  { %430 = vadd.xlane.f32.xlu0 %v429_v3 }
  0xef   :  { %484 = vadd.xlane.f32.xlu1 %v483_v10 }
 0x172   :  { %v417_v11 = vpop.xlane.xlu0 %416 }
 0x173   :  { %v432_v12 = vmul.f32 0.00069252076, %v417_v11 }
 0x174   :  { %v471_v13 = vpop.xlane.xlu1 %470 }
 0x175   :  { %v488_v14 = vmul.f32 %v432_v12, %v432_v12  ;;  %v486_v15 = vmul.f32 0.00069252076, %v471_v13 }
 0x176   :  { %v431_v18 = vpop.xlane.xlu0 %430 }
 0x177   :  { %v490_v19 = vsub.f32 %v486_v15, %v488_v14  ;;  %v433_v20 = vmul.f32 0.00069252076, %v431_v18 }
 0x178   :  { %v485_v21 = vpop.xlane.xlu1 %484 }
 0x179   :  { %v492_v22 = vadd.f32 1e-05, %v490_v19  ;;  %v489_v23 = vmul.f32 %v433_v20, %v433_v20  ;;  %v487_v25 = vmul.f32 0.00069252076, %v485_v21 }
 0x17b   :  { %720 = vrsqrt.f32 %v492_v22  ;;  %v491_v30 = vsub.f32 %v487_v25, %v489_v23 }
 0x17d   :  { %v493_v9 = vadd.f32 1e-05, %v491_v30 }
 0x17f   :  { %722 = vrsqrt.f32 %v493_v9 }
 0x188   :  { %v721_v32 = vpop.eup %720 }
 0x189   :  { %v496_v35 = vmul.f32 %v721_v32, %v399_v31 }
 0x18b   :  { %504 = vperm.xlu0 %717, %v496_v35   ;;  %v498_v43 = vmul.f32 %v496_v35, %v432_v12 }
 0x18c   :  { %v723_v41 = vpop.eup %722 }
 0x18d   :  { %v497_v42 = vmul.f32 %v723_v41, %v400_v38  ;;  %v500_v49 = vsub.f32 %v401_v48, %v498_v43 }
 0x18f   :  { %509 = vperm.xlu1 %718, %v497_v42   ;;  %v499_v50 = vmul.f32 %v497_v42, %v433_v20 }
 0x191   :  { %v501_v52 = vsub.f32 %v402_v51, %v499_v50 }
 0x193   :  { %538 = vperm.xlu1 %718, %v500_v49  }
 0x197   :  { %543 = vperm.xlu1 %718, %v501_v52  }
 0x206   :  { %v505_v53 = vpop.permute.xlu0 %504 }
 0x207   :  { %v512_v56 = vmul.f32 %v505_v53, %v935_v26  ;;  %v513_v57 = vmul.f32 %v505_v53, %v939_v28  ;;  %v514_v58 = vmul.f32 %v505_v53, %v937_v27  ;;  %v515_v59 = vmul.f32 %v505_v53, %v941_v29 }
 0x208   :  { %v516_v60 = vmul.f32 %v505_v53, %v971_v46  ;;  %v517_v61 = vmul.f32 %v505_v53, %v981_v54  ;;  %v518_v0 = vmul.f32 %v505_v53, %v973_v47  ;;  %v519_v1 = vmul.f32 %v505_v53, %v983_v55 }
 0x209   :  { %v520_v3 = vmul.f32 %v505_v53, %v1011_v16  ;;  %v521_v26 = vmul.f32 %v505_v53, %v1021_v5  ;;  %v522_v28 = vmul.f32 %v505_v53, %v1013_v17  ;;  %v523_v27 = vmul.f32 %v505_v53, %v1023_v24 }
 0x20a   :  { %v510_v2 = vpop.permute.xlu1 %509 }
 0x20b   :  { %v524_v29 = vmul.f32 %v510_v2, %v951_v33  ;;  %v525_v4 = vmul.f32 %v510_v2, %v960_v39  ;;  %v526_v46 = vmul.f32 %v510_v2, %v953_v34  ;;  %v527_v54 = vmul.f32 %v510_v2, %v962_v40 }
 0x20c   :  { %v528_v47 = vmul.f32 %v510_v2, %v991_v62  ;;  %v529_v55 = vmul.f32 %v510_v2, %v999_v6  ;;  %v530_v16 = vmul.f32 %v510_v2, %v993_v63  ;;  %v531_v5 = vmul.f32 %v510_v2, %v1001_v7 }
 0x20d   :  { %v532_v17 = vmul.f32 %v510_v2, %v1031_v36  ;;  %v533_v24 = vmul.f32 %v510_v2, %v1040_v44  ;;  %v534_v33 = vmul.f32 %v510_v2, %v1033_v37  ;;  %v535_v39 = vmul.f32 %v510_v2, %v1042_v45 }
 0x20e   :  { %v539_v8 = vpop.permute.xlu1 %538 }
 0x20f   :  { %v546_v34 = vadd.f32 %v539_v8, %v512_v56  ;;  %v547_v10 = vadd.f32 %v539_v8, %v513_v57  ;;  %v548_v40 = vadd.f32 %v539_v8, %v514_v58  ;;  %v549_v11 = vadd.f32 %v539_v8, %v515_v59 }
 0x210   :  { %v550_v62 = vadd.f32 %v539_v8, %v516_v60  ;;  %v551_v12 = vadd.f32 %v539_v8, %v517_v61  ;;  %v552_v6 = vadd.f32 %v539_v8, %v518_v0  ;;  %v553_v13 = vadd.f32 %v539_v8, %v519_v1 }
 0x211   :  { %v554_v63 = vadd.f32 %v539_v8, %v520_v3  ;;  %v555_v14 = vadd.f32 %v539_v8, %v521_v26  ;;  %v556_v7 = vadd.f32 %v539_v8, %v522_v28  ;;  %v557_v15 = vadd.f32 %v539_v8, %v523_v27 }
 0x212   :  { %v570_v18 = vmax.f32 %v546_v34, 0.0  ;;  %v571_v36 = vmax.f32 %v547_v10, 0.0  ;;  %v572_v19 = vmax.f32 %v548_v40, 0.0  ;;  %v573_v44 = vmax.f32 %v549_v11, 0.0  ;;  %v544_v22 = vpop.permute.xlu1 %543 }
 0x213   :  { %v574_v20 = vmax.f32 %v550_v62, 0.0  ;;  %v575_v37 = vmax.f32 %v551_v12, 0.0  ;;  %v576_v21 = vmax.f32 %v552_v6, 0.0  ;;  %v577_v45 = vmax.f32 %v553_v13, 0.0 }
 0x214   :  { %v578_v23 = vmax.f32 %v554_v63, 0.0  ;;  %v579_v25 = vmax.f32 %v555_v14, 0.0  ;;  %v580_v30 = vmax.f32 %v556_v7, 0.0  ;;  %v581_v9 = vmax.f32 %v557_v15, 0.0 }
 0x215   :  { %v703_v32 = vpack.c.bf16 %v571_v36, %v570_v18  ;;  %v704_v35 = vpack.c.bf16 %v573_v44, %v572_v19  ;;  %v705_v38 = vpack.c.bf16 %v575_v37, %v574_v20  ;;  %v706_v41 = vpack.c.bf16 %v577_v45, %v576_v21 }
 0x216   :  { %v707_v42 = vpack.c.bf16 %v579_v25, %v578_v23  ;;  %v708_v43 = vpack.c.bf16 %v581_v9, %v580_v30  ;;  %v558_v48 = vadd.f32 %v544_v22, %v524_v29  ;;  %v559_v49 = vadd.f32 %v544_v22, %v525_v4 }
 0x217   :  { %666 = vst [vmem:[%s1145_s4] sm:$0xff] %v703_v32  ;;  %667 = vst [vmem:[%s1145_s4 + $0x8] sm:$0xff] %v704_v35  ;;  %v560_v50 = vadd.f32 %v544_v22, %v526_v46  ;;  %v561_v51 = vadd.f32 %v544_v22, %v527_v54  ;;  %v562_v52 = vadd.f32 %v544_v22, %v528_v47 }
 0x218   :  { %668 = vst [vmem:[%s1145_s4 + $0x10] sm:$0xff] %v705_v38  ;;  %669 = vst [vmem:[%s1145_s4 + $0x18] sm:$0xff] %v706_v41  ;;  %v563_v53 = vadd.f32 %v544_v22, %v529_v55  ;;  %v564_v56 = vadd.f32 %v544_v22, %v530_v16  ;;  %v565_v57 = vadd.f32 %v544_v22, %v531_v5  ;;  %v582_v0 = vmax.f32 %v558_v48, 0.0 }
 0x219   :  { %670 = vst [vmem:[%s1145_s4 + $0x20] sm:$0xff] %v707_v42  ;;  %673 = vst.msk [vmem:[%s1145_s4 + $0x28] sm:$0xff] %vm1097_vm5, %v708_v43  ;;  %v566_v58 = vadd.f32 %v544_v22, %v532_v17  ;;  %v567_v59 = vadd.f32 %v544_v22, %v533_v24  ;;  %v568_v60 = vadd.f32 %v544_v22, %v534_v33  ;;  %v583_v1 = vmax.f32 %v559_v49, 0.0 }
 0x21a   :  { %v569_v61 = vadd.f32 %v544_v22, %v535_v39  ;;  %v584_v2 = vmax.f32 %v560_v50, 0.0  ;;  %v585_v3 = vmax.f32 %v561_v51, 0.0  ;;  %v586_v26 = vmax.f32 %v562_v52, 0.0 }
 0x21b   :  { %v587_v28 = vmax.f32 %v563_v53, 0.0  ;;  %v588_v27 = vmax.f32 %v564_v56, 0.0  ;;  %v589_v29 = vmax.f32 %v565_v57, 0.0  ;;  %v590_v4 = vmax.f32 %v566_v58, 0.0 }
 0x21c   :  { %v591_v46 = vmax.f32 %v567_v59, 0.0  ;;  %v592_v54 = vmax.f32 %v568_v60, 0.0  ;;  %v593_v47 = vmax.f32 %v569_v61, 0.0  ;;  %v709_v55 = vpack.c.bf16 %v583_v1, %v582_v0 }
 0x21d   :  { %v710_v8 = vpack.c.bf16 %v585_v3, %v584_v2  ;;  %v711_v16 = vpack.c.bf16 %v587_v28, %v586_v26  ;;  %v712_v5 = vpack.c.bf16 %v589_v29, %v588_v27 }
 0x21e   :  { %v713_v17 = vpack.c.bf16 %v591_v46, %v590_v4  ;;  %v714_v24 = vpack.c.bf16 %v593_v47, %v592_v54  ;;  %674 = vst [vmem:[%s1145_s4 + $0x30] sm:$0xff] %v709_v55 }
 0x21f   :  { %675 = vst [vmem:[%s1145_s4 + $0x38] sm:$0xff] %v710_v8  ;;  %676 = vst [vmem:[%s1145_s4 + $0x40] sm:$0xff] %v711_v16 }
 0x220   :  { %677 = vst [vmem:[%s1145_s4 + $0x48] sm:$0xff] %v712_v5  ;;  %678 = vst [vmem:[%s1145_s4 + $0x50] sm:$0xff] %v713_v17 }
 0x221   :  { %679 = vst.msk [vmem:[%s1145_s4 + $0x58] sm:$0xff] %vm1097_vm5, %v714_v24 }

// kernel: rollout_forward.4
= control target key start
LH: loop header
LB: loop body
LE: loop exit
PB: predicated region body
PF: predicated region fallthrough
CT: control target
= control target key end

     0   :  { %v1273_v1 = vmov 0   ;;  %vm564_vm0 = vcmask 130048   ;;  %vm784_vm1 = vcmask 269312   ;;  %vm989_vm2 = vcmask 265216   ;;  %s1723_s0 = inlined_call_operand.vmem [shape: bf16[400,289], index: 0, kind: input, shape index: {}]   ;;  %s1724_s1 = inlined_call_operand.vmem [shape: bf16[32,400], index: 1, kind: input, shape index: {}]   ;;  %s1725_s2 = inlined_call_operand.vmem [shape: f32[32,1], index: 2, kind: input, shape index: {}]   ;;  %s1726_s3 = inlined_call_operand.vmem [shape: f32[32,1], index: 3, kind: input, shape index: {}]   ;;  %s1727_s4 = inlined_call_operand.vmem [shape: bf16[32,289], index: 4, kind: output, shape index: {}]  }
   0x1   :  { %v1153_v0 = vld [vmem:[%s1723_s0 + $0xac] ss:$12 sps:$4 sm:$0xff]   ;;  %1151 = vset.pattern.permute.xlu0 %v1273_v1  ;;  %1152 = vset.pattern.permute.xlu1 %v1273_v1  ;;  %v1157_v3 = vld [vmem:[%s1723_s0 + $0xa8] ss:$12 sps:$4 sm:$0xff]   ;;  %v1163_v7 = vld [vmem:[%s1723_s0 + $0x90] ss:$12 sps:$4 sm:$0xff]  }
   0x2   :  { %v1155_v2 = vld [vmem:[%s1723_s0 + $0x22c] ss:$12 sps:$4 sm:$0xff]   ;;  %571 = vmatprep.subr.bf16.mxu0 %v1153_v0  ;;  %v1158_v4 = vld [vmem:[%s1723_s0 + $0x228] ss:$12 sps:$4 sm:$0xff]   ;;  %v1164_v8 = vld [vmem:[%s1723_s0 + $0x210] ss:$12 sps:$4 sm:$0xff]  }
   0x3   :  { %624 = vmatprep.subr.bf16.mxu1 %v1155_v2  ;;  %v1159_v5 = vld [vmem:[%s1723_s0 + $0x94] ss:$12 sps:$4 sm:$0xff]   ;;  %572 = vmatpush1.bf16.msra.mxu0 %v1157_v3  ;;  %v1165_v9 = vld [vmem:[%s1723_s0 + $0x7c] ss:$12 sps:$4 sm:$0xff]   ;;  %v1169_v11 = vld [vmem:[%s1723_s0 + $0x78] ss:$12 sps:$4 sm:$0xff]  }
   0x4   :  { %625 = vmatpush1.bf16.msra.mxu1 %v1158_v4  ;;  %v1161_v6 = vld [vmem:[%s1723_s0 + $0x214] ss:$12 sps:$4 sm:$0xff]   ;;  %573 = vmatprep.subr.bf16.mxu0 %v1159_v5  ;;  %v1167_v10 = vld [vmem:[%s1723_s0 + $0x1fc] ss:$12 sps:$4 sm:$0xff]   ;;  %v1170_v12 = vld [vmem:[%s1723_s0 + $0x1f8] ss:$12 sps:$4 sm:$0xff]  }
   0x5   :  { %626 = vmatprep.subr.bf16.mxu1 %v1161_v6  ;;  %v1171_v13 = vld [vmem:[%s1723_s0 + $0x64] ss:$12 sps:$4 sm:$0xff]   ;;  %v1175_v15 = vld [vmem:[%s1723_s0 + $0x60] ss:$12 sps:$4 sm:$0xff]   ;;  %v1181_v19 = vld [vmem:[%s1723_s0 + $0x48] ss:$12 sps:$4 sm:$0xff]  }
   0x6   :  { %v1173_v14 = vld [vmem:[%s1723_s0 + $0x1e4] ss:$12 sps:$4 sm:$0xff]   ;;  %v1176_v16 = vld [vmem:[%s1723_s0 + $0x1e0] ss:$12 sps:$4 sm:$0xff]   ;;  %v1182_v20 = vld [vmem:[%s1723_s0 + $0x1c8] ss:$12 sps:$4 sm:$0xff]  }
   0x7   :  { %574 = vmatpush1.bf16.msra.mxu0 %v1163_v7  ;;  %v1177_v17 = vld [vmem:[%s1723_s0 + $0x4c] ss:$12 sps:$4 sm:$0xff]   ;;  %v1183_v21 = vld [vmem:[%s1723_s0 + $0x34] ss:$12 sps:$4 sm:$0xff]   ;;  %v1187_v23 = vld [vmem:[%s1723_s0 + $0x30] ss:$12 sps:$4 sm:$0xff]  }
   0x8   :  { %627 = vmatpush1.bf16.msra.mxu1 %v1164_v8  ;;  %575 = vmatprep.subr.bf16.mxu0 %v1165_v9  ;;  %v1179_v18 = vld [vmem:[%s1723_s0 + $0x1cc] ss:$12 sps:$4 sm:$0xff]   ;;  %v1185_v22 = vld [vmem:[%s1723_s0 + $0x1b4] ss:$12 sps:$4 sm:$0xff]   ;;  %v1188_v24 = vld [vmem:[%s1723_s0 + $0x1b0] ss:$12 sps:$4 sm:$0xff]  }
   0x9   :  { %628 = vmatprep.subr.bf16.mxu1 %v1167_v10  ;;  %v1189_v25 = vld [vmem:[%s1723_s0 + $0x1c] ss:$12 sps:$4 sm:$0xff]   ;;  %v1193_v27 = vld [vmem:[%s1723_s0 + $0x18] ss:$12 sps:$4 sm:$0xff]   ;;  %v1199_v32 = vld [vmem:[%s1723_s0] ss:$12 sps:$4 sm:$0xff]  }
   0xa   :  { %v1191_v26 = vld [vmem:[%s1723_s0 + $0x19c] ss:$12 sps:$4 sm:$0xff]   ;;  %v1194_v28 = vld [vmem:[%s1723_s0 + $0x198] ss:$12 sps:$4 sm:$0xff]   ;;  %v1200_v33 = vld [vmem:[%s1723_s0 + $0x180] ss:$12 sps:$4 sm:$0xff]  }
   0xb   :  { %576 = vmatpush1.bf16.msra.mxu0 %v1169_v11  ;;  %v1195_v29 = vld [vmem:[%s1723_s0 + $0x4] ss:$12 sps:$4 sm:$0xff]   ;;  %v1394_v31 = vld [vmem:[%s1724_s1 + $0xc] ss:$16 sps:$4 sm:$0xff]   ;;  %v1205_v36 = vld [vmem:[%s1723_s0 + $0x168] ss:$12 sps:$4 sm:$0xff]  }
   0xc   :  { %629 = vmatpush1.bf16.msra.mxu1 %v1170_v12  ;;  %577 = vmatprep.subr.bf16.mxu0 %v1171_v13  ;;  %v1197_v30 = vld [vmem:[%s1723_s0 + $0x184] ss:$12 sps:$4 sm:$0xff]   ;;  %v1201_v34 = vld [vmem:[%s1723_s0 + $0x16c] ss:$12 sps:$4 sm:$0xff]   ;;  %v1210_v38 = vld [vmem:[%s1723_s0 + $0x154] ss:$12 sps:$4 sm:$0xff]  }
   0xd   :  { %630 = vmatprep.subr.bf16.mxu1 %v1173_v14  ;;  %1084 = vmatprep.mubr.msk.bf16.mxu1 %vm564_vm0, %v1394_v31  ;;  %v1203_v35 = vld [vmem:[%s1723_s0 + $0x244] ss:$12 sps:$4 sm:$0xff]   ;;  %v1206_v37 = vld [vmem:[%s1723_s0 + $0x240] ss:$12 sps:$4 sm:$0xff]   ;;  %v1425_v40 = vld [vmem:[%s1724_s1 + $0x8] ss:$16 sps:$4 sm:$0xff]  }
   0xe   :  { %v1212_v39 = vld [vmem:[%s1723_s0 + $0x170] ss:$12 sps:$4 sm:$0xff]   ;;  %v1217_v44 = vld [vmem:[%s1723_s0 + $0x158] ss:$12 sps:$4 sm:$0xff]   ;;  %v1222_v48 = vld [vmem:[%s1723_s0 + $0x140] ss:$12 sps:$4 sm:$0xff]  }
   0xf   :  { %578 = vmatpush1.bf16.msra.mxu0 %v1175_v15  ;;  %v1213_v41 = vld [vmem:[%s1723_s0 + $0x150] ss:$12 sps:$4 sm:$0xff]   ;;  %v1218_v45 = vld [vmem:[%s1723_s0 + $0x138] ss:$12 sps:$4 sm:$0xff]   ;;  %v1223_v49 = vld [vmem:[%s1723_s0 + $0x120] ss:$12 sps:$4 sm:$0xff]  }
  0x10   :  { %631 = vmatpush1.bf16.msra.mxu1 %v1176_v16  ;;  %579 = vmatprep.subr.bf16.mxu0 %v1177_v17  ;;  %v1214_v42 = vld [vmem:[%s1723_s0 + $0xb0] ss:$12 sps:$4 sm:$0xff]   ;;  %v1219_v46 = vld [vmem:[%s1723_s0 + $0x98] ss:$12 sps:$4 sm:$0xff]   ;;  %v1224_v50 = vld [vmem:[%s1723_s0 + $0x80] ss:$12 sps:$4 sm:$0xff]  }
  0x11   :  { %632 = vmatprep.subr.bf16.mxu1 %v1179_v18  ;;  %v1215_v43 = vld [vmem:[%s1723_s0 + $0x13c] ss:$12 sps:$4 sm:$0xff]   ;;  %v1220_v47 = vld [vmem:[%s1723_s0 + $0x124] ss:$12 sps:$4 sm:$0xff]   ;;  %v1225_v52 = vld [vmem:[%s1723_s0 + $0x10c] ss:$12 sps:$4 sm:$0xff]  }
  0x12   :  { %v1461_v51 = vld [vmem:[%s1724_s1 + $0x2c] ss:$16 sps:$4 sm:$0xff]   ;;  %v1227_v53 = vld [vmem:[%s1723_s0 + $0x128] ss:$12 sps:$4 sm:$0xff]   ;;  %v1239_v63 = vld [vmem:[%s1723_s0 + $0xf8] ss:$12 sps:$4 sm:$0xff]  }
  0x13   :  { %580 = vmatpush1.bf16.msra.mxu0 %v1181_v19  ;;  %v1472_v54 = vld [vmem:[%s1724_s1 + $0x28] ss:$16 sps:$4 sm:$0xff]   ;;  %v1230_v57 = vld [vmem:[%s1723_s0 + $0xf4] ss:$12 sps:$4 sm:$0xff]   ;;  %v1232_v58 = vld [vmem:[%s1723_s0 + $0x110] ss:$12 sps:$4 sm:$0xff]  }
  0x14   :  { %633 = vmatpush1.bf16.msra.mxu1 %v1182_v20  ;;  %581 = vmatprep.subr.bf16.mxu0 %v1183_v21  ;;  %v1228_v55 = vld [vmem:[%s1723_s0 + $0x108] ss:$12 sps:$4 sm:$0xff]   ;;  %v1233_v59 = vld [vmem:[%s1723_s0 + $0xf0] ss:$12 sps:$4 sm:$0xff]   ;;  %v1240_v0 = vld [vmem:[%s1723_s0 + $0xd8] ss:$12 sps:$4 sm:$0xff]  }
  0x15   :  { %634 = vmatprep.subr.bf16.mxu1 %v1185_v22  ;;  %v1229_v56 = vld [vmem:[%s1723_s0 + $0x68] ss:$12 sps:$4 sm:$0xff]   ;;  %v1234_v60 = vld [vmem:[%s1723_s0 + $0x50] ss:$12 sps:$4 sm:$0xff]   ;;  %v1242_v2 = vld [vmem:[%s1723_s0 + $0x38] ss:$12 sps:$4 sm:$0xff]  }
  0x16   :  { %v1250_v61 = vld [vmem:[%s1724_s1 + $0x4] ss:$16 sps:$4 sm:$0xff]   ;;  %v1235_v62 = vld [vmem:[%s1723_s0 + $0xdc] ss:$12 sps:$4 sm:$0xff]   ;;  %v1245_v4 = vld [vmem:[%s1723_s0 + $0xe0] ss:$12 sps:$4 sm:$0xff]  }
  0x17   :  { %582 = vmatpush1.bf16.msra.mxu0 %v1187_v23  ;;  %603 = vmatprep.mubr.bf16.mxu0 %v1250_v61  ;;  %v1243_v3 = vld [vmem:[%s1723_s0 + $0xc4] ss:$12 sps:$4 sm:$0xff]   ;;  %v1246_v5 = vld [vmem:[%s1723_s0 + $0xc0] ss:$12 sps:$4 sm:$0xff]   ;;  %v1251_v7 = vld [vmem:[%s1723_s0 + $0xc8] ss:$12 sps:$4 sm:$0xff]  }
  0x18   :  { %635 = vmatpush1.bf16.msra.mxu1 %v1188_v24  ;;  %583 = vmatprep.subr.bf16.mxu0 %v1189_v25  ;;  %v1247_v6 = vld [vmem:[%s1723_s0 + $0x20] ss:$12 sps:$4 sm:$0xff]   ;;  %v1252_v9 = vld [vmem:[%s1723_s0 + $0x8] ss:$12 sps:$4 sm:$0xff]   ;;  %v1253_v10 = vld [vmem:[%s1723_s0 + $0x230] ss:$12 sps:$4 sm:$0xff]  }
  0x19   :  { %636 = vmatprep.subr.bf16.mxu1 %v1191_v26  ;;  %v1248_v8 = vld [vmem:[%s1724_s1] ss:$16 sps:$4 sm:$0xff]   ;;  %v1255_v11 = vld [vmem:[%s1724_s1 + $0x24] ss:$16 sps:$4 sm:$0xff]  }
  0x1a   :  { %v1254_v12 = vld [vmem:[%s1723_s0 + $0x218] ss:$12 sps:$4 sm:$0xff]   ;;  %v1257_v13 = vld [vmem:[%s1724_s1 + $0x20] ss:$16 sps:$4 sm:$0xff]   ;;  %v1259_v15 = vld [vmem:[%s1723_s0 + $0x1e8] ss:$12 sps:$4 sm:$0xff]  }
  0x1b   :  { %584 = vmatpush1.bf16.msra.mxu0 %v1193_v27  ;;  %v1258_v14 = vld [vmem:[%s1723_s0 + $0x200] ss:$12 sps:$4 sm:$0xff]   ;;  %v1260_v16 = vld [vmem:[%s1723_s0 + $0x1d0] ss:$12 sps:$4 sm:$0xff]   ;;  %v1261_v17 = vld [vmem:[%s1723_s0 + $0x1b8] ss:$12 sps:$4 sm:$0xff]  }
  0x1c   :  { %637 = vmatpush1.bf16.msra.mxu1 %v1194_v28  ;;  %585 = vmatprep.subr.bf16.mxu0 %v1195_v29  ;;  %v1262_v18 = vld [vmem:[%s1723_s0 + $0x1a0] ss:$12 sps:$4 sm:$0xff]   ;;  %v1263_v19 = vld [vmem:[%s1723_s0 + $0x188] ss:$12 sps:$4 sm:$0xff]  }
  0x1d   :  { %638 = vmatprep.subr.bf16.mxu1 %v1197_v30  ;;  %v1264_v20 = vld [vmem:[%s1723_s0 + $0x248] ss:$12 sps:$4 sm:$0xff]  }
  0x1f   :  { %586 = vmatpush1.bf16.msra.mxu0 %v1199_v32 }
  0x20   :  { %639 = vmatpush1.bf16.msra.mxu1 %v1200_v33  ;;  %587 = vmatprep.subr.bf16.mxu0 %v1201_v34 }
  0x21   :  { %654 = vmatprep.subr.bf16.mxu1 %v1203_v35 }
  0x23   :  { %588 = vmatpush2.bf16.msra.mxu0 %v1205_v36 }
  0x24   :  { %655 = vmatpush2.bf16.msra.mxu1 %v1206_v37  ;;  %589 = vmatprep.subr.bf16.mxu0 %v1210_v38 }
  0x25   :  { %1104 = vmatprep.subr.bf16.mxu1 %v1212_v39 }
  0x27   :  { %657 = vmatmul.mubr.bf16.vlgmr.msra.gmra.mxu1 %v1425_v40  ;;  %590 = vmatpush2.bf16.msra.mxu0 %v1213_v41 }
  0x28   :  { %1105 = vmatpush3.bf16.msra.mxu1 %v1214_v42  ;;  %591 = vmatprep.subr.bf16.mxu0 %v1215_v43 }
  0x29   :  { %1106 = vmatprep.subr.bf16.mxu1 %v1217_v44  ;;  %1085 = vmatprep.mubr.msk.bf16.mxu1 %vm564_vm0, %v1461_v51 }
  0x2b   :  { %592 = vmatpush2.bf16.msra.mxu0 %v1218_v45 }
  0x2c   :  { %1107 = vmatpush3.bf16.msra.mxu1 %v1219_v46  ;;  %593 = vmatprep.subr.bf16.mxu0 %v1220_v47 }
  0x2d   :  { %1108 = vmatprep.subr.bf16.mxu1 %v1222_v48 }
  0x2f   :  { %667 = vmatmul.mubr.bf16.gmra.mxu1 %v1472_v54  ;;  %594 = vmatpush2.bf16.msra.mxu0 %v1223_v49 }
  0x30   :  { %1109 = vmatpush3.bf16.msra.mxu1 %v1224_v50  ;;  %595 = vmatprep.subr.bf16.mxu0 %v1225_v52 }
  0x31   :  { %1110 = vmatprep.subr.bf16.mxu1 %v1227_v53  ;;  %709 = vmatprep.mubr.bf16.mxu1 %v1250_v61 }
  0x33   :  { %596 = vmatpush2.bf16.msra.mxu0 %v1228_v55 }
  0x34   :  { %1111 = vmatpush3.bf16.msra.mxu1 %v1229_v56  ;;  %597 = vmatprep.subr.bf16.mxu0 %v1230_v57 }
  0x35   :  { %1112 = vmatprep.subr.bf16.mxu1 %v1232_v58 }
  0x37   :  { %598 = vmatpush2.bf16.msra.mxu0 %v1233_v59 }
  0x38   :  { %1113 = vmatpush3.bf16.msra.mxu1 %v1234_v60  ;;  %599 = vmatprep.subr.bf16.mxu0 %v1235_v62 }
  0x39   :  { %1114 = vmatprep.subr.bf16.mxu1 %v1239_v63 }
  0x3b   :  { %600 = vmatpush2.bf16.msra.mxu0 %v1240_v0 }
  0x3c   :  { %1115 = vmatpush3.bf16.msra.mxu1 %v1242_v2  ;;  %601 = vmatprep.subr.bf16.mxu0 %v1243_v3 }
  0x3d   :  { %1116 = vmatprep.subr.bf16.mxu1 %v1245_v4 }
  0x3f   :  { %602 = vmatpush2.bf16.msra.mxu0 %v1246_v5 }
  0x40   :  { %1117 = vmatpush3.bf16.msra.mxu1 %v1247_v6  ;;  %726 = vmatprep.subr.bf16.mxu0 %v1273_v1 }
  0x41   :  { %1118 = vmatprep.subr.bf16.mxu1 %v1251_v7 }
  0x42   :  { %604 = vmatmul.mubr.bf16.vlgmr.msra.gmra.mxu0 %v1248_v8 }
  0x43   :  { %727 = vmatpush1.bf16.msra.mxu0 %v1253_v10  ;;  %613 = vmatprep.mubr.bf16.mxu0 %v1255_v11 }
  0x44   :  { %1119 = vmatpush3.bf16.msra.mxu1 %v1252_v9  ;;  %728 = vmatprep.subr.bf16.mxu0 %v1273_v1 }
  0x45   :  { %1132 = vmatprep.subr.bf16.mxu1 %v1273_v1 }
  0x47   :  { %710 = vmatmul.mubr.bf16.vlgmr.msra.gmra.mxu1 %v1248_v8  ;;  %729 = vmatpush1.bf16.msra.mxu0 %v1254_v12 }
  0x48   :  { %1141 = vmatpush1.bf16.msra.mxu1 %v1253_v10  ;;  %730 = vmatprep.subr.bf16.mxu0 %v1273_v1 }
  0x49   :  { %1133 = vmatprep.subr.bf16.mxu1 %v1273_v1  ;;  %717 = vmatprep.mubr.bf16.mxu1 %v1255_v11 }
  0x4a   :  { %614 = vmatmul.mubr.bf16.gmra.mxu0 %v1257_v13 }
  0x4b   :  { %731 = vmatpush1.bf16.msra.mxu0 %v1258_v14  ;;  %1086 = vmatprep.mubr.msk.bf16.mxu0 %vm564_vm0, %v1394_v31 }
  0x4c   :  { %1142 = vmatpush1.bf16.msra.mxu1 %v1254_v12  ;;  %732 = vmatprep.subr.bf16.mxu0 %v1273_v1 }
  0x4d   :  { %1134 = vmatprep.subr.bf16.mxu1 %v1273_v1 }
  0x4f   :  { %718 = vmatmul.mubr.bf16.gmra.mxu1 %v1257_v13  ;;  %733 = vmatpush1.bf16.msra.mxu0 %v1259_v15 }
  0x50   :  { %1143 = vmatpush1.bf16.msra.mxu1 %v1258_v14  ;;  %734 = vmatprep.subr.bf16.mxu0 %v1273_v1 }
  0x51   :  { %1135 = vmatprep.subr.bf16.mxu1 %v1273_v1  ;;  %1087 = vmatprep.mubr.msk.bf16.mxu1 %vm564_vm0, %v1461_v51 }
  0x53   :  { %735 = vmatpush1.bf16.msra.mxu0 %v1260_v16 }
  0x54   :  { %1144 = vmatpush1.bf16.msra.mxu1 %v1259_v15  ;;  %736 = vmatprep.subr.bf16.mxu0 %v1273_v1 }
  0x55   :  { %1136 = vmatprep.subr.bf16.mxu1 %v1273_v1 }
  0x57   :  { %737 = vmatpush1.bf16.msra.mxu0 %v1261_v17 }
  0x58   :  { %1145 = vmatpush1.bf16.msra.mxu1 %v1260_v16  ;;  %738 = vmatprep.subr.bf16.mxu0 %v1273_v1 }
  0x59   :  { %1137 = vmatprep.subr.bf16.mxu1 %v1273_v1 }
  0x5b   :  { %739 = vmatpush1.bf16.msra.mxu0 %v1262_v18 }
  0x5c   :  { %1146 = vmatpush1.bf16.msra.mxu1 %v1261_v17  ;;  %740 = vmatprep.subr.bf16.mxu0 %v1273_v1 }
  0x5d   :  { %1138 = vmatprep.subr.bf16.mxu1 %v1273_v1 }
  0x5f   :  { %741 = vmatpush1.bf16.msra.mxu0 %v1263_v19 }
  0x60   :  { %1147 = vmatpush1.bf16.msra.mxu1 %v1262_v18  ;;  %756 = vmatprep.subr.bf16.mxu0 %v1273_v1 }
  0x61   :  { %1139 = vmatprep.subr.bf16.mxu1 %v1273_v1 }
  0x63   :  { %757 = vmatpush2.bf16.msra.mxu0 %v1264_v20 }
  0x64   :  { %1148 = vmatpush1.bf16.msra.mxu1 %v1263_v19 }
  0x65   :  { %1140 = vmatprep.subr.bf16.mxu1 %v1273_v1 }
  0x66   :  { %759 = vmatmul.mubr.bf16.vlgmr.msra.gmra.mxu0 %v1425_v40 }
  0x68   :  { %1149 = vmatpush2.bf16.msra.mxu1 %v1264_v20 }
  0x6b   :  { %767 = vmatmul.mubr.bf16.vlgmr.msra.gmra.mxu1 %v1472_v54 }
  0xe7   :  { %v658_v21 = vpop.f32.mrf.mxu1 }
  0xe9   :  { %v660_v22 = vpop.f32.mrf.mxu1 }
  0xeb   :  { %v662_v23 = vpop.f32.mrf.mxu1 }
  0xed   :  { %v664_v24 = vpop.f32.mrf.mxu1 }
  0xef   :  { %v668_v25 = vpop.f32.mrf.mxu1 }
  0xf1   :  { %v670_v26 = vpop.f32.mrf.mxu1 }
  0xf3   :  { %v1588_v27 = vpop.f32.mrf.mxu1 }
  0xf5   :  { %v674_v29 = vpop.f32.mrf.mxu1 }
 0x102   :  { %v605_v28 = vpop.f32.mrf.mxu0 }
 0x103   :  { %v1592_v45 = vadd.f32 %v658_v21, %v605_v28 }
 0x104   :  { %v607_v30 = vpop.f32.mrf.mxu0 }
 0x105   :  { %v1590_v41 = vadd.f32 %v660_v22, %v607_v30  ;;  %v808_v58 = vmul.f32 %v1592_v45, %v1592_v45 }
 0x106   :  { %v609_v32 = vpop.f32.mrf.mxu0 }
 0x107   :  { %v1120_v31 = vpop.f32.mrf.mxu1  ;;  %v809_v48 = vmul.f32 %v1590_v41, %v1590_v41  ;;  %v783_v53 = vadd.f32 %v1590_v41, %v1592_v45  ;;  %v1610_v59 = vadd.f32 %v662_v23, %v609_v32 }
 0x108   :  { %v611_v1 = vpop.f32.mrf.mxu0 }
 0x109   :  { %v1121_v33 = vpop.f32.mrf.mxu1  ;;  %v1598_v49 = vadd.f32 %v664_v24, %v611_v1  ;;  %v820_v8 = vadd.f32 %v809_v48, %v808_v58  ;;  %v811_v12 = vmul.f32 %v1610_v59, %v1610_v59 }
 0x10a   :  { %v615_v35 = vpop.f32.mrf.mxu0  ;;  %v1122_v44 = vadd.f32 %v1121_v33, %v1120_v31 }
 0x10b   :  { %v1123_v34 = vpop.f32.mrf.mxu1  ;;  %v1612_v60 = vadd.f32 %v668_v25, %v615_v35  ;;  %v812_v4 = vmul.f32 %v1598_v49, %v1598_v49  ;;  %v789_v16 = vadd.f32 %v1598_v49, %v1610_v59 }
 0x10c   :  { %v617_v37 = vpop.f32.mrf.mxu0 }
 0x10d   :  { %v1124_v36 = vpop.f32.mrf.mxu1  ;;  %v1600_v50 = vadd.f32 %v670_v26, %v617_v37  ;;  %v825_v24 = vadd.f32 %v812_v4, %v811_v12  ;;  %v814_v25 = vmul.f32 %v1612_v60, %v1612_v60 }
 0x10e   :  { %v619_v39 = vpop.f32.mrf.mxu0  ;;  %v1125_v54 = vadd.f32 %v1124_v36, %v1123_v34 }
 0x10f   :  { %v1126_v38 = vpop.f32.mrf.mxu1  ;;  %v794_v7 = vadd.f32 %v1600_v50, %v1612_v60  ;;  %v815_v21 = vmul.f32 %v1600_v50, %v1600_v50  ;;  %v1645_v26 = vadd.f32 %v1588_v27, %v619_v39 }
 0x110   :  { %v621_v42 = vpop.f32.mrf.mxu0 }
 0x111   :  { %v1127_v40 = vpop.f32.mrf.mxu1  ;;  %v1640_v22 = vadd.f32 %v674_v29, %v621_v42  ;;  %v830_v1 = vadd.f32 %v815_v21, %v814_v25  ;;  %v817_v34 = vmul.f32 %v1645_v26, %v1645_v26 }
 0x112   :  { %v1128_v55 = vadd.f32 %v1127_v40, %v1126_v38 }
 0x113   :  { %v1129_v43 = vpop.f32.mrf.mxu1  ;;  %v818_v33 = vmul.f32 %v1640_v22, %v1640_v22  ;;  %v799_v27 = vadd.f32 %v1640_v22, %v1645_v26 }
 0x115   :  { %v1130_v51 = vpop.f32.mrf.mxu1  ;;  %v835_v38 = vadd.f32 %v818_v33, %v817_v34 }
 0x116   :  { %v1131_v9 = vadd.f32 %v1130_v51, %v1129_v43 }
 0x126   :  { %v760_v46 = vpop.f32.mrf.mxu0 }
 0x127   :  { %v1594_v47 = vadd.f32 %v1122_v44, %v760_v46 }
 0x128   :  { %v762_v52 = vpop.f32.mrf.mxu0 }
 0x129   :  { %v785_v56 = vsel %vm784_vm1, %v1594_v47, 0.0  ;;  %v810_v57 = vmul.f32 %v1594_v47, %v1594_v47 }
 0x12a   :  { %v763_v61 = vpop.f32.mrf.mxu0  ;;  %v786_v63 = vadd.f32 %v785_v56, %v783_v53 }
 0x12b   :  { %v768_v62 = vpop.f32.mrf.mxu1  ;;  %v1614_v0 = vadd.f32 %v1125_v54, %v763_v61  ;;  %v821_v3 = vsel %vm784_vm1, %v810_v57, 0.0 }
 0x12c   :  { %v1616_v2 = vadd.f32 %v1128_v55, %v768_v62  ;;  %v765_v5 = vpop.f32.mrf.mxu0  ;;  %787 = vadd.xlane.f32.xlu0 %v786_v63  ;;  %v822_v15 = vadd.f32 %v821_v3, %v820_v8 }
 0x12d   :  { %v770_v6 = vpop.f32.mrf.mxu1  ;;  %v813_v11 = vmul.f32 %v1614_v0, %v1614_v0  ;;  %v790_v19 = vsel %vm784_vm1, %v1614_v0, 0.0 }
 0x12e   :  { %v795_v10 = vsel %vm784_vm1, %v1616_v2, 0.0  ;;  %v816_v20 = vmul.f32 %v1616_v2, %v1616_v2  ;;  %v791_v30 = vadd.f32 %v790_v19, %v789_v16 }
 0x12f   :  { %v771_v13 = vpop.f32.mrf.mxu1  ;;  %v796_v14 = vadd.f32 %v795_v10, %v794_v7  ;;  %v826_v18 = vsel %vm784_vm1, %v813_v11, 0.0 }
 0x130   :  { %v1631_v17 = vadd.f32 %v1131_v9, %v771_v13  ;;  %823 = vadd.xlane.f32.xlu0 %v822_v15  ;;  %v827_v28 = vadd.f32 %v826_v18, %v825_v24  ;;  %v831_v31 = vsel %vm784_vm1, %v816_v20, 0.0  ;;  %v775_v13 = vld [vmem:[%s1725_s2] sm:$0xff]  ;;  %v776_v18 = vld [vmem:[%s1725_s2 + $0x8] sm:$0xff] }
 0x131   :  { %v773_v23 = vpop.f32.mrf.mxu1  ;;  %797 = vadd.xlane.f32.xlu1 %v796_v14  ;;  %v832_v35 = vadd.f32 %v831_v31, %v830_v1  ;;  %v780_v1 = vld [vmem:[%s1726_s3 + $0x8] sm:$0xff] }
 0x132   :  { %v800_v32 = vsel %vm784_vm1, %v1631_v17, 0.0  ;;  %v819_v29 = vmul.f32 %v1631_v17, %v1631_v17  ;;  %v777_v23 = vld [vmem:[%s1725_s2 + $0x10] sm:$0xff] }
 0x133   :  { %v801_v36 = vadd.f32 %v800_v32, %v799_v27  ;;  %v778_v32 = vld [vmem:[%s1725_s2 + $0x18] sm:$0xff] }
 0x134   :  { %792 = vadd.xlane.f32.xlu0 %v791_v30  ;;  %v836_v37 = vsel %vm784_vm1, %v819_v29, 0.0 }
 0x135   :  { %828 = vadd.xlane.f32.xlu1 %v827_v28  ;;  %v837_v39 = vadd.f32 %v836_v37, %v835_v38  ;;  %v779_v28 = vld [vmem:[%s1726_s3] sm:$0xff]  ;;  %v782_v38 = vld [vmem:[%s1726_s3 + $0x18] sm:$0xff] }
 0x138   :  { %833 = vadd.xlane.f32.xlu0 %v832_v35  ;;  %v781_v35 = vld [vmem:[%s1726_s3 + $0x10] sm:$0xff] }
 0x139   :  { %802 = vadd.xlane.f32.xlu1 %v801_v36 }
 0x13d   :  { %838 = vadd.xlane.f32.xlu1 %v837_v39 }
 0x1b5   :  { %v788_v40 = vpop.xlane.xlu0 %787 }
 0x1b6   :  { %v804_v42 = vmul.f32 0.0034602077, %v788_v40 }
 0x1b8   :  { %v844_v46 = vmul.f32 %v804_v42, %v804_v42 }
 0x1b9   :  { %v824_v44 = vpop.xlane.xlu0 %823 }
 0x1ba   :  { %v798_v43 = vpop.xlane.xlu1 %797  ;;  %v840_v48 = vmul.f32 0.0034602077, %v824_v44 }
 0x1bb   :  { %v806_v54 = vmul.f32 0.0034602077, %v798_v43 }
 0x1bc   :  { %v848_v51 = vsub.f32 %v840_v48, %v844_v46 }
 0x1bd   :  { %v793_v53 = vpop.xlane.xlu0 %792  ;;  %v846_v63 = vmul.f32 %v806_v54, %v806_v54 }
 0x1be   :  { %v829_v52 = vpop.xlane.xlu1 %828  ;;  %v852_v55 = vadd.f32 1e-05, %v848_v51  ;;  %v805_v56 = vmul.f32 0.0034602077, %v793_v53 }
 0x1bf   :  { %v841_v57 = vmul.f32 0.0034602077, %v829_v52 }
 0x1c0   :  { %1265 = vrsqrt.f32 %v852_v55  ;;  %v845_v58 = vmul.f32 %v805_v56, %v805_v56 }
 0x1c1   :  { %v834_v61 = vpop.xlane.xlu0 %833 }
 0x1c2   :  { %v803_v62 = vpop.xlane.xlu1 %802  ;;  %v849_v3 = vsub.f32 %v841_v57, %v845_v58  ;;  %v842_v4 = vmul.f32 0.0034602077, %v834_v61 }
 0x1c3   :  { %v807_v5 = vmul.f32 0.0034602077, %v803_v62 }
 0x1c4   :  { %v853_v6 = vadd.f32 1e-05, %v849_v3  ;;  %v850_v7 = vsub.f32 %v842_v4, %v846_v63 }
 0x1c5   :  { %v847_v10 = vmul.f32 %v807_v5, %v807_v5 }
 0x1c6   :  { %v839_v8 = vpop.xlane.xlu1 %838  ;;  %1267 = vrsqrt.f32 %v853_v6  ;;  %v854_v9 = vadd.f32 1e-05, %v850_v7 }
 0x1c7   :  { %v843_v11 = vmul.f32 0.0034602077, %v839_v8 }
 0x1c8   :  { %1269 = vrsqrt.f32 %v854_v9 }
 0x1c9   :  { %v851_v12 = vsub.f32 %v843_v11, %v847_v10 }
 0x1cb   :  { %v855_v14 = vadd.f32 1e-05, %v851_v12 }
 0x1cd   :  { %v1266_v15 = vpop.eup %1265  ;;  %1271 = vrsqrt.f32 %v855_v14 }
 0x1ce   :  { %v860_v16 = vmul.f32 %v1266_v15, %v775_v13 }
 0x1d0   :  { %874 = vperm.xlu0 %1151, %v860_v16   ;;  %v864_v25 = vmul.f32 %v860_v16, %v804_v42 }
 0x1d2   :  { %v868_v30 = vsub.f32 %v779_v28, %v864_v25 }
 0x1d3   :  { %v1268_v19 = vpop.eup %1267 }
 0x1d4   :  { %v861_v20 = vmul.f32 %v1268_v19, %v776_v18 }
 0x1d5   :  { %v1270_v21 = vpop.eup %1269 }
 0x1d6   :  { %879 = vperm.xlu1 %1152, %v861_v20   ;;  %v862_v24 = vmul.f32 %v1270_v21, %v777_v23  ;;  %v865_v29 = vmul.f32 %v861_v20, %v805_v56 }
 0x1d8   :  { %v869_v27 = vsub.f32 %v780_v1, %v865_v29  ;;  %v866_v34 = vmul.f32 %v862_v24, %v806_v54 }
 0x1da   :  { %884 = vperm.xlu1 %1152, %v862_v24   ;;  %v1272_v31 = vpop.eup %1271  ;;  %v870_v36 = vsub.f32 %v781_v35, %v866_v34 }
 0x1db   :  { %v863_v33 = vmul.f32 %v1272_v31, %v778_v32 }
 0x1dd   :  { %v867_v37 = vmul.f32 %v863_v33, %v807_v5 }
 0x1de   :  { %906 = vperm.xlu1 %1152, %v868_v30  }
 0x1df   :  { %v871_v39 = vsub.f32 %v782_v38, %v867_v37 }
 0x1e2   :  { %889 = vperm.xlu1 %1152, %v863_v33  }
 0x1e6   :  { %911 = vperm.xlu1 %1152, %v869_v27  }
 0x1ea   :  { %916 = vperm.xlu1 %1152, %v870_v36  }
 0x1ee   :  { %921 = vperm.xlu1 %1152, %v871_v39  }
 0x24b   :  { %v875_v42 = vpop.permute.xlu0 %874 }
 0x24c   :  { %v892_v44 = vmul.f32 %v875_v42, %v1592_v45  ;;  %v893_v46 = vmul.f32 %v875_v42, %v1590_v41  ;;  %v894_v48 = vmul.f32 %v875_v42, %v1594_v47 }
 0x251   :  { %v880_v40 = vpop.permute.xlu1 %879 }
 0x252   :  { %v895_v63 = vmul.f32 %v880_v40, %v1610_v59  ;;  %v896_v3 = vmul.f32 %v880_v40, %v1598_v49  ;;  %v897_v45 = vmul.f32 %v880_v40, %v1614_v0 }
 0x255   :  { %v885_v43 = vpop.permute.xlu1 %884 }
 0x256   :  { %v898_v6 = vmul.f32 %v885_v43, %v1612_v60  ;;  %v899_v59 = vmul.f32 %v885_v43, %v1600_v50  ;;  %v900_v8 = vmul.f32 %v885_v43, %v1616_v2 }
 0x259   :  { %v907_v51 = vpop.permute.xlu1 %906 }
 0x25a   :  { %v924_v52 = vadd.f32 %v907_v51, %v892_v44  ;;  %v925_v53 = vadd.f32 %v907_v51, %v893_v46  ;;  %v926_v54 = vadd.f32 %v907_v51, %v894_v48 }
 0x25c   :  { %v936_v55 = vmax.f32 %v924_v52, 0.0  ;;  %v937_v56 = vmax.f32 %v925_v53, 0.0  ;;  %v938_v57 = vmax.f32 %v926_v54, 0.0 }
 0x25d   :  { %v890_v58 = vpop.permute.xlu1 %889 }
 0x25e   :  { %v1096_v61 = vpack.c.bf16 %v937_v56, %v936_v55  ;;  %v1097_v62 = vpack.c.bf16 %v938_v57, %v938_v57  ;;  %v901_v14 = vmul.f32 %v890_v58, %v1645_v26  ;;  %v902_v16 = vmul.f32 %v890_v58, %v1640_v22 }
 0x25f   :  { %v903_v18 = vmul.f32 %v890_v58, %v1631_v17 }
 0x260   :  { %988 = vst [vmem:[%s1727_s4] sm:$0xff] %v1096_v61  ;;  %990 = vst.msk [vmem:[%s1727_s4 + $0x8] sm:$0xf] %vm989_vm2, %v1097_v62 }
 0x261   :  { %v912_v41 = vpop.permute.xlu1 %911 }
 0x262   :  { %v927_v47 = vadd.f32 %v912_v41, %v895_v63  ;;  %v928_v4 = vadd.f32 %v912_v41, %v896_v3  ;;  %v929_v5 = vadd.f32 %v912_v41, %v897_v45 }
 0x264   :  { %v939_v49 = vmax.f32 %v927_v47, 0.0  ;;  %v940_v7 = vmax.f32 %v928_v4, 0.0  ;;  %v941_v0 = vmax.f32 %v929_v5, 0.0 }
 0x265   :  { %v917_v9 = vpop.permute.xlu1 %916 }
 0x266   :  { %v1098_v10 = vpack.c.bf16 %v940_v7, %v939_v49  ;;  %v1099_v11 = vpack.c.bf16 %v941_v0, %v941_v0  ;;  %v930_v12 = vadd.f32 %v917_v9, %v898_v6  ;;  %v931_v13 = vadd.f32 %v917_v9, %v899_v59 }
 0x267   :  { %v932_v15 = vadd.f32 %v917_v9, %v900_v8 }
 0x268   :  { %991 = vst [vmem:[%s1727_s4 + $0xc] sm:$0xff] %v1098_v10  ;;  %992 = vst.msk [vmem:[%s1727_s4 + $0x14] sm:$0xf] %vm989_vm2, %v1099_v11  ;;  %v942_v50 = vmax.f32 %v930_v12, 0.0  ;;  %v943_v60 = vmax.f32 %v931_v13, 0.0 }
 0x269   :  { %v944_v2 = vmax.f32 %v932_v15, 0.0  ;;  %v922_v19 = vpop.permute.xlu1 %921 }
 0x26a   :  { %v1100_v20 = vpack.c.bf16 %v943_v60, %v942_v50  ;;  %v933_v26 = vadd.f32 %v922_v19, %v901_v14  ;;  %v934_v21 = vadd.f32 %v922_v19, %v902_v16  ;;  %v935_v23 = vadd.f32 %v922_v19, %v903_v18 }
 0x26b   :  { %v1101_v22 = vpack.c.bf16 %v944_v2, %v944_v2 }
 0x26c   :  { %993 = vst [vmem:[%s1727_s4 + $0x18] sm:$0xff] %v1100_v20  ;;  %v945_v17 = vmax.f32 %v933_v26, 0.0  ;;  %v946_v24 = vmax.f32 %v934_v21, 0.0  ;;  %v947_v25 = vmax.f32 %v935_v23, 0.0 }
 0x26d   :  { %994 = vst.msk [vmem:[%s1727_s4 + $0x20] sm:$0xf] %vm989_vm2, %v1101_v22 }
 0x26e   :  { %v1102_v28 = vpack.c.bf16 %v946_v24, %v945_v17  ;;  %v1103_v30 = vpack.c.bf16 %v947_v25, %v947_v25 }
 0x270   :  { %995 = vst [vmem:[%s1727_s4 + $0x24] sm:$0xff] %v1102_v28  ;;  %996 = vst.msk [vmem:[%s1727_s4 + $0x2c] sm:$0xf] %vm989_vm2, %v1103_v30 }

// kernel: rollout_forward.5
= control target key start
LH: loop header
LB: loop body
LE: loop exit
PB: predicated region body
PF: predicated region fallthrough
CT: control target
= control target key end

     0   :  { %vm543_vm0 = vcmask 261120   ;;  %vm754_vm1 = vcmask 400384   ;;  %vm2338_vm2 = vcmask 1042432   ;;  %vm2334_vm3 = vcmask 48128   ;;  %s8445_s0 = inlined_call_operand.vmem [shape: bf16[800,49], index: 0, kind: input, shape index: {}]   ;;  %s8446_s1 = inlined_call_operand.vmem [shape: bf16[32,800], index: 1, kind: input, shape index: {}]   ;;  %s8447_s2 = inlined_call_operand.vmem [shape: f32[32,1], index: 2, kind: input, shape index: {}]   ;;  %s8448_s3 = inlined_call_operand.vmem [shape: f32[32,1], index: 3, kind: input, shape index: {}]   ;;  %s8449_s4 = inlined_call_operand.vmem [shape: f32[49,32,128], index: 4, kind: input, shape index: {}]   ;;  %s8450_s9 = inlined_call_operand.vmem [shape: bf16[128,128], index: 9, kind: input, shape index: {}]   ;;  %s8451_s7 = inlined_call_operand.vmem [shape: bf16[6,384], index: 7, kind: input, shape index: {}]   ;;  %s8452_s6 = inlined_call_operand.vmem [shape: bf16[6,6], index: 6, kind: input, shape index: {}]   ;;  %s8453_s11 = inlined_call_operand.vmem [shape: bf16[128,128], index: 11, kind: input, shape index: {}]   ;;  %s8454_s5 = inlined_call_operand.vmem [shape: f32[1,128], index: 5, kind: input, shape index: {}]   ;;  %s8455_s13 = inlined_call_operand.vmem [shape: bf16[128,128], index: 13, kind: input, shape index: {}]   ;;  %s8456_s8 = inlined_call_operand.vmem [shape: f32[1,384], index: 8, kind: input, shape index: {}]   ;;  %s8457_s10 = inlined_call_operand.vmem [shape: f32[1,128], index: 10, kind: input, shape index: {}]   ;;  %s8458_s12 = inlined_call_operand.vmem [shape: f32[1,128], index: 12, kind: input, shape index: {}]   ;;  %s8459_s14 = inlined_call_operand.vmem [shape: f32[1,128], index: 14, kind: input, shape index: {}]   ;;  %s8460_s15 = inlined_call_operand.vmem [shape: bf16[128,2], index: 15, kind: input, shape index: {}]   ;;  %s8461_s16 = inlined_call_operand.vmem [shape: f32[1,2], index: 16, kind: input, shape index: {}]   ;;  %s8462_s17 = inlined_call_operand.vmem [shape: f32[6,2], index: 17, kind: output, shape index: {}]  }
   0x1   :  { %8542 = sst [smem:[#allocation4_spill]] %s8445_s0  ;;  %vm6125_vm4 = vmmov 0   ;;  %vm4525_vm5 = vcmask 13312  }
   0x2   :  { %8543 = sst [smem:[#allocation5_spill]] %s8446_s1 }
   0x3   :  { %s8544_s26 = sld [smem:[#allocation4_spill]] }
   0x4   :  { %s8545_s20 = sld [smem:[#allocation5_spill]] }
   0x9   :  { %v5842_v0 = vld [vmem:[%s8544_s26 + $0x78] sm:$0xff]   ;;  %v5846_v4 = vld [vmem:[%s8544_s26 + $0x70] sm:$0xff]   ;;  %v5850_v8 = vld [vmem:[%s8544_s26 + $0x68] sm:$0xff]  }
   0xa   :  { %v5843_v1 = vld [vmem:[%s8544_s26 + $0xf8] sm:$0xff]   ;;  %4948 = vmatprep.subr.bf16.mxu0 %v5842_v0  ;;  %v5847_v5 = vld [vmem:[%s8544_s26 + $0xf0] sm:$0xff]   ;;  %v5851_v9 = vld [vmem:[%s8544_s26 + $0xe8] sm:$0xff]  }
   0xb   :  { %v5844_v2 = vld [vmem:[%s8544_s26 + $0x38] sm:$0xff]   ;;  %4976 = vmatprep.subr.bf16.mxu1 %v5843_v1  ;;  %v5848_v6 = vld [vmem:[%s8544_s26 + $0x30] sm:$0xff]   ;;  %v5852_v10 = vld [vmem:[%s8544_s26 + $0x28] sm:$0xff]  }
   0xc   :  { %v5845_v3 = vld [vmem:[%s8544_s26 + $0xb8] sm:$0xff]   ;;  %4949 = vmatpush3.bf16.msra.mxu0 %v5844_v2  ;;  %v5849_v7 = vld [vmem:[%s8544_s26 + $0xb0] sm:$0xff]   ;;  %v5853_v11 = vld [vmem:[%s8544_s26 + $0xa8] sm:$0xff]  }
   0xd   :  { %4977 = vmatpush3.bf16.msra.mxu1 %v5845_v3  ;;  %4950 = vmatprep.subr.bf16.mxu0 %v5846_v4  ;;  %v5854_v12 = vld [vmem:[%s8544_s26 + $0x60] sm:$0xff]   ;;  %v5858_v16 = vld [vmem:[%s8544_s26 + $0x58] sm:$0xff]   ;;  %v5862_v20 = vld [vmem:[%s8544_s26 + $0x50] sm:$0xff]  }
   0xe   :  { %4978 = vmatprep.subr.bf16.mxu1 %v5847_v5  ;;  %v5855_v13 = vld [vmem:[%s8544_s26 + $0xe0] sm:$0xff]   ;;  %v5859_v17 = vld [vmem:[%s8544_s26 + $0xd8] sm:$0xff]   ;;  %v5863_v21 = vld [vmem:[%s8544_s26 + $0xd0] sm:$0xff]  }
   0xf   :  { %v5856_v14 = vld [vmem:[%s8544_s26 + $0x20] sm:$0xff]   ;;  %v5860_v18 = vld [vmem:[%s8544_s26 + $0x18] sm:$0xff]   ;;  %v5864_v22 = vld [vmem:[%s8544_s26 + $0x10] sm:$0xff]  }
  0x10   :  { %4951 = vmatpush3.bf16.msra.mxu0 %v5848_v6  ;;  %v5857_v15 = vld [vmem:[%s8544_s26 + $0xa0] sm:$0xff]   ;;  %v5861_v19 = vld [vmem:[%s8544_s26 + $0x98] sm:$0xff]   ;;  %v5865_v23 = vld [vmem:[%s8544_s26 + $0x90] sm:$0xff]  }
  0x11   :  { %4979 = vmatpush3.bf16.msra.mxu1 %v5849_v7  ;;  %4952 = vmatprep.subr.bf16.mxu0 %v5850_v8  ;;  %v5866_v24 = vld [vmem:[%s8544_s26 + $0x48] sm:$0xff]   ;;  %v5870_v28 = vld [vmem:[%s8544_s26 + $0x40] sm:$0xff]   ;;  %v5880_v36 = vld [vmem:[%s8544_s26 + $0x178] sm:$0xff]  }
  0x12   :  { %4980 = vmatprep.subr.bf16.mxu1 %v5851_v9  ;;  %v5867_v25 = vld [vmem:[%s8544_s26 + $0xc8] sm:$0xff]   ;;  %v5871_v29 = vld [vmem:[%s8544_s26 + $0xc0] sm:$0xff]   ;;  %v5881_v37 = vld [vmem:[%s8544_s26 + $0x138] sm:$0xff]  }
  0x13   :  { %v5868_v26 = vld [vmem:[%s8544_s26 + $0x8] sm:$0xff]   ;;  %v5872_v30 = vld [vmem:[%s8544_s26] sm:$0xff]   ;;  %v5882_v38 = vld [vmem:[%s8544_s26 + $0x170] sm:$0xff]  }
  0x14   :  { %4953 = vmatpush3.bf16.msra.mxu0 %v5852_v10  ;;  %v5869_v27 = vld [vmem:[%s8544_s26 + $0x88] sm:$0xff]   ;;  %v5873_v31 = vld [vmem:[%s8544_s26 + $0x80] sm:$0xff]   ;;  %v5883_v39 = vld [vmem:[%s8544_s26 + $0x130] sm:$0xff]  }
  0x15   :  { %4981 = vmatpush3.bf16.msra.mxu1 %v5853_v11  ;;  %4954 = vmatprep.subr.bf16.mxu0 %v5854_v12  ;;  %v5874_v32 = vld [vmem:[%s8545_s20] ss:$28 sps:$4 sm:$0xff]   ;;  %v5877_v34 = vld [vmem:[%s8545_s20 + $0x8] ss:$28 sps:$4 sm:$0xff]   ;;  %v5894_v47 = vld [vmem:[%s8545_s20 + $0x38] ss:$28 sps:$4 sm:$0xff]  }
  0x16   :  { %4982 = vmatprep.subr.bf16.mxu1 %v5855_v13  ;;  %v5876_v33 = vld [vmem:[%s8545_s20 + $0x4] ss:$28 sps:$4 sm:$0xff]   ;;  %v5879_v35 = vld [vmem:[%s8545_s20 + $0xc] ss:$28 sps:$4 sm:$0xff]   ;;  %v5889_v44 = vld [vmem:[%s8545_s20 + $0x3c] ss:$28 sps:$4 sm:$0xff]  }
  0x17   :  { %582 = vmatprep.mubr.bf16.mxu0 %v5876_v33  ;;  %631 = vmatprep.mubr.bf16.mxu1 %v5879_v35  ;;  %v5884_v40 = vld [vmem:[%s8544_s26 + $0x168] sm:$0xff]   ;;  %v5886_v42 = vld [vmem:[%s8544_s26 + $0x160] sm:$0xff]   ;;  %v5888_v46 = vld [vmem:[%s8544_s26 + $0x158] sm:$0xff]  }
  0x18   :  { %4955 = vmatpush3.bf16.msra.mxu0 %v5856_v14  ;;  %v5885_v41 = vld [vmem:[%s8544_s26 + $0x128] sm:$0xff]   ;;  %v5887_v43 = vld [vmem:[%s8544_s26 + $0x120] sm:$0xff]   ;;  %v5893_v50 = vld [vmem:[%s8544_s26 + $0x118] sm:$0xff]  }
  0x19   :  { %4983 = vmatpush3.bf16.msra.mxu1 %v5857_v15  ;;  %4956 = vmatprep.subr.bf16.mxu0 %v5858_v16  ;;  %v5891_v45 = vld [vmem:[%s8545_s20 + $0x44] ss:$28 sps:$4 sm:$0xff]   ;;  %v5896_v49 = vld [vmem:[%s8544_s26 + $0x188] sm:$0xff]   ;;  %v5897_v51 = vld [vmem:[%s8544_s26 + $0x150] sm:$0xff]  }
  0x1a   :  { %4984 = vmatprep.subr.bf16.mxu1 %v5859_v17  ;;  %v5895_v48 = vld [vmem:[%s8545_s20 + $0x40] ss:$28 sps:$4 sm:$0xff]   ;;  %v5898_v53 = vld [vmem:[%s8544_s26 + $0x110] sm:$0xff]   ;;  %v5899_v54 = vld [vmem:[%s8544_s26 + $0x148] sm:$0xff]  }
  0x1b   :  { %v5901_v52 = vld [vmem:[%s8544_s26 + $0x180] sm:$0xff]   ;;  %v5904_v55 = vld [vmem:[%s8545_s20 + $0x18] ss:$28 sps:$4 sm:$0xff]   ;;  %v5905_v56 = vld [vmem:[%s8545_s20 + $0x50] ss:$28 sps:$4 sm:$0xff]  }
  0x1c   :  { %4957 = vmatpush3.bf16.msra.mxu0 %v5860_v18  ;;  %v5900_v57 = vld [vmem:[%s8544_s26 + $0x108] sm:$0xff]   ;;  %v5908_v58 = vld [vmem:[%s8545_s20 + $0x14] ss:$28 sps:$4 sm:$0xff]   ;;  %v5902_v59 = vld [vmem:[%s8544_s26 + $0x140] sm:$0xff]  }
  0x1d   :  { %4985 = vmatpush3.bf16.msra.mxu1 %v5861_v19  ;;  %4958 = vmatprep.subr.bf16.mxu0 %v5862_v20  ;;  %v5903_v60 = vld [vmem:[%s8544_s26 + $0x100] sm:$0xff]   ;;  %v5906_v61 = vld [vmem:[%s8545_s20 + $0x10] ss:$28 sps:$4 sm:$0xff]  }
  0x1e   :  { %4986 = vmatprep.subr.bf16.mxu1 %v5863_v21  ;;  %v5909_v62 = vld [vmem:[%s8545_s20 + $0x4c] ss:$28 sps:$4 sm:$0xff]  }
  0x1f   :  { %v5911_v63 = vld [vmem:[%s8545_s20 + $0x48] ss:$28 sps:$4 sm:$0xff]  }
  0x20   :  { %4959 = vmatpush3.bf16.msra.mxu0 %v5864_v22 }
  0x21   :  { %4987 = vmatpush3.bf16.msra.mxu1 %v5865_v23  ;;  %4960 = vmatprep.subr.bf16.mxu0 %v5866_v24 }
  0x22   :  { %4988 = vmatprep.subr.bf16.mxu1 %v5867_v25 }
  0x24   :  { %4961 = vmatpush3.bf16.msra.mxu0 %v5868_v26 }
  0x25   :  { %4989 = vmatpush3.bf16.msra.mxu1 %v5869_v27  ;;  %4962 = vmatprep.subr.bf16.mxu0 %v5870_v28 }
  0x26   :  { %4990 = vmatprep.subr.bf16.mxu1 %v5871_v29 }
  0x28   :  { %4963 = vmatpush3.bf16.msra.mxu0 %v5872_v30 }
  0x29   :  { %4991 = vmatpush3.bf16.msra.mxu1 %v5873_v31  ;;  %5004 = vmatprep.subr.bf16.mxu0 %v5880_v36 }
  0x2a   :  { %5209 = vmatprep.subr.bf16.mxu1 %v5896_v49 }
  0x2b   :  { %583 = vmatmul.mubr.bf16.vlgmr.msra.gmra.mxu0 %v5874_v32 }
  0x2c   :  { %632 = vmatmul.mubr.bf16.vlgmr.msra.gmra.mxu1 %v5877_v34  ;;  %5005 = vmatpush3.bf16.msra.mxu0 %v5881_v37 }
  0x2d   :  { %5006 = vmatprep.subr.bf16.mxu0 %v5882_v38  ;;  %590 = vmatprep.mubr.bf16.mxu0 %v5889_v44 }
  0x2e   :  { %639 = vmatprep.mubr.bf16.mxu1 %v5891_v45  ;;  %5210 = vmatpush3.bf16.msra.mxu1 %v5896_v49 }
  0x2f   :  { %5211 = vmatprep.subr.bf16.mxu1 %v5901_v52 }
  0x30   :  { %5007 = vmatpush3.bf16.msra.mxu0 %v5883_v39 }
  0x31   :  { %5008 = vmatprep.subr.bf16.mxu0 %v5884_v40 }
  0x32   :  { %5212 = vmatpush3.bf16.msra.mxu1 %v5901_v52 }
  0x33   :  { %591 = vmatmul.mubr.bf16.gmra.mxu0 %v5894_v47 }
  0x34   :  { %5009 = vmatpush3.bf16.msra.mxu0 %v5885_v41  ;;  %640 = vmatmul.mubr.bf16.gmra.mxu1 %v5895_v48 }
  0x35   :  { %5010 = vmatprep.subr.bf16.mxu0 %v5886_v42  ;;  %5213 = vmatprep.mubr.msk.bf16.mxu1 %vm543_vm0, %v5904_v55 }
  0x36   :  { %680 = vmatprep.mubr.bf16.mxu0 %v5908_v58 }
  0x38   :  { %5011 = vmatpush3.bf16.msra.mxu0 %v5887_v43 }
  0x39   :  { %5012 = vmatprep.subr.bf16.mxu0 %v5888_v46 }
  0x3c   :  { %5013 = vmatpush3.bf16.msra.mxu0 %v5893_v50  ;;  %5214 = vmatmul.mubr.msk.bf16.vlgmr.msra.gmra.mxu1 %vm543_vm0, %v5905_v56 }
  0x3d   :  { %5014 = vmatprep.subr.bf16.mxu0 %v5897_v51 }
  0x40   :  { %5015 = vmatpush3.bf16.msra.mxu0 %v5898_v53 }
  0x41   :  { %5016 = vmatprep.subr.bf16.mxu0 %v5899_v54 }
  0x44   :  { %5017 = vmatpush3.bf16.msra.mxu0 %v5900_v57 }
  0x45   :  { %5018 = vmatprep.subr.bf16.mxu0 %v5902_v59 }
  0x48   :  { %5019 = vmatpush3.bf16.msra.mxu0 %v5903_v60 }
  0x4b   :  { %681 = vmatmul.mubr.bf16.vlgmr.msra.gmra.mxu0 %v5906_v61 }
  0x4c   :  { %688 = vmatprep.mubr.bf16.mxu0 %v5909_v62 }
  0x53   :  { %689 = vmatmul.mubr.bf16.gmra.mxu0 %v5911_v63 }
  0xeb   :  { %v4964_v1 = vpop.f32.mrf.mxu0 }
  0xec   :  { %v4992_v0 = vpop.f32.mrf.mxu1 }
  0xed   :  { %v4965_v3 = vpop.f32.mrf.mxu0 }
  0xee   :  { %v4993_v2 = vpop.f32.mrf.mxu1  ;;  %v4966_v17 = vadd.f32 %v4965_v3, %v4964_v1 }
  0xef   :  { %v4967_v5 = vpop.f32.mrf.mxu0  ;;  %v4994_v18 = vadd.f32 %v4993_v2, %v4992_v0  ;;  %v8509_v0 = vmov 0  }
  0xf0   :  { %v4995_v4 = vpop.f32.mrf.mxu1  ;;  %5654 = vset.pattern.permute.xlu0 %v8509_v0  ;;  %5655 = vset.pattern.permute.xlu1 %v8509_v0 }
  0xf1   :  { %v4968_v7 = vpop.f32.mrf.mxu0  ;;  %v634_v22 = vadd.f32 %v4994_v18, %v4966_v17  ;;  %2380 = vmatprep.mubr.bf16.mxu1 %v8509_v0 }
  0xf2   :  { %v4996_v6 = vpop.f32.mrf.mxu1  ;;  %v4969_v23 = vadd.f32 %v4968_v7, %v4967_v5 }
  0xf3   :  { %v4970_v9 = vpop.f32.mrf.mxu0  ;;  %v4997_v24 = vadd.f32 %v4996_v6, %v4995_v4 }
  0xf4   :  { %v4998_v8 = vpop.f32.mrf.mxu1 }
  0xf5   :  { %v4971_v11 = vpop.f32.mrf.mxu0  ;;  %v637_v32 = vadd.f32 %v4997_v24, %v4969_v23 }
  0xf6   :  { %v4999_v10 = vpop.f32.mrf.mxu1  ;;  %v4972_v28 = vadd.f32 %v4971_v11, %v4970_v9 }
  0xf7   :  { %v4973_v13 = vpop.f32.mrf.mxu0  ;;  %v5000_v29 = vadd.f32 %v4999_v10, %v4998_v8 }
  0xf8   :  { %v5001_v12 = vpop.f32.mrf.mxu1 }
  0xf9   :  { %v4974_v15 = vpop.f32.mrf.mxu0  ;;  %v642_v39 = vadd.f32 %v5000_v29, %v4972_v28 }
  0xfa   :  { %v5002_v14 = vpop.f32.mrf.mxu1  ;;  %v4975_v40 = vadd.f32 %v4974_v15, %v4973_v13 }
  0xfb   :  { %v5003_v43 = vadd.f32 %v5002_v14, %v5001_v12 }
  0xfc   :  { %v5215_v16 = vpop.f32.mrf.mxu1 }
  0xfd   :  { %v645_v52 = vadd.f32 %v5003_v43, %v4975_v40  ;;  %v748_v40 = vld [vmem:[%s8447_s2 + $0x10] sm:$0xff] }
  0xfe   :  { %v731_v20 = vpop.f32.mrf.mxu1 }
 0x100   :  { %v5216_v30 = vpop.f32.mrf.mxu1 }
 0x102   :  { %v734_v41 = vpop.f32.mrf.mxu1 }
 0x10b   :  { %v5020_v19 = vpop.f32.mrf.mxu0 }
 0x10d   :  { %v5021_v21 = vpop.f32.mrf.mxu0 }
 0x10e   :  { %v5022_v25 = vadd.f32 %v5021_v21, %v5020_v19 }
 0x10f   :  { %v5023_v26 = vpop.f32.mrf.mxu0 }
 0x110   :  { %v683_v27 = vadd.f32 %v5022_v25, %v634_v22 }
 0x111   :  { %v5024_v31 = vpop.f32.mrf.mxu0 }
 0x112   :  { %v5025_v33 = vadd.f32 %v5024_v31, %v5023_v26  ;;  %v6408_v34 = vadd.f32 %v731_v20, %v683_v27  ;;  %v746_v27 = vld [vmem:[%s8447_s2] sm:$0xff] }
 0x113   :  { %v5026_v35 = vpop.f32.mrf.mxu0 }
 0x114   :  { %v686_v36 = vadd.f32 %v5025_v33, %v637_v32  ;;  %v755_v37 = vsel %vm754_vm1, %v6408_v34, 0.0  ;;  %v771_v38 = vmul.f32 %v6408_v34, %v6408_v34  ;;  %v747_v32 = vld [vmem:[%s8447_s2 + $0x8] sm:$0xff] }
 0x115   :  { %v5027_v42 = vpop.f32.mrf.mxu0  ;;  %756 = vadd.xlane.f32.xlu0 %v755_v37  ;;  %v750_v37 = vld [vmem:[%s8448_s3] sm:$0xff] }
 0x116   :  { %v6414_v44 = vadd.f32 %v734_v41, %v686_v36  ;;  %v5028_v45 = vadd.f32 %v5027_v42, %v5026_v35  ;;  %v775_v46 = vsel %vm754_vm1, %v771_v38, 0.0  ;;  %v8508_v41 = vmov 2  }
 0x117   :  { %v5029_v47 = vpop.f32.mrf.mxu0  ;;  %776 = vadd.xlane.f32.xlu1 %v775_v46 }
 0x118   :  { %v691_v48 = vadd.f32 %v5028_v45, %v642_v39  ;;  %v758_v49 = vsel %vm754_vm1, %v6414_v44, 0.0  ;;  %v772_v50 = vmul.f32 %v6414_v44, %v6414_v44  ;;  %v751_v45 = vld [vmem:[%s8448_s3 + $0x8] sm:$0xff] }
 0x119   :  { %v5030_v51 = vpop.f32.mrf.mxu0  ;;  %759 = vadd.xlane.f32.xlu0 %v758_v49 }
 0x11a   :  { %v6421_v53 = vadd.f32 %v5215_v16, %v691_v48  ;;  %v5031_v54 = vadd.f32 %v5030_v51, %v5029_v47  ;;  %v778_v57 = vsel %vm754_vm1, %v772_v50, 0.0  ;;  %v749_v48 = vld [vmem:[%s8447_s2 + $0x18] sm:$0xff]  ;;  %v752_v51 = vld [vmem:[%s8448_s3 + $0x10] sm:$0xff] }
 0x11c   :  { %v694_v55 = vadd.f32 %v5031_v54, %v645_v52  ;;  %v761_v56 = vsel %vm754_vm1, %v6421_v53, 0.0  ;;  %v773_v58 = vmul.f32 %v6421_v53, %v6421_v53 }
 0x11d   :  { %762 = vadd.xlane.f32.xlu1 %v761_v56  ;;  %779 = vadd.xlane.f32.xlu0 %v778_v57 }
 0x11e   :  { %v6428_v59 = vadd.f32 %v5216_v30, %v694_v55  ;;  %v781_v61 = vsel %vm754_vm1, %v773_v58, 0.0  ;;  %v753_v55 = vld [vmem:[%s8448_s3 + $0x18] sm:$0xff] }
 0x120   :  { %v764_v60 = vsel %vm754_vm1, %v6428_v59, 0.0  ;;  %v774_v62 = vmul.f32 %v6428_v59, %v6428_v59 }
 0x121   :  { %765 = vadd.xlane.f32.xlu1 %v764_v60  ;;  %782 = vadd.xlane.f32.xlu0 %v781_v61 }
 0x122   :  { %v784_v63 = vsel %vm754_vm1, %v774_v62, 0.0 }
 0x125   :  { %785 = vadd.xlane.f32.xlu1 %v784_v63 }
 0x19e   :  { %v757_v1 = vpop.xlane.xlu0 %756 }
 0x19f   :  { %v767_v2 = vmul.f32 0.020408163, %v757_v1  ;;  %v8504_v1 = vmov 4  }
 0x1a0   :  { %v777_v3 = vpop.xlane.xlu1 %776 }
 0x1a1   :  { %v791_v4 = vmul.f32 %v767_v2, %v767_v2  ;;  %v787_v5 = vmul.f32 0.020408163, %v777_v3  ;;  %v8503_v3 = vmov 6  }
 0x1a2   :  { %v760_v6 = vpop.xlane.xlu0 %759 }
 0x1a3   :  { %v795_v7 = vsub.f32 %v787_v5, %v791_v4  ;;  %v768_v8 = vmul.f32 0.020408163, %v760_v6  ;;  %v8505_v4 = vmov 8   ;;  %v8511_v5 = vmov 5  }
 0x1a4   :  { %v8506_v6 = vmov 10  }
 0x1a5   :  { %v799_v9 = vadd.f32 1e-05, %v795_v7  ;;  %v792_v12 = vmul.f32 %v768_v8, %v768_v8  ;;  %v8527_v7 = vmov 7  }
 0x1a6   :  { %v763_v10 = vpop.xlane.xlu1 %762  ;;  %v780_v11 = vpop.xlane.xlu0 %779 }
 0x1a7   :  { %6067 = vrsqrt.f32 %v799_v9  ;;  %v769_v13 = vmul.f32 0.020408163, %v763_v10  ;;  %v788_v14 = vmul.f32 0.020408163, %v780_v11  ;;  %v8526_v9 = vmov 9  }
 0x1a8   :  { %v8521_v10 = vmov 14   ;;  %v8525_v11 = vmov 11  }
 0x1a9   :  { %v796_v15 = vsub.f32 %v788_v14, %v792_v12  ;;  %v793_v18 = vmul.f32 %v769_v13, %v769_v13  ;;  %v8524_v12 = vmov 16   ;;  %v8522_v14 = vmov 18  }
 0x1aa   :  { %v766_v16 = vpop.xlane.xlu1 %765  ;;  %v783_v17 = vpop.xlane.xlu0 %782 }
 0x1ab   :  { %v800_v19 = vadd.f32 1e-05, %v796_v15  ;;  %v789_v20 = vmul.f32 0.020408163, %v783_v17  ;;  %v770_v21 = vmul.f32 0.020408163, %v766_v16 }
 0x1ac   :  { %v8501_v15 = vmov 15   ;;  %v8523_v16 = vmov 20   ;;  %v8473_v17 = vmov 17  }
 0x1ad   :  { %6069 = vrsqrt.f32 %v800_v19  ;;  %v797_v22 = vsub.f32 %v789_v20, %v793_v18  ;;  %v794_v26 = vmul.f32 %v770_v21, %v770_v21  ;;  %v8517_v18 = vmov 22  }
 0x1ae   :  { %v786_v23 = vpop.xlane.xlu1 %785  ;;  %v8469_v19 = vmov 19   ;;  %v8495_v20 = vmov 24  }
 0x1af   :  { %v801_v24 = vadd.f32 1e-05, %v797_v22  ;;  %v790_v25 = vmul.f32 0.020408163, %v786_v23  ;;  %v8477_v22 = vmov 26   ;;  %v8467_v23 = vmov 23  }
 0x1b1   :  { %6071 = vrsqrt.f32 %v801_v24  ;;  %v798_v28 = vsub.f32 %v790_v25, %v794_v26  ;;  %v8481_v24 = vmov 28   ;;  %v8471_v25 = vmov 25  }
 0x1b2   :  { %v8485_v26 = vmov 30  }
 0x1b3   :  { %v802_v31 = vadd.f32 1e-05, %v798_v28  ;;  %v8493_v28 = vmov 32  }
 0x1b4   :  { %v6068_v29 = vpop.eup %6067 }
 0x1b5   :  { %v807_v30 = vmul.f32 %v6068_v29, %v746_v27  ;;  %6073 = vrsqrt.f32 %v802_v31  ;;  %v8475_v27 = vmov 27   ;;  %v8479_v29 = vmov 29  }
 0x1b6   :  { %v8483_v31 = vmov 31  }
 0x1b7   :  { %821 = vperm.xlu0 %5654, %v807_v30   ;;  %v811_v36 = vmul.f32 %v807_v30, %v767_v2  ;;  %v8514_v2 = vmov 1   ;;  %v8491_v30 = vmov 34  }
 0x1b9   :  { %v815_v38 = vsub.f32 %v750_v37, %v811_v36 }
 0x1ba   :  { %v6070_v33 = vpop.eup %6069 }
 0x1bb   :  { %v808_v35 = vmul.f32 %v6070_v33, %v747_v32  ;;  %5657 = vset.pattern.permute.xlu0 %v8508_v41  ;;  %v8499_v33 = vmov 36  }
 0x1bd   :  { %826 = vperm.xlu1 %5655, %v808_v35   ;;  %v812_v43 = vmul.f32 %v808_v35, %v768_v8  ;;  %v8510_v8 = vmov 12   ;;  %v8487_v35 = vmov 33  }
 0x1be   :  { %v6072_v39 = vpop.eup %6071 }
 0x1bf   :  { %v809_v42 = vmul.f32 %v6072_v39, %v748_v40  ;;  %v816_v46 = vsub.f32 %v751_v45, %v812_v43  ;;  %v8515_v39 = vmov 38   ;;  %v8489_v40 = vmov 35  }
 0x1c0   :  { %v8497_v43 = vmov 37  }
 0x1c1   :  { %845 = vperm.xlu1 %5655, %v815_v38   ;;  %v813_v50 = vmul.f32 %v809_v42, %v769_v13  ;;  %v8519_v13 = vmov 13  }
 0x1c2   :  { %v6074_v47 = vpop.eup %6073 }
 0x1c3   :  { %v810_v49 = vmul.f32 %v6074_v47, %v749_v48  ;;  %v817_v52 = vsub.f32 %v752_v51, %v813_v50 }
 0x1c5   :  { %831 = vperm.xlu1 %5655, %v809_v42   ;;  %v814_v54 = vmul.f32 %v810_v49, %v770_v21  ;;  %v8465_v21 = vmov 21  }
 0x1c7   :  { %v818_v56 = vsub.f32 %v753_v55, %v814_v54 }
 0x1c9   :  { %850 = vperm.xlu1 %5655, %v816_v46  }
 0x1cd   :  { %836 = vperm.xlu1 %5655, %v810_v49  }
 0x1d1   :  { %855 = vperm.xlu1 %5655, %v817_v52  }
 0x1d5   :  { %860 = vperm.xlu1 %5655, %v818_v56  }
 0x232   :  { %v822_v57 = vpop.permute.xlu0 %821 }
 0x233   :  { %v839_v60 = vmul.f32 %v822_v57, %v6408_v34  ;;  %v8507_v34 = vmov 3  }
 0x238   :  { %v6464_v58 = vpop.permute.xlu1 %826 }
 0x239   :  { %v840_v37 = vmul.f32 %v6464_v58, %v6414_v44  ;;  %v8512_v44 = vmov 39  }
 0x23c   :  { %v846_v61 = vpop.permute.xlu1 %845 }
 0x23d   :  { %v863_v62 = vadd.f32 %v846_v61, %v839_v60 }
 0x23f   :  { %v6467_v63 = vmax.f32 %v863_v62, 0.0 }
 0x240   :  { %v6533_v32 = vpop.permute.xlu1 %831 }
 0x241   :  { %938 = vperm.xlu0 %5657, %v6467_v63   ;;  %877 = vperm.xlu1 %5655, %v6467_v63  }
 0x244   :  { %v851_v36 = vpop.permute.xlu1 %850 }
 0x245   :  { %5659 = vset.pattern.permute.xlu0 %v8504_v1  ;;  %5656 = vset.pattern.permute.xlu1 %v8514_v2  ;;  %v864_v38 = vadd.f32 %v851_v36, %v840_v37 }
 0x246   :  { %996 = vperm.xlu0 %5659, %v6467_v63   ;;  %909 = vperm.xlu1 %5656, %v6467_v63  }
 0x247   :  { %v6547_v42 = vmax.f32 %v864_v38, 0.0 }
 0x248   :  { %v6561_v45 = vpop.permute.xlu1 %836 }
 0x24a   :  { %5661 = vset.pattern.permute.xlu0 %v8503_v3  ;;  %5658 = vset.pattern.permute.xlu1 %v8507_v34 }
 0x24b   :  { %1054 = vperm.xlu0 %5661, %v6467_v63   ;;  %967 = vperm.xlu1 %5658, %v6467_v63  }
 0x24c   :  { %v6567_v46 = vpop.permute.xlu1 %855 }
 0x24f   :  { %5663 = vset.pattern.permute.xlu0 %v8505_v4  ;;  %5660 = vset.pattern.permute.xlu1 %v8511_v5 }
 0x250   :  { %1112 = vperm.xlu0 %5663, %v6467_v63   ;;  %1025 = vperm.xlu1 %5660, %v6467_v63   ;;  %v6573_v47 = vpop.permute.xlu1 %860 }
 0x254   :  { %5665 = vset.pattern.permute.xlu0 %v8506_v6  ;;  %5662 = vset.pattern.permute.xlu1 %v8527_v7 }
 0x255   :  { %1170 = vperm.xlu0 %5665, %v6467_v63   ;;  %1083 = vperm.xlu1 %5662, %v6467_v63  }
 0x259   :  { %5667 = vset.pattern.permute.xlu0 %v8510_v8  ;;  %5664 = vset.pattern.permute.xlu1 %v8526_v9 }
 0x25a   :  { %1228 = vperm.xlu0 %5667, %v6467_v63   ;;  %1141 = vperm.xlu1 %5664, %v6467_v63  }
 0x25e   :  { %5669 = vset.pattern.permute.xlu0 %v8521_v10  ;;  %5666 = vset.pattern.permute.xlu1 %v8525_v11 }
 0x25f   :  { %1286 = vperm.xlu0 %5669, %v6467_v63   ;;  %1199 = vperm.xlu1 %5666, %v6467_v63  }
 0x263   :  { %5671 = vset.pattern.permute.xlu0 %v8524_v12  ;;  %5668 = vset.pattern.permute.xlu1 %v8519_v13 }
 0x264   :  { %1344 = vperm.xlu0 %5671, %v6467_v63   ;;  %1257 = vperm.xlu1 %5668, %v6467_v63  }
 0x268   :  { %5673 = vset.pattern.permute.xlu0 %v8522_v14  ;;  %5670 = vset.pattern.permute.xlu1 %v8501_v15 }
 0x269   :  { %1402 = vperm.xlu0 %5673, %v6467_v63   ;;  %1315 = vperm.xlu1 %5670, %v6467_v63  }
 0x26d   :  { %5675 = vset.pattern.permute.xlu0 %v8523_v16  ;;  %5672 = vset.pattern.permute.xlu1 %v8473_v17 }
 0x26e   :  { %1460 = vperm.xlu0 %5675, %v6467_v63   ;;  %1373 = vperm.xlu1 %5672, %v6467_v63  }
 0x272   :  { %5677 = vset.pattern.permute.xlu0 %v8517_v18  ;;  %5674 = vset.pattern.permute.xlu1 %v8469_v19 }
 0x273   :  { %1518 = vperm.xlu0 %5677, %v6467_v63   ;;  %1431 = vperm.xlu1 %5674, %v6467_v63  }
 0x277   :  { %5679 = vset.pattern.permute.xlu0 %v8495_v20  ;;  %5676 = vset.pattern.permute.xlu1 %v8465_v21 }
 0x278   :  { %1576 = vperm.xlu0 %5679, %v6467_v63   ;;  %1489 = vperm.xlu1 %5676, %v6467_v63  }
 0x27c   :  { %5681 = vset.pattern.permute.xlu0 %v8477_v22  ;;  %5678 = vset.pattern.permute.xlu1 %v8467_v23 }
 0x27d   :  { %1634 = vperm.xlu0 %5681, %v6467_v63   ;;  %1547 = vperm.xlu1 %5678, %v6467_v63  }
 0x281   :  { %5683 = vset.pattern.permute.xlu0 %v8481_v24  ;;  %5680 = vset.pattern.permute.xlu1 %v8471_v25 }
 0x282   :  { %1692 = vperm.xlu0 %5683, %v6467_v63   ;;  %1605 = vperm.xlu1 %5680, %v6467_v63  }
 0x286   :  { %5685 = vset.pattern.permute.xlu0 %v8485_v26  ;;  %5682 = vset.pattern.permute.xlu1 %v8475_v27 }
 0x287   :  { %1750 = vperm.xlu0 %5685, %v6467_v63   ;;  %1663 = vperm.xlu1 %5682, %v6467_v63  }
 0x28b   :  { %5687 = vset.pattern.permute.xlu0 %v8493_v28  ;;  %5684 = vset.pattern.permute.xlu1 %v8479_v29 }
 0x28c   :  { %1808 = vperm.xlu0 %5687, %v6467_v63   ;;  %1721 = vperm.xlu1 %5684, %v6467_v63  }
 0x290   :  { %5689 = vset.pattern.permute.xlu0 %v8491_v30  ;;  %5686 = vset.pattern.permute.xlu1 %v8483_v31 }
 0x291   :  { %1866 = vperm.xlu0 %5689, %v6467_v63   ;;  %1779 = vperm.xlu1 %5686, %v6467_v63  }
 0x295   :  { %5691 = vset.pattern.permute.xlu0 %v8499_v33  ;;  %5688 = vset.pattern.permute.xlu1 %v8487_v35 }
 0x296   :  { %1924 = vperm.xlu0 %5691, %v6467_v63   ;;  %1837 = vperm.xlu1 %5688, %v6467_v63  }
 0x29a   :  { %5693 = vset.pattern.permute.xlu0 %v8515_v39  ;;  %5690 = vset.pattern.permute.xlu1 %v8489_v40 }
 0x29b   :  { %1982 = vperm.xlu0 %5693, %v6467_v63   ;;  %1895 = vperm.xlu1 %5690, %v6467_v63  }
 0x29f   :  { %5695 = vset.pattern.permute.xlu0 %v8509_v0  ;;  %5692 = vset.pattern.permute.xlu1 %v8497_v43 }
 0x2a0   :  { %882 = vperm.xlu0 %5695, %v6547_v42   ;;  %1953 = vperm.xlu1 %5692, %v6467_v63  }
 0x2a4   :  { %5696 = vset.pattern.permute.xlu0 %v8514_v2  ;;  %5694 = vset.pattern.permute.xlu1 %v8512_v44 }
 0x2a5   :  { %913 = vperm.xlu0 %5696, %v6547_v42   ;;  %2011 = vperm.xlu1 %5694, %v6467_v63  }
 0x2a9   :  { %5698 = vset.pattern.permute.xlu0 %v8507_v34  ;;  %5697 = vset.pattern.permute.xlu1 %v8508_v41 }
 0x2aa   :  { %971 = vperm.xlu0 %5698, %v6547_v42   ;;  %942 = vperm.xlu1 %5697, %v6547_v42  }
 0x2ae   :  { %5700 = vset.pattern.permute.xlu0 %v8511_v5  ;;  %5699 = vset.pattern.permute.xlu1 %v8504_v1 }
 0x2af   :  { %1029 = vperm.xlu0 %5700, %v6547_v42   ;;  %1000 = vperm.xlu1 %5699, %v6547_v42  }
 0x2b3   :  { %5702 = vset.pattern.permute.xlu0 %v8527_v7  ;;  %5701 = vset.pattern.permute.xlu1 %v8503_v3 }
 0x2b4   :  { %1087 = vperm.xlu0 %5702, %v6547_v42   ;;  %1058 = vperm.xlu1 %5701, %v6547_v42  }
 0x2b8   :  { %5704 = vset.pattern.permute.xlu0 %v8526_v9  ;;  %5703 = vset.pattern.permute.xlu1 %v8505_v4 }
 0x2b9   :  { %1145 = vperm.xlu0 %5704, %v6547_v42   ;;  %1116 = vperm.xlu1 %5703, %v6547_v42  }
 0x2bc   :  { %v6579_v48 = vpop.permute.xlu0 %938  ;;  %v6581_v49 = vpop.permute.xlu1 %877 }
 0x2bd   :  { %5706 = vset.pattern.permute.xlu0 %v8525_v11  ;;  %5705 = vset.pattern.permute.xlu1 %v8506_v6 }
 0x2be   :  { %1203 = vperm.xlu0 %5706, %v6547_v42   ;;  %1174 = vperm.xlu1 %5705, %v6547_v42  }
 0x2c1   :  { %v6587_v50 = vpop.permute.xlu0 %996  ;;  %v6589_v51 = vpop.permute.xlu1 %909 }
 0x2c2   :  { %5708 = vset.pattern.permute.xlu0 %v8519_v13  ;;  %5707 = vset.pattern.permute.xlu1 %v8510_v8 }
 0x2c3   :  { %1261 = vperm.xlu0 %5708, %v6547_v42   ;;  %1232 = vperm.xlu1 %5707, %v6547_v42  }
 0x2c6   :  { %v6595_v52 = vpop.permute.xlu0 %1054  ;;  %v6597_v54 = vpop.permute.xlu1 %967 }
 0x2c7   :  { %5710 = vset.pattern.permute.xlu0 %v8501_v15  ;;  %5709 = vset.pattern.permute.xlu1 %v8521_v10 }
 0x2c8   :  { %1319 = vperm.xlu0 %5710, %v6547_v42   ;;  %1290 = vperm.xlu1 %5709, %v6547_v42  }
 0x2cb   :  { %v6603_v55 = vpop.permute.xlu0 %1112  ;;  %v6605_v56 = vpop.permute.xlu1 %1025 }
 0x2cc   :  { %5712 = vset.pattern.permute.xlu0 %v8473_v17  ;;  %5711 = vset.pattern.permute.xlu1 %v8524_v12 }
 0x2cd   :  { %1377 = vperm.xlu0 %5712, %v6547_v42   ;;  %1348 = vperm.xlu1 %5711, %v6547_v42  }
 0x2d0   :  { %v6611_v57 = vpop.permute.xlu0 %1170  ;;  %v6613_v58 = vpop.permute.xlu1 %1083 }
 0x2d1   :  { %5714 = vset.pattern.permute.xlu0 %v8469_v19  ;;  %5713 = vset.pattern.permute.xlu1 %v8522_v14 }
 0x2d2   :  { %1435 = vperm.xlu0 %5714, %v6547_v42   ;;  %1406 = vperm.xlu1 %5713, %v6547_v42  }
 0x2d5   :  { %v6619_v60 = vpop.permute.xlu0 %1228  ;;  %v6621_v61 = vpop.permute.xlu1 %1141 }
 0x2d6   :  { %5716 = vset.pattern.permute.xlu0 %v8465_v21  ;;  %5715 = vset.pattern.permute.xlu1 %v8523_v16 }
 0x2d7   :  { %1493 = vperm.xlu0 %5716, %v6547_v42   ;;  %1464 = vperm.xlu1 %5715, %v6547_v42  }
 0x2da   :  { %v6627_v62 = vpop.permute.xlu0 %1286  ;;  %v6629_v36 = vpop.permute.xlu1 %1199 }
 0x2db   :  { %5718 = vset.pattern.permute.xlu0 %v8467_v23  ;;  %5717 = vset.pattern.permute.xlu1 %v8517_v18 }
 0x2dc   :  { %1551 = vperm.xlu0 %5718, %v6547_v42   ;;  %1522 = vperm.xlu1 %5717, %v6547_v42  }
 0x2df   :  { %v6635_v37 = vpop.permute.xlu0 %1344  ;;  %v6637_v38 = vpop.permute.xlu1 %1257 }
 0x2e0   :  { %5720 = vset.pattern.permute.xlu0 %v8471_v25  ;;  %5719 = vset.pattern.permute.xlu1 %v8495_v20 }
 0x2e1   :  { %1609 = vperm.xlu0 %5720, %v6547_v42   ;;  %1580 = vperm.xlu1 %5719, %v6547_v42  }
 0x2e4   :  { %v6643_v21 = vpop.permute.xlu0 %1402  ;;  %v6645_v23 = vpop.permute.xlu1 %1315 }
 0x2e5   :  { %5722 = vset.pattern.permute.xlu0 %v8475_v27  ;;  %5721 = vset.pattern.permute.xlu1 %v8477_v22 }
 0x2e6   :  { %1667 = vperm.xlu0 %5722, %v6547_v42   ;;  %1638 = vperm.xlu1 %5721, %v6547_v42  }
 0x2e9   :  { %v6651_v19 = vpop.permute.xlu0 %1460  ;;  %v6653_v25 = vpop.permute.xlu1 %1373 }
 0x2ea   :  { %5724 = vset.pattern.permute.xlu0 %v8479_v29  ;;  %5723 = vset.pattern.permute.xlu1 %v8481_v24 }
 0x2eb   :  { %1725 = vperm.xlu0 %5724, %v6547_v42   ;;  %1696 = vperm.xlu1 %5723, %v6547_v42  }
 0x2ee   :  { %v6659_v17 = vpop.permute.xlu0 %1518  ;;  %v6661_v27 = vpop.permute.xlu1 %1431 }
 0x2ef   :  { %5726 = vset.pattern.permute.xlu0 %v8483_v31  ;;  %5725 = vset.pattern.permute.xlu1 %v8485_v26 }
 0x2f0   :  { %1783 = vperm.xlu0 %5726, %v6547_v42   ;;  %1754 = vperm.xlu1 %5725, %v6547_v42  }
 0x2f3   :  { %v6667_v22 = vpop.permute.xlu0 %1576  ;;  %v6669_v29 = vpop.permute.xlu1 %1489 }
 0x2f4   :  { %5728 = vset.pattern.permute.xlu0 %v8487_v35  ;;  %5727 = vset.pattern.permute.xlu1 %v8493_v28 }
 0x2f5   :  { %1841 = vperm.xlu0 %5728, %v6547_v42   ;;  %1812 = vperm.xlu1 %5727, %v6547_v42  }
 0x2f8   :  { %v6675_v24 = vpop.permute.xlu0 %1634  ;;  %v6677_v31 = vpop.permute.xlu1 %1547 }
 0x2f9   :  { %5730 = vset.pattern.permute.xlu0 %v8489_v40  ;;  %5729 = vset.pattern.permute.xlu1 %v8491_v30  ;;  %v841_v40 = vmul.f32 %v6533_v32, %v6421_v53 }
 0x2fa   :  { %1899 = vperm.xlu0 %5730, %v6547_v42   ;;  %1870 = vperm.xlu1 %5729, %v6547_v42  }
 0x2fb   :  { %v865_v20 = vadd.f32 %v6567_v46, %v841_v40 }
 0x2fd   :  { %v6683_v26 = vpop.permute.xlu0 %1692  ;;  %v6685_v35 = vpop.permute.xlu1 %1605 }
 0x2fe   :  { %5732 = vset.pattern.permute.xlu0 %v8497_v43  ;;  %5731 = vset.pattern.permute.xlu1 %v8499_v33  ;;  %v6702_v43 = vmax.f32 %v865_v20, 0.0 }
 0x2ff   :  { %1957 = vperm.xlu0 %5732, %v6547_v42   ;;  %1928 = vperm.xlu1 %5731, %v6547_v42  }
 0x302   :  { %v6693_v30 = vpop.permute.xlu0 %1750  ;;  %v6695_v28 = vpop.permute.xlu1 %1663 }
 0x303   :  { %5734 = vset.pattern.permute.xlu0 %v8512_v44  ;;  %5733 = vset.pattern.permute.xlu1 %v8515_v39 }
 0x304   :  { %2015 = vperm.xlu0 %5734, %v6547_v42   ;;  %1986 = vperm.xlu1 %5733, %v6547_v42  }
 0x307   :  { %v6704_v33 = vpop.permute.xlu0 %1808  ;;  %v6706_v15 = vpop.permute.xlu1 %1721 }
 0x308   :  { %5739 = vset.pattern.permute.xlu0 %v8504_v1  ;;  %5735 = vset.pattern.permute.xlu1 %v8509_v0  ;;  %v872_v0 = vld [vmem:[%s8449_s4 + $0x8] sm:$0xff] }
 0x309   :  { %1004 = vperm.xlu0 %5739, %v6702_v43   ;;  %887 = vperm.xlu1 %5735, %v6702_v43  }
 0x30c   :  { %v6712_v53 = vpop.permute.xlu0 %1866  ;;  %v6714_v32 = vpop.permute.xlu1 %1779 }
 0x30d   :  { %5741 = vset.pattern.permute.xlu0 %v8503_v3  ;;  %5736 = vset.pattern.permute.xlu1 %v8514_v2  ;;  %v4606_v2 = vld [vmem:[%s8449_s4 + $0x68] sm:$0xff] }
 0x30e   :  { %1062 = vperm.xlu0 %5741, %v6702_v43   ;;  %917 = vperm.xlu1 %5736, %v6702_v43  }
 0x311   :  { %v6720_v20 = vpop.permute.xlu0 %1924  ;;  %v6722_v40 = vpop.permute.xlu1 %1837 }
 0x312   :  { %5743 = vset.pattern.permute.xlu0 %v8505_v4  ;;  %5737 = vset.pattern.permute.xlu1 %v8508_v41 }
 0x313   :  { %1120 = vperm.xlu0 %5743, %v6702_v43   ;;  %946 = vperm.xlu1 %5737, %v6702_v43  }
 0x316   :  { %v6728_v46 = vpop.permute.xlu0 %1982  ;;  %v6730_v3 = vpop.permute.xlu1 %1895 }
 0x317   :  { %5745 = vset.pattern.permute.xlu0 %v8506_v6  ;;  %5738 = vset.pattern.permute.xlu1 %v8507_v34  ;;  %v4598_v6 = vld [vmem:[%s8449_s4 + $0x28] sm:$0xff] }
 0x318   :  { %1178 = vperm.xlu0 %5745, %v6702_v43   ;;  %975 = vperm.xlu1 %5738, %v6702_v43  }
 0x31b   :  { %v883_v1 = vpop.permute.xlu0 %882  ;;  %v6736_v4 = vpop.permute.xlu1 %1953 }
 0x31c   :  { %5747 = vset.pattern.permute.xlu0 %v8510_v8  ;;  %5740 = vset.pattern.permute.xlu1 %v8511_v5  ;;  %v4602_v5 = vld [vmem:[%s8449_s4 + $0x48] sm:$0xff]  ;;  %v896_v44 = vmul.f32 %v883_v1, %v872_v0 }
 0x31d   :  { %1236 = vperm.xlu0 %5747, %v6702_v43   ;;  %1033 = vperm.xlu1 %5740, %v6702_v43   ;;  %v4610_v0 = vld [vmem:[%s8449_s4 + $0x88] sm:$0xff] }
 0x31e   :  { %v4614_v1 = vld [vmem:[%s8449_s4 + $0xa8] sm:$0xff] }
 0x320   :  { %v914_v34 = vpop.permute.xlu0 %913  ;;  %v6745_v41 = vpop.permute.xlu1 %2011 }
 0x321   :  { %8546 = vst [vmem:[#allocation3_spill] sm:$0xff] %v6745_v41  ;;  %5749 = vset.pattern.permute.xlu0 %v8521_v10  ;;  %5742 = vset.pattern.permute.xlu1 %v8527_v7  ;;  %v925_v8 = vmul.f32 %v4598_v6, %v914_v34  ;;  %v8552_v7 = vmov 26   ;;  %v8564_v41 = vmov 38  }
 0x322   :  { %1294 = vperm.xlu0 %5749, %v6702_v43   ;;  %1091 = vperm.xlu1 %5742, %v6702_v43  }
 0x323   :  { %v929_v13 = vadd.f32 %v925_v8, %v896_v44 }
 0x325   :  { %v972_v39 = vpop.permute.xlu0 %971  ;;  %v943_v18 = vpop.permute.xlu1 %942 }
 0x326   :  { %v954_v10 = vmul.f32 %v4602_v5, %v943_v18  ;;  %5751 = vset.pattern.permute.xlu0 %v8524_v12  ;;  %5744 = vset.pattern.permute.xlu1 %v8526_v9  ;;  %v983_v34 = vmul.f32 %v4606_v2, %v972_v39  ;;  %v4622_v39 = vld [vmem:[%s8449_s4 + $0xe8] sm:$0xff]  ;;  %v8549_v12 = vmov 15   ;;  %v8551_v9 = vmov 17  }
 0x327   :  { %1352 = vperm.xlu0 %5751, %v6702_v43   ;;  %1149 = vperm.xlu1 %5744, %v6702_v43  }
 0x328   :  { %v958_v6 = vadd.f32 %v954_v10, %v929_v13  ;;  %v4618_v13 = vld [vmem:[%s8449_s4 + $0xc8] sm:$0xff] }
 0x32a   :  { %v1030_v8 = vpop.permute.xlu0 %1029  ;;  %v987_v5 = vadd.f32 %v983_v34, %v958_v6  ;;  %v1001_v18 = vpop.permute.xlu1 %1000 }
 0x32b   :  { %v1012_v44 = vmul.f32 %v4610_v0, %v1001_v18  ;;  %5753 = vset.pattern.permute.xlu0 %v8522_v14  ;;  %5746 = vset.pattern.permute.xlu1 %v8525_v11  ;;  %v1041_v2 = vmul.f32 %v4614_v1, %v1030_v8  ;;  %v8547_v14 = vmov 13   ;;  %v8550_v11 = vmov 24  }
 0x32c   :  { %1410 = vperm.xlu0 %5753, %v6702_v43   ;;  %1207 = vperm.xlu1 %5746, %v6702_v43  }
 0x32d   :  { %v1016_v10 = vadd.f32 %v1012_v44, %v987_v5  ;;  %v4626_v5 = vld [vmem:[%s8449_s4 + $0x108] sm:$0xff] }
 0x32e   :  { %v4630_v44 = vld [vmem:[%s8449_s4 + $0x128] sm:$0xff] }
 0x32f   :  { %v1088_v34 = vpop.permute.xlu0 %1087  ;;  %v1045_v6 = vadd.f32 %v1041_v2, %v1016_v10  ;;  %v1059_v0 = vpop.permute.xlu1 %1058 }
 0x330   :  { %v1070_v18 = vmul.f32 %v4618_v13, %v1059_v0  ;;  %5755 = vset.pattern.permute.xlu0 %v8523_v16  ;;  %5748 = vset.pattern.permute.xlu1 %v8547_v14  ;;  %v1099_v1 = vmul.f32 %v4622_v39, %v1088_v34  ;;  %v8548_v16 = vmov 22  }
 0x331   :  { %1468 = vperm.xlu0 %5755, %v6702_v43   ;;  %1265 = vperm.xlu1 %5748, %v6702_v43  }
 0x332   :  { %v1074_v8 = vadd.f32 %v1070_v18, %v1045_v6  ;;  %v4634_v6 = vld [vmem:[%s8449_s4 + $0x148] sm:$0xff] }
 0x333   :  { %v4638_v18 = vld [vmem:[%s8449_s4 + $0x168] sm:$0xff] }
 0x334   :  { %v1146_v2 = vpop.permute.xlu0 %1145  ;;  %v1103_v10 = vadd.f32 %v1099_v1, %v1074_v8  ;;  %v1117_v13 = vpop.permute.xlu1 %1116 }
 0x335   :  { %v1128_v0 = vmul.f32 %v4626_v5, %v1117_v13  ;;  %5757 = vset.pattern.permute.xlu0 %v8548_v16  ;;  %5750 = vset.pattern.permute.xlu1 %v8549_v12  ;;  %v1157_v39 = vmul.f32 %v4630_v44, %v1146_v2  ;;  %v8555_v16 = vmov 21  }
 0x336   :  { %1526 = vperm.xlu0 %5757, %v6702_v43   ;;  %1323 = vperm.xlu1 %5750, %v6702_v43  }
 0x337   :  { %v1132_v34 = vadd.f32 %v1128_v0, %v1103_v10  ;;  %v4642_v10 = vld [vmem:[%s8449_s4 + $0x188] sm:$0xff] }
 0x338   :  { %v4646_v0 = vld [vmem:[%s8449_s4 + $0x1a8] sm:$0xff] }
 0x339   :  { %v1204_v1 = vpop.permute.xlu0 %1203  ;;  %v1161_v8 = vadd.f32 %v1157_v39, %v1132_v34  ;;  %v1175_v5 = vpop.permute.xlu1 %1174 }
 0x33a   :  { %v1186_v13 = vmul.f32 %v4634_v6, %v1175_v5  ;;  %5759 = vset.pattern.permute.xlu0 %v8550_v11  ;;  %5752 = vset.pattern.permute.xlu1 %v8551_v9  ;;  %v1215_v44 = vmul.f32 %v4638_v18, %v1204_v1  ;;  %v8553_v11 = vmov 19  }
 0x33b   :  { %1584 = vperm.xlu0 %5759, %v6702_v43   ;;  %1381 = vperm.xlu1 %5752, %v6702_v43  }
 0x33c   :  { %v1190_v2 = vadd.f32 %v1186_v13, %v1161_v8  ;;  %v4650_v8 = vld [vmem:[%s8449_s4 + $0x1c8] sm:$0xff] }
 0x33d   :  { %v4654_v13 = vld [vmem:[%s8449_s4 + $0x1e8] sm:$0xff] }
 0x33e   :  { %v1262_v39 = vpop.permute.xlu0 %1261  ;;  %v1219_v34 = vadd.f32 %v1215_v44, %v1190_v2  ;;  %v1233_v6 = vpop.permute.xlu1 %1232 }
 0x33f   :  { %v1244_v5 = vmul.f32 %v4642_v10, %v1233_v6  ;;  %5761 = vset.pattern.permute.xlu0 %v8552_v7  ;;  %5754 = vset.pattern.permute.xlu1 %v8553_v11  ;;  %v1273_v18 = vmul.f32 %v4646_v0, %v1262_v39  ;;  %v8554_v7 = vmov 28  }
 0x340   :  { %1642 = vperm.xlu0 %5761, %v6702_v43   ;;  %1439 = vperm.xlu1 %5754, %v6702_v43  }
 0x341   :  { %v1248_v1 = vadd.f32 %v1244_v5, %v1219_v34  ;;  %v4658_v34 = vld [vmem:[%s8449_s4 + $0x208] sm:$0xff] }
 0x342   :  { %v4662_v5 = vld [vmem:[%s8449_s4 + $0x228] sm:$0xff] }
 0x343   :  { %v1320_v44 = vpop.permute.xlu0 %1319  ;;  %v1277_v2 = vadd.f32 %v1273_v18, %v1248_v1  ;;  %v1291_v10 = vpop.permute.xlu1 %1290 }
 0x344   :  { %v1302_v6 = vmul.f32 %v4650_v8, %v1291_v10  ;;  %5763 = vset.pattern.permute.xlu0 %v8554_v7  ;;  %5756 = vset.pattern.permute.xlu1 %v8555_v16  ;;  %v1331_v0 = vmul.f32 %v4654_v13, %v1320_v44  ;;  %v8556_v7 = vmov 30   ;;  %v8557_v16 = vmov 23  }
 0x345   :  { %1700 = vperm.xlu0 %5763, %v6702_v43   ;;  %1497 = vperm.xlu1 %5756, %v6702_v43  }
 0x346   :  { %v1306_v39 = vadd.f32 %v1302_v6, %v1277_v2  ;;  %v4666_v2 = vld [vmem:[%s8449_s4 + $0x248] sm:$0xff] }
 0x347   :  { %v4670_v6 = vld [vmem:[%s8449_s4 + $0x268] sm:$0xff] }
 0x348   :  { %v1378_v18 = vpop.permute.xlu0 %1377  ;;  %v1335_v1 = vadd.f32 %v1331_v0, %v1306_v39  ;;  %v1349_v8 = vpop.permute.xlu1 %1348 }
 0x349   :  { %v1360_v10 = vmul.f32 %v4658_v34, %v1349_v8  ;;  %5765 = vset.pattern.permute.xlu0 %v8556_v7  ;;  %5758 = vset.pattern.permute.xlu1 %v8557_v16  ;;  %v1389_v13 = vmul.f32 %v4662_v5, %v1378_v18  ;;  %v8558_v7 = vmov 32   ;;  %v8559_v16 = vmov 25  }
 0x34a   :  { %1758 = vperm.xlu0 %5765, %v6702_v43   ;;  %1555 = vperm.xlu1 %5758, %v6702_v43  }
 0x34b   :  { %v1364_v44 = vadd.f32 %v1360_v10, %v1335_v1  ;;  %v4674_v1 = vld [vmem:[%s8449_s4 + $0x288] sm:$0xff] }
 0x34c   :  { %v4678_v10 = vld [vmem:[%s8449_s4 + $0x2a8] sm:$0xff] }
 0x34d   :  { %v1436_v0 = vpop.permute.xlu0 %1435  ;;  %v1393_v39 = vadd.f32 %v1389_v13, %v1364_v44  ;;  %v1407_v34 = vpop.permute.xlu1 %1406 }
 0x34e   :  { %v1418_v8 = vmul.f32 %v4666_v2, %v1407_v34  ;;  %5767 = vset.pattern.permute.xlu0 %v8558_v7  ;;  %5760 = vset.pattern.permute.xlu1 %v8559_v16  ;;  %v1447_v5 = vmul.f32 %v4670_v6, %v1436_v0  ;;  %v8560_v7 = vmov 34   ;;  %v8561_v16 = vmov 27  }
 0x34f   :  { %1816 = vperm.xlu0 %5767, %v6702_v43   ;;  %1613 = vperm.xlu1 %5760, %v6702_v43  }
 0x350   :  { %v1422_v18 = vadd.f32 %v1418_v8, %v1393_v39  ;;  %v4682_v39 = vld [vmem:[%s8449_s4 + $0x2c8] sm:$0xff] }
 0x351   :  { %v4686_v8 = vld [vmem:[%s8449_s4 + $0x2e8] sm:$0xff] }
 0x352   :  { %v1494_v13 = vpop.permute.xlu0 %1493  ;;  %v1451_v44 = vadd.f32 %v1447_v5, %v1422_v18  ;;  %v1465_v2 = vpop.permute.xlu1 %1464 }
 0x353   :  { %v1476_v34 = vmul.f32 %v4674_v1, %v1465_v2  ;;  %5769 = vset.pattern.permute.xlu0 %v8560_v7  ;;  %5762 = vset.pattern.permute.xlu1 %v8561_v16  ;;  %v1505_v6 = vmul.f32 %v4678_v10, %v1494_v13  ;;  %v8562_v7 = vmov 36   ;;  %v8563_v16 = vmov 29  }
 0x354   :  { %1874 = vperm.xlu0 %5769, %v6702_v43   ;;  %1671 = vperm.xlu1 %5762, %v6702_v43  }
 0x355   :  { %v1480_v0 = vadd.f32 %v1476_v34, %v1451_v44  ;;  %v4690_v44 = vld [vmem:[%s8449_s4 + $0x308] sm:$0xff]  ;;  %v842_v34 = vmul.f32 %v6561_v45, %v6428_v59 }
 0x356   :  { %v4698_v45 = vld [vmem:[%s8449_s4 + $0x348] sm:$0xff] }
 0x357   :  { %v1552_v5 = vpop.permute.xlu0 %1551  ;;  %v1509_v18 = vadd.f32 %v1505_v6, %v1480_v0  ;;  %v1523_v1 = vpop.permute.xlu1 %1522  ;;  %v4694_v6 = vld [vmem:[%s8449_s4 + $0x328] sm:$0xff] }
 0x358   :  { %v1534_v2 = vmul.f32 %v4682_v39, %v1523_v1  ;;  %5771 = vset.pattern.permute.xlu0 %v8562_v7  ;;  %5764 = vset.pattern.permute.xlu1 %v8563_v16  ;;  %v1563_v10 = vmul.f32 %v4686_v8, %v1552_v5  ;;  %v866_v7 = vadd.f32 %v6573_v47, %v842_v34  ;;  %v8565_v8 = vmov 31   ;;  %v4702_v47 = vld [vmem:[%s8449_s4 + $0x368] sm:$0xff] }
 0x359   :  { %1932 = vperm.xlu0 %5771, %v6702_v43   ;;  %1729 = vperm.xlu1 %5764, %v6702_v43   ;;  %v8566_v34 = vmov 1  }
 0x35a   :  { %v1538_v13 = vadd.f32 %v1534_v2, %v1509_v18  ;;  %v6880_v18 = vmax.f32 %v866_v7, 0.0  ;;  %v4706_v7 = vld [vmem:[%s8449_s4 + $0x388] sm:$0xff] }
 0x35c   :  { %v1610_v0 = vpop.permute.xlu0 %1609  ;;  %v1567_v39 = vadd.f32 %v1563_v10, %v1538_v13  ;;  %v1581_v1 = vpop.permute.xlu1 %1580 }
 0x35d   :  { %v1592_v16 = vmul.f32 %v4690_v44, %v1581_v1  ;;  %5773 = vset.pattern.permute.xlu0 %v8564_v41  ;;  %5766 = vset.pattern.permute.xlu1 %v8565_v8  ;;  %v1621_v5 = vmul.f32 %v4694_v6, %v1610_v0  ;;  %v8567_v1 = vmov 33   ;;  %v4710_v0 = vld [vmem:[%s8449_s4 + $0x3a8] sm:$0xff] }
 0x35e   :  { %1990 = vperm.xlu0 %5773, %v6702_v43   ;;  %1787 = vperm.xlu1 %5766, %v6702_v43  }
 0x35f   :  { %v1596_v59 = vadd.f32 %v1592_v16, %v1567_v39 }
 0x361   :  { %v1668_v2 = vpop.permute.xlu0 %1667  ;;  %v1625_v10 = vadd.f32 %v1621_v5, %v1596_v59  ;;  %v1639_v13 = vpop.permute.xlu1 %1638 }
 0x362   :  { %v1650_v44 = vmul.f32 %v4698_v45, %v1639_v13  ;;  %5776 = vset.pattern.permute.xlu0 %v8566_v34  ;;  %5768 = vset.pattern.permute.xlu1 %v8567_v1  ;;  %v1679_v16 = vmul.f32 %v4702_v47, %v1668_v2  ;;  %v8528_v13 = vmov 40   ;;  %v8568_v34 = vmov 35  }
 0x363   :  { %921 = vperm.xlu0 %5776, %v6880_v18   ;;  %1845 = vperm.xlu1 %5768, %v6702_v43   ;;  %v8538_v1 = vmov 44  }
 0x364   :  { %v1654_v6 = vadd.f32 %v1650_v44, %v1625_v10  ;;  %v4714_v10 = vld [vmem:[%s8449_s4 + $0x3c8] sm:$0xff] }
 0x365   :  { %v4718_v44 = vld [vmem:[%s8449_s4 + $0x3e8] sm:$0xff] }
 0x366   :  { %v1726_v39 = vpop.permute.xlu0 %1725  ;;  %v1683_v5 = vadd.f32 %v1679_v16, %v1654_v6  ;;  %v1697_v59 = vpop.permute.xlu1 %1696 }
 0x367   :  { %v1708_v45 = vmul.f32 %v4706_v7, %v1697_v59  ;;  %5777 = vset.pattern.permute.xlu0 %v8528_v13  ;;  %5770 = vset.pattern.permute.xlu1 %v8568_v34  ;;  %v1737_v47 = vmul.f32 %v4710_v0, %v1726_v39  ;;  %v8569_v13 = vmov 37   ;;  %v4746_v34 = vld [vmem:[%s8449_s4 + $0x4c8] sm:$0xff] }
 0x368   :  { %2040 = vperm.xlu0 %5777, %v6467_v63   ;;  %1903 = vperm.xlu1 %5770, %v6702_v43  }
 0x369   :  { %v1712_v2 = vadd.f32 %v1708_v45, %v1683_v5  ;;  %v4722_v5 = vld [vmem:[%s8449_s4 + $0x408] sm:$0xff]  ;;  %v8530_v45 = vmov 41  }
 0x36b   :  { %v1784_v16 = vpop.permute.xlu0 %1783  ;;  %v1741_v6 = vadd.f32 %v1737_v47, %v1712_v2  ;;  %v1755_v7 = vpop.permute.xlu1 %1754  ;;  %v4726_v47 = vld [vmem:[%s8449_s4 + $0x428] sm:$0xff] }
 0x36c   :  { %v1766_v59 = vmul.f32 %v4714_v10, %v1755_v7  ;;  %2048 = vperm.xlu0 %5777, %v6702_v43   ;;  %5772 = vset.pattern.permute.xlu1 %v8569_v13  ;;  %v1795_v0 = vmul.f32 %v4718_v44, %v1784_v16  ;;  %v8570_v13 = vmov 39  }
 0x36d   :  { %1961 = vperm.xlu1 %5772, %v6702_v43  }
 0x36e   :  { %v1770_v39 = vadd.f32 %v1766_v59, %v1741_v6  ;;  %v4730_v6 = vld [vmem:[%s8449_s4 + $0x448] sm:$0xff]  ;;  %v8532_v59 = vmov 42  }
 0x370   :  { %5780 = vset.pattern.permute.xlu0 %v8530_v45  ;;  %v1842_v2 = vpop.permute.xlu0 %1841  ;;  %v1799_v10 = vadd.f32 %v1795_v0, %v1770_v39  ;;  %v1813_v7 = vpop.permute.xlu1 %1812  ;;  %v4734_v0 = vld [vmem:[%s8449_s4 + $0x468] sm:$0xff] }
 0x371   :  { %v1824_v41 = vmul.f32 %v4722_v5, %v1813_v7  ;;  %2073 = vperm.xlu0 %5780, %v6547_v42   ;;  %5774 = vset.pattern.permute.xlu1 %v8570_v13  ;;  %v1853_v44 = vmul.f32 %v4726_v47, %v1842_v2  ;;  %v8571_v13 = vmov 0   ;;  %v4738_v2 = vld [vmem:[%s8449_s4 + $0x488] sm:$0xff] }
 0x372   :  { %2019 = vperm.xlu1 %5774, %v6702_v43  }
 0x373   :  { %v1828_v16 = vadd.f32 %v1824_v41, %v1799_v10  ;;  %v4597_v10 = vld [vmem:[%s8449_s4 + $0x20] sm:$0xff] }
 0x375   :  { %5781 = vset.pattern.permute.xlu0 %v8532_v59  ;;  %v1900_v39 = vpop.permute.xlu0 %1899  ;;  %v1857_v5 = vadd.f32 %v1853_v44, %v1828_v16  ;;  %v1871_v7 = vpop.permute.xlu1 %1870  ;;  %v4742_v44 = vld [vmem:[%s8449_s4 + $0x4a8] sm:$0xff] }
 0x376   :  { %v1882_v45 = vmul.f32 %v4730_v6, %v1871_v7  ;;  %2098 = vperm.xlu0 %5781, %v6467_v63   ;;  %5775 = vset.pattern.permute.xlu1 %v8571_v13  ;;  %v1911_v41 = vmul.f32 %v4734_v0, %v1900_v39  ;;  %v8572_v39 = vmov 40  }
 0x377   :  { %892 = vperm.xlu1 %5775, %v6880_v18  }
 0x378   :  { %v1886_v47 = vadd.f32 %v1882_v45, %v1857_v5  ;;  %v871_v45 = vld [vmem:[%s8449_s4] sm:$0xff]  ;;  %v924_v5 = vmul.f32 %v4597_v10, %v6589_v51  ;;  %v4750_v51 = vld [vmem:[%s8449_s4 + $0x4e8] sm:$0xff] }
 0x37a   :  { %2106 = vperm.xlu0 %5781, %v6702_v43   ;;  %v1958_v16 = vpop.permute.xlu0 %1957  ;;  %v1915_v13 = vadd.f32 %v1911_v41, %v1886_v47  ;;  %v1929_v6 = vpop.permute.xlu1 %1928  ;;  %v895_v41 = vmul.f32 %v6581_v49, %v871_v45  ;;  %v8534_v47 = vmov 43   ;;  %v4605_v49 = vld [vmem:[%s8449_s4 + $0x60] sm:$0xff] }
 0x37b   :  { %v1940_v0 = vmul.f32 %v4738_v2, %v1929_v6  ;;  %5778 = vset.pattern.permute.xlu1 %v8572_v39  ;;  %v1969_v7 = vmul.f32 %v4742_v44, %v1958_v16  ;;  %v4601_v2 = vld [vmem:[%s8449_s4 + $0x40] sm:$0xff] }
 0x37c   :  { %2044 = vperm.xlu1 %5778, %v6547_v42   ;;  %v953_v45 = vmul.f32 %v4601_v2, %v6579_v48  ;;  %v4609_v48 = vld [vmem:[%s8449_s4 + $0x80] sm:$0xff] }
 0x37d   :  { %v1944_v59 = vadd.f32 %v1940_v0, %v1915_v13  ;;  %v928_v13 = vadd.f32 %v924_v5, %v895_v41  ;;  %v8573_v0 = vmov 41   ;;  %v4613_v2 = vld [vmem:[%s8449_s4 + $0xa0] sm:$0xff] }
 0x37e   :  { %5784 = vset.pattern.permute.xlu0 %v8534_v47 }
 0x37f   :  { %2131 = vperm.xlu0 %5784, %v6547_v42   ;;  %v2016_v10 = vpop.permute.xlu0 %2015  ;;  %v1973_v44 = vadd.f32 %v1969_v7, %v1944_v59  ;;  %v1987_v16 = vpop.permute.xlu1 %1986  ;;  %v957_v8 = vadd.f32 %v953_v45, %v928_v13  ;;  %v982_v59 = vmul.f32 %v4605_v49, %v6597_v54  ;;  %v873_v13 = vld [vmem:[%s8449_s4 + $0x10] sm:$0xff]  ;;  %v8575_v45 = vmov 43  }
 0x380   :  { %v1998_v6 = vmul.f32 %v4746_v34, %v1987_v16  ;;  %5779 = vset.pattern.permute.xlu1 %v8573_v0  ;;  %v2027_v47 = vmul.f32 %v4750_v51, %v2016_v10  ;;  %v8574_v51 = vmov 42   ;;  %v8536_v16 = vmov 45  }
 0x381   :  { %2069 = vperm.xlu1 %5779, %v6467_v63   ;;  %v986_v41 = vadd.f32 %v982_v59, %v957_v8  ;;  %v1040_v8 = vmul.f32 %v4613_v2, %v6605_v56  ;;  %v4617_v56 = vld [vmem:[%s8449_s4 + $0xc0] sm:$0xff] }
 0x382   :  { %v2002_v39 = vadd.f32 %v1998_v6, %v1973_v44 }
 0x383   :  { %5785 = vset.pattern.permute.xlu0 %v8538_v1 }
 0x384   :  { %2156 = vperm.xlu0 %5785, %v6467_v63   ;;  %v1005_v34 = vpop.permute.xlu0 %1004  ;;  %v888_v5 = vpop.permute.xlu1 %887  ;;  %v6965_v7 = vadd.f32 %v2027_v47, %v2002_v39  ;;  %v1011_v39 = vmul.f32 %v4609_v48, %v6587_v50  ;;  %v4599_v47 = vld [vmem:[%s8449_s4 + $0x30] sm:$0xff] }
 0x385   :  { %2077 = vperm.xlu1 %5779, %v6702_v43   ;;  %v4603_v50 = vld [vmem:[%s8449_s4 + $0x50] sm:$0xff] }
 0x386   :  { %v1015_v44 = vadd.f32 %v1011_v39, %v986_v41  ;;  %v897_v41 = vmul.f32 %v888_v5, %v873_v13  ;;  %v4621_v39 = vld [vmem:[%s8449_s4 + $0xe0] sm:$0xff]  ;;  %v4611_v5 = vld [vmem:[%s8449_s4 + $0x90] sm:$0xff] }
 0x388   :  { %2164 = vperm.xlu0 %5785, %v6702_v43   ;;  %v1044_v48 = vadd.f32 %v1040_v8, %v1015_v44 }
 0x389   :  { %v1063_v54 = vpop.permute.xlu0 %1062  ;;  %5782 = vset.pattern.permute.xlu1 %v8574_v51  ;;  %v918_v10 = vpop.permute.xlu1 %917 }
 0x38a   :  { %2102 = vperm.xlu1 %5782, %v6547_v42   ;;  %v926_v6 = vmul.f32 %v4599_v47, %v918_v10  ;;  %v4607_v10 = vld [vmem:[%s8449_s4 + $0x70] sm:$0xff]  ;;  %v1069_v47 = vmul.f32 %v4617_v56, %v6595_v52  ;;  %v8576_v56 = vmov 44  }
 0x38b   :  { %v4615_v52 = vld [vmem:[%s8449_s4 + $0xb0] sm:$0xff] }
 0x38c   :  { %5788 = vset.pattern.permute.xlu0 %v8536_v16  ;;  %v8540_v16 = vmov 46   ;;  %v930_v1 = vadd.f32 %v926_v6, %v897_v41  ;;  %v1073_v13 = vadd.f32 %v1069_v47, %v1044_v48  ;;  %v4625_v6 = vld [vmem:[%s8449_s4 + $0x100] sm:$0xff] }
 0x38d   :  { %2189 = vperm.xlu0 %5788, %v6547_v42   ;;  %v4629_v48 = vld [vmem:[%s8449_s4 + $0x120] sm:$0xff] }
 0x38e   :  { %v1121_v49 = vpop.permute.xlu0 %1120  ;;  %5783 = vset.pattern.permute.xlu1 %v8575_v45  ;;  %v947_v59 = vpop.permute.xlu1 %946  ;;  %v1013_v45 = vmul.f32 %v4611_v5, %v1005_v34 }
 0x38f   :  { %2127 = vperm.xlu1 %5783, %v6467_v63   ;;  %v955_v2 = vmul.f32 %v4603_v50, %v947_v59  ;;  %v1098_v50 = vmul.f32 %v4621_v39, %v6613_v58  ;;  %v4619_v58 = vld [vmem:[%s8449_s4 + $0xd0] sm:$0xff]  ;;  %v1127_v39 = vmul.f32 %v4625_v6, %v6603_v55  ;;  %v4633_v6 = vld [vmem:[%s8449_s4 + $0x140] sm:$0xff] }
 0x390   :  { %v1071_v47 = vmul.f32 %v4619_v58, %v1063_v54  ;;  %v4627_v55 = vld [vmem:[%s8449_s4 + $0x110] sm:$0xff]  ;;  %v6123_v58 = vmov 48  }
 0x391   :  { %5789 = vset.pattern.permute.xlu0 %v8540_v16  ;;  %v959_v59 = vadd.f32 %v955_v2, %v930_v1  ;;  %v1102_v41 = vadd.f32 %v1098_v50, %v1073_v13  ;;  %v8577_v13 = vmov 45  }
 0x392   :  { %2214 = vperm.xlu0 %5789, %v6467_v63  }
 0x393   :  { %v1179_v44 = vpop.permute.xlu0 %1178  ;;  %2135 = vperm.xlu1 %5783, %v6702_v43   ;;  %v976_v8 = vpop.permute.xlu1 %975 }
 0x394   :  { %v984_v16 = vmul.f32 %v4607_v10, %v976_v8  ;;  %v6122_v10 = vmov 47   ;;  %v4623_v8 = vld [vmem:[%s8449_s4 + $0xf0] sm:$0xff] }
 0x396   :  { %v988_v51 = vadd.f32 %v984_v16, %v959_v59  ;;  %2222 = vperm.xlu0 %5789, %v6702_v43  }
 0x397   :  { %5786 = vset.pattern.permute.xlu1 %v8576_v56 }
 0x398   :  { %v1237_v1 = vpop.permute.xlu0 %1236  ;;  %2160 = vperm.xlu1 %5786, %v6547_v42   ;;  %v1017_v34 = vadd.f32 %v1013_v45, %v988_v51  ;;  %v1034_v16 = vpop.permute.xlu1 %1033  ;;  %v1131_v51 = vadd.f32 %v1127_v39, %v1102_v41  ;;  %v1156_v45 = vmul.f32 %v4629_v48, %v6621_v61  ;;  %v1129_v41 = vmul.f32 %v4627_v55, %v1121_v49  ;;  %v4637_v48 = vld [vmem:[%s8449_s4 + $0x160] sm:$0xff]  ;;  %v4635_v39 = vld [vmem:[%s8449_s4 + $0x150] sm:$0xff] }
 0x399   :  { %v1042_v2 = vmul.f32 %v4615_v52, %v1034_v16  ;;  %v4631_v16 = vld [vmem:[%s8449_s4 + $0x130] sm:$0xff]  ;;  %v1187_v55 = vmul.f32 %v4635_v39, %v1179_v44 }
 0x39a   :  { %5792 = vset.pattern.permute.xlu0 %v6122_v10  ;;  %v1160_v61 = vadd.f32 %v1156_v45, %v1131_v51  ;;  %v1214_v45 = vmul.f32 %v4637_v48, %v6629_v36  ;;  %v4643_v36 = vld [vmem:[%s8449_s4 + $0x190] sm:$0xff] }
 0x39b   :  { %v1046_v5 = vadd.f32 %v1042_v2, %v1017_v34  ;;  %2247 = vperm.xlu0 %5792, %v6547_v42   ;;  %v1185_v2 = vmul.f32 %v4633_v6, %v6611_v57  ;;  %v4639_v57 = vld [vmem:[%s8449_s4 + $0x170] sm:$0xff] }
 0x39c   :  { %5787 = vset.pattern.permute.xlu1 %v8577_v13 }
 0x39d   :  { %v1295_v50 = vpop.permute.xlu0 %1294  ;;  %2185 = vperm.xlu1 %5787, %v6467_v63   ;;  %v1075_v54 = vadd.f32 %v1071_v47, %v1046_v5  ;;  %v1092_v59 = vpop.permute.xlu1 %1091  ;;  %v1189_v51 = vadd.f32 %v1185_v2, %v1160_v61  ;;  %v1245_v2 = vmul.f32 %v4643_v36, %v1237_v1  ;;  %v4653_v36 = vld [vmem:[%s8449_s4 + $0x1e0] sm:$0xff] }
 0x39e   :  { %v1100_v52 = vmul.f32 %v4623_v8, %v1092_v59  ;;  %v8578_v59 = vmov 46  }
 0x39f   :  { %5793 = vset.pattern.permute.xlu0 %v6123_v58 }
 0x3a0   :  { %v1104_v34 = vadd.f32 %v1100_v52, %v1075_v54  ;;  %2272 = vperm.xlu0 %5793, %v6467_v63   ;;  %v4641_v52 = vld [vmem:[%s8449_s4 + $0x180] sm:$0xff] }
 0x3a1   :  { %2193 = vperm.xlu1 %5787, %v6702_v43   ;;  %v1243_v48 = vmul.f32 %v4641_v52, %v6619_v60 }
 0x3a2   :  { %v1353_v49 = vpop.permute.xlu0 %1352  ;;  %v1133_v47 = vadd.f32 %v1129_v41, %v1104_v34  ;;  %v1150_v5 = vpop.permute.xlu1 %1149  ;;  %v1218_v41 = vadd.f32 %v1214_v45, %v1189_v51  ;;  %v4651_v51 = vld [vmem:[%s8449_s4 + $0x1d0] sm:$0xff] }
 0x3a3   :  { %v1158_v8 = vmul.f32 %v4631_v16, %v1150_v5  ;;  %v4645_v16 = vld [vmem:[%s8449_s4 + $0x1a0] sm:$0xff] }
 0x3a4   :  { %2280 = vperm.xlu0 %5793, %v6702_v43   ;;  %v1247_v5 = vadd.f32 %v1243_v48, %v1218_v41  ;;  %v1330_v48 = vmul.f32 %v4653_v36, %v6645_v23 }
 0x3a5   :  { %v1162_v54 = vadd.f32 %v1158_v8, %v1133_v47  ;;  %5790 = vset.pattern.permute.xlu1 %v8578_v59  ;;  %v4647_v47 = vld [vmem:[%s8449_s4 + $0x1b0] sm:$0xff]  ;;  %v1272_v8 = vmul.f32 %v4645_v16, %v6637_v38 }
 0x3a6   :  { %2218 = vperm.xlu1 %5790, %v6547_v42  }
 0x3a7   :  { %v1411_v6 = vpop.permute.xlu0 %1410  ;;  %v1191_v61 = vadd.f32 %v1187_v55, %v1162_v54  ;;  %v1208_v44 = vpop.permute.xlu1 %1207  ;;  %v4649_v54 = vld [vmem:[%s8449_s4 + $0x1c0] sm:$0xff]  ;;  %v1276_v38 = vadd.f32 %v1272_v8, %v1247_v5  ;;  %v4667_v5 = vld [vmem:[%s8449_s4 + $0x250] sm:$0xff] }
 0x3a8   :  { %v1216_v34 = vmul.f32 %v4639_v57, %v1208_v44  ;;  %v1303_v57 = vmul.f32 %v4651_v51, %v1295_v50  ;;  %v1301_v50 = vmul.f32 %v4649_v54, %v6627_v62 }
 0x3aa   :  { %v1220_v39 = vadd.f32 %v1216_v34, %v1191_v61  ;;  %5791 = vset.pattern.permute.xlu1 %v6122_v10  ;;  %v4659_v61 = vld [vmem:[%s8449_s4 + $0x210] sm:$0xff] }
 0x3ab   :  { %2243 = vperm.xlu1 %5791, %v6467_v63   ;;  %v4655_v63 = vld [vmem:[%s8449_s4 + $0x1f0] sm:$0xff] }
 0x3ac   :  { %v1469_v45 = vpop.permute.xlu0 %1468  ;;  %v1249_v55 = vadd.f32 %v1245_v2, %v1220_v39  ;;  %v1266_v60 = vpop.permute.xlu1 %1265  ;;  %v1361_v2 = vmul.f32 %v4659_v61, %v1353_v49 }
 0x3ad   :  { %v1274_v1 = vmul.f32 %v4647_v47, %v1266_v60  ;;  %v4663_v47 = vld [vmem:[%s8449_s4 + $0x230] sm:$0xff]  ;;  %v8579_v60 = vmov 2  }
 0x3af   :  { %v1278_v52 = vadd.f32 %v1274_v1, %v1249_v55  ;;  %2251 = vperm.xlu1 %5791, %v6702_v43   ;;  %v1305_v43 = vadd.f32 %v1301_v50, %v1276_v38  ;;  %v4657_v55 = vld [vmem:[%s8449_s4 + $0x200] sm:$0xff]  ;;  %v1419_v1 = vmul.f32 %v4667_v5, %v1411_v6  ;;  %v8580_v50 = vmov 3  }
 0x3b1   :  { %v1527_v44 = vpop.permute.xlu0 %1526  ;;  %v1307_v41 = vadd.f32 %v1303_v57, %v1278_v52  ;;  %v1324_v34 = vpop.permute.xlu1 %1323  ;;  %v1334_v49 = vadd.f32 %v1330_v48, %v1305_v43  ;;  %v4671_v57 = vld [vmem:[%s8449_s4 + $0x270] sm:$0xff]  ;;  %v1359_v52 = vmul.f32 %v4657_v55, %v6635_v37  ;;  %v4665_v48 = vld [vmem:[%s8449_s4 + $0x240] sm:$0xff]  ;;  %v8581_v55 = vmov 4  }
 0x3b2   :  { %v1332_v16 = vmul.f32 %v4655_v63, %v1324_v34  ;;  %v4675_v63 = vld [vmem:[%s8449_s4 + $0x290] sm:$0xff] }
 0x3b3   :  { %5794 = vset.pattern.permute.xlu1 %v6123_v58  ;;  %v4679_v37 = vld [vmem:[%s8449_s4 + $0x2b0] sm:$0xff] }
 0x3b4   :  { %v1336_v39 = vadd.f32 %v1332_v16, %v1307_v41  ;;  %2276 = vperm.xlu1 %5794, %v6547_v42   ;;  %v4661_v42 = vld [vmem:[%s8449_s4 + $0x220] sm:$0xff]  ;;  %v1363_v41 = vadd.f32 %v1359_v52, %v1334_v49  ;;  %v1477_v16 = vmul.f32 %v4675_v63, %v1469_v45 }
 0x3b5   :  { %v1388_v34 = vmul.f32 %v4661_v42, %v6653_v25  ;;  %v4683_v25 = vld [vmem:[%s8449_s4 + $0x2d0] sm:$0xff]  ;;  %v4669_v45 = vld [vmem:[%s8449_s4 + $0x260] sm:$0xff] }
 0x3b6   :  { %v1585_v8 = vpop.permute.xlu0 %1584  ;;  %v1365_v62 = vadd.f32 %v1361_v2, %v1336_v39  ;;  %v1382_v51 = vpop.permute.xlu1 %1381 }
 0x3b7   :  { %v1390_v23 = vmul.f32 %v4663_v47, %v1382_v51  ;;  %v1392_v2 = vadd.f32 %v1388_v34, %v1363_v41  ;;  %v1417_v51 = vmul.f32 %v4665_v48, %v6643_v21 }
 0x3b8   :  { %5795 = vset.pattern.permute.xlu1 %v8579_v60  ;;  %v4687_v60 = vld [vmem:[%s8449_s4 + $0x2f0] sm:$0xff] }
 0x3b9   :  { %v1394_v54 = vadd.f32 %v1390_v23, %v1365_v62  ;;  %950 = vperm.xlu1 %5795, %v6880_v18   ;;  %v1535_v23 = vmul.f32 %v4683_v25, %v1527_v44  ;;  %v1421_v42 = vadd.f32 %v1417_v51, %v1392_v2  ;;  %v4673_v44 = vld [vmem:[%s8449_s4 + $0x280] sm:$0xff]  ;;  %v4707_v51 = vld [vmem:[%s8449_s4 + $0x390] sm:$0xff] }
 0x3bb   :  { %v1643_v38 = vpop.permute.xlu0 %1642  ;;  %v1423_v36 = vadd.f32 %v1419_v1, %v1394_v54  ;;  %v1440_v61 = vpop.permute.xlu1 %1439  ;;  %v1446_v1 = vmul.f32 %v4669_v45, %v6661_v27  ;;  %v4691_v54 = vld [vmem:[%s8449_s4 + $0x310] sm:$0xff] }
 0x3bc   :  { %v1448_v6 = vmul.f32 %v4671_v57, %v1440_v61  ;;  %v1593_v41 = vmul.f32 %v4691_v54, %v1585_v8  ;;  %v4695_v27 = vld [vmem:[%s8449_s4 + $0x330] sm:$0xff] }
 0x3bd   :  { %5796 = vset.pattern.permute.xlu1 %v8580_v50  ;;  %v1450_v61 = vadd.f32 %v1446_v1, %v1421_v42  ;;  %v1475_v50 = vmul.f32 %v4673_v44, %v6651_v19  ;;  %v4703_v19 = vld [vmem:[%s8449_s4 + $0x370] sm:$0xff]  ;;  %v8584_v42 = vmov 7  }
 0x3be   :  { %v1452_v43 = vadd.f32 %v1448_v6, %v1423_v36  ;;  %979 = vperm.xlu1 %5796, %v6880_v18   ;;  %v8582_v36 = vmov 5   ;;  %v4677_v6 = vld [vmem:[%s8449_s4 + $0x2a0] sm:$0xff] }
 0x3bf   :  { %v1479_v2 = vadd.f32 %v1475_v50, %v1450_v61  ;;  %v1504_v25 = vmul.f32 %v4677_v6, %v6669_v29 }
 0x3c0   :  { %v1701_v39 = vpop.permute.xlu0 %1700  ;;  %v1481_v47 = vadd.f32 %v1477_v16, %v1452_v43  ;;  %v1498_v5 = vpop.permute.xlu1 %1497  ;;  %v4699_v16 = vld [vmem:[%s8449_s4 + $0x350] sm:$0xff] }
 0x3c1   :  { %v1506_v62 = vmul.f32 %v4679_v37, %v1498_v5  ;;  %v1651_v5 = vmul.f32 %v4699_v16, %v1643_v38  ;;  %v1709_v54 = vmul.f32 %v4707_v51, %v1701_v39  ;;  %v4689_v39 = vld [vmem:[%s8449_s4 + $0x300] sm:$0xff] }
 0x3c2   :  { %5797 = vset.pattern.permute.xlu1 %v8581_v55 }
 0x3c3   :  { %v1510_v49 = vadd.f32 %v1506_v62, %v1481_v47  ;;  %1008 = vperm.xlu1 %5797, %v6880_v18   ;;  %v8583_v47 = vmov 6   ;;  %v4681_v62 = vld [vmem:[%s8449_s4 + $0x2c0] sm:$0xff] }
 0x3c4   :  { %v1533_v1 = vmul.f32 %v4681_v62, %v6659_v17  ;;  %v8585_v17 = vmov 8  }
 0x3c5   :  { %v1759_v57 = vpop.permute.xlu0 %1758  ;;  %v1539_v52 = vadd.f32 %v1535_v23, %v1510_v49  ;;  %v1556_v21 = vpop.permute.xlu1 %1555  ;;  %v1508_v49 = vadd.f32 %v1504_v25, %v1479_v2 }
 0x3c6   :  { %v1564_v63 = vmul.f32 %v4687_v60, %v1556_v21  ;;  %v4685_v60 = vld [vmem:[%s8449_s4 + $0x2e0] sm:$0xff]  ;;  %v4711_v21 = vld [vmem:[%s8449_s4 + $0x3b0] sm:$0xff] }
 0x3c7   :  { %5798 = vset.pattern.permute.xlu1 %v8582_v36  ;;  %v1562_v44 = vmul.f32 %v4685_v60, %v6677_v31  ;;  %v4715_v36 = vld [vmem:[%s8449_s4 + $0x3d0] sm:$0xff] }
 0x3c8   :  { %v1568_v34 = vadd.f32 %v1564_v63, %v1539_v52  ;;  %1037 = vperm.xlu1 %5798, %v6880_v18   ;;  %v1537_v63 = vadd.f32 %v1533_v1, %v1508_v49  ;;  %v1767_v6 = vmul.f32 %v4715_v36, %v1759_v57  ;;  %v4719_v31 = vld [vmem:[%s8449_s4 + $0x3f0] sm:$0xff]  ;;  %v1591_v57 = vmul.f32 %v4689_v39, %v6667_v22  ;;  %v4701_v1 = vld [vmem:[%s8449_s4 + $0x360] sm:$0xff] }
 0x3c9   :  { %v8588_v39 = vmov 11  }
 0x3ca   :  { %v1817_v43 = vpop.permute.xlu0 %1816  ;;  %v1597_v37 = vadd.f32 %v1593_v41, %v1568_v34  ;;  %v1614_v8 = vpop.permute.xlu1 %1613  ;;  %v1566_v16 = vadd.f32 %v1562_v44, %v1537_v63  ;;  %v4739_v44 = vld [vmem:[%s8449_s4 + $0x490] sm:$0xff] }
 0x3cb   :  { %v1622_v48 = vmul.f32 %v4695_v27, %v1614_v8  ;;  %v4723_v8 = vld [vmem:[%s8449_s4 + $0x410] sm:$0xff] }
 0x3cc   :  { %5799 = vset.pattern.permute.xlu1 %v8583_v47  ;;  %v1825_v62 = vmul.f32 %v4723_v8, %v1817_v43 }
 0x3cd   :  { %v1626_v45 = vadd.f32 %v1622_v48, %v1597_v37  ;;  %1066 = vperm.xlu1 %5799, %v6880_v18   ;;  %v4693_v37 = vld [vmem:[%s8449_s4 + $0x320] sm:$0xff] }
 0x3cf   :  { %v1875_v55 = vpop.permute.xlu0 %1874  ;;  %v1655_v29 = vadd.f32 %v1651_v5, %v1626_v45  ;;  %v1672_v23 = vpop.permute.xlu1 %1671  ;;  %v8586_v5 = vmov 9   ;;  %v1595_v45 = vadd.f32 %v1591_v57, %v1566_v16 }
 0x3d0   :  { %v1680_v38 = vmul.f32 %v4703_v19, %v1672_v23  ;;  %v1620_v19 = vmul.f32 %v4693_v37, %v6685_v35  ;;  %v4731_v23 = vld [vmem:[%s8449_s4 + $0x450] sm:$0xff]  ;;  %v4697_v35 = vld [vmem:[%s8449_s4 + $0x340] sm:$0xff] }
 0x3d1   :  { %5800 = vset.pattern.permute.xlu1 %v8584_v42  ;;  %v8587_v42 = vmov 10   ;;  %v1649_v63 = vmul.f32 %v4697_v35, %v6675_v24  ;;  %v4743_v24 = vld [vmem:[%s8449_s4 + $0x4b0] sm:$0xff] }
 0x3d2   :  { %v1684_v52 = vadd.f32 %v1680_v38, %v1655_v29  ;;  %1095 = vperm.xlu1 %5800, %v6880_v18   ;;  %v4727_v29 = vld [vmem:[%s8449_s4 + $0x430] sm:$0xff]  ;;  %v1624_v60 = vadd.f32 %v1620_v19, %v1595_v45 }
 0x3d4   :  { %v1933_v61 = vpop.permute.xlu0 %1932  ;;  %v1713_v41 = vadd.f32 %v1709_v54, %v1684_v52  ;;  %v1730_v34 = vpop.permute.xlu1 %1729  ;;  %v1883_v54 = vmul.f32 %v4731_v23, %v1875_v55  ;;  %v1678_v55 = vmul.f32 %v4701_v1, %v6695_v28  ;;  %v4747_v28 = vld [vmem:[%s8449_s4 + $0x4d0] sm:$0xff] }
 0x3d5   :  { %v1738_v27 = vmul.f32 %v4711_v21, %v1730_v34  ;;  %v4735_v21 = vld [vmem:[%s8449_s4 + $0x470] sm:$0xff] }
 0x3d6   :  { %5801 = vset.pattern.permute.xlu1 %v8585_v17 }
 0x3d7   :  { %v1742_v50 = vadd.f32 %v1738_v27, %v1713_v41  ;;  %1124 = vperm.xlu1 %5801, %v6880_v18   ;;  %v1653_v27 = vadd.f32 %v1649_v63, %v1624_v60 }
 0x3d9   :  { %v1991_v48 = vpop.permute.xlu0 %1990  ;;  %v1771_v2 = vadd.f32 %v1767_v6, %v1742_v50  ;;  %v1788_v25 = vpop.permute.xlu1 %1787  ;;  %v1941_v6 = vmul.f32 %v4739_v44, %v1933_v61  ;;  %v1682_v37 = vadd.f32 %v1678_v55, %v1653_v27 }
 0x3da   :  { %v1796_v47 = vmul.f32 %v4719_v31, %v1788_v25  ;;  %v4705_v31 = vld [vmem:[%s8449_s4 + $0x380] sm:$0xff] }
 0x3db   :  { %5802 = vset.pattern.permute.xlu1 %v8586_v5  ;;  %v1707_v57 = vmul.f32 %v4705_v31, %v6683_v26  ;;  %v1999_v5 = vmul.f32 %v4747_v28, %v1991_v48  ;;  %v4717_v48 = vld [vmem:[%s8449_s4 + $0x3e0] sm:$0xff] }
 0x3dc   :  { %v1800_v51 = vadd.f32 %v1796_v47, %v1771_v2  ;;  %1153 = vperm.xlu1 %5802, %v6880_v18   ;;  %v4709_v2 = vld [vmem:[%s8449_s4 + $0x3a0] sm:$0xff]  ;;  %v8589_v47 = vmov 12   ;;  %v1794_v60 = vmul.f32 %v4717_v48, %v6714_v32  ;;  %v8594_v48 = vld [vmem:[#allocation3_spill] sm:$0xff] }
 0x3dd   :  { %v1711_v19 = vadd.f32 %v1707_v57, %v1682_v37  ;;  %v8592_v37 = vmov 18   ;;  %v4745_v57 = vld [vmem:[%s8449_s4 + $0x4c0] sm:$0xff] }
 0x3de   :  { %v7205_v49 = vpop.permute.xlu0 %921  ;;  %v1829_v22 = vadd.f32 %v1825_v62, %v1800_v51  ;;  %v1846_v38 = vpop.permute.xlu1 %1845  ;;  %v1736_v62 = vmul.f32 %v4709_v2, %v6706_v15  ;;  %v4751_v2 = vld [vmem:[%s8449_s4 + $0x4f0] sm:$0xff] }
 0x3df   :  { %v1854_v43 = vmul.f32 %v4727_v29, %v1846_v38 }
 0x3e0   :  { %5803 = vset.pattern.permute.xlu1 %v8587_v42  ;;  %v1740_v26 = vadd.f32 %v1736_v62, %v1711_v19  ;;  %v8590_v42 = vmov 14   ;;  %v4753_v19 = vld [vmem:[%s8449_s4 + $0x500] sm:$0xff]  ;;  %v4754_v62 = vld [vmem:[%s8449_s4 + $0x508] sm:$0xff] }
 0x3e1   :  { %v1858_v52 = vadd.f32 %v1854_v43, %v1829_v22  ;;  %1182 = vperm.xlu1 %5803, %v6880_v18   ;;  %v4713_v22 = vld [vmem:[%s8449_s4 + $0x3c0] sm:$0xff] }
 0x3e2   :  { %v1765_v15 = vmul.f32 %v4713_v22, %v6693_v30  ;;  %v4725_v30 = vld [vmem:[%s8449_s4 + $0x420] sm:$0xff] }
 0x3e3   :  { %v7222_v36 = vpop.permute.xlu0 %2040  ;;  %v1887_v41 = vadd.f32 %v1883_v54, %v1858_v52  ;;  %v1904_v34 = vpop.permute.xlu1 %1903  ;;  %v1852_v63 = vmul.f32 %v4725_v30, %v6722_v40 }
 0x3e4   :  { %v1912_v17 = vmul.f32 %v4735_v21, %v1904_v34  ;;  %v1769_v43 = vadd.f32 %v1765_v15, %v1740_v26  ;;  %v4729_v34 = vld [vmem:[%s8449_s4 + $0x440] sm:$0xff]  ;;  %v4759_v15 = vld [vmem:[%s8449_s4 + $0x530] sm:$0xff] }
 0x3e5   :  { %5804 = vset.pattern.permute.xlu1 %v8588_v39 }
 0x3e6   :  { %v1916_v50 = vadd.f32 %v1912_v17, %v1887_v41  ;;  %1211 = vperm.xlu1 %5804, %v6880_v18   ;;  %v1798_v54 = vadd.f32 %v1794_v60, %v1769_v43  ;;  %v8591_v41 = vmov 16   ;;  %v1881_v17 = vmul.f32 %v4729_v34, %v6712_v53  ;;  %v4741_v53 = vld [vmem:[%s8449_s4 + $0x4a0] sm:$0xff] }
 0x3e7   :  { %v7233_v16 = vpop.permute.xlu0 %2048  ;;  %v4757_v60 = vld [vmem:[%s8449_s4 + $0x520] sm:$0xff] }
 0x3e8   :  { %v1945_v8 = vadd.f32 %v1941_v6, %v1916_v50  ;;  %v1962_v61 = vpop.permute.xlu1 %1961 }
 0x3e9   :  { %v1970_v25 = vmul.f32 %v4743_v24, %v1962_v61  ;;  %v4737_v24 = vld [vmem:[%s8449_s4 + $0x480] sm:$0xff]  ;;  %v1968_v61 = vmul.f32 %v4741_v53, %v6736_v4 }
 0x3ea   :  { %5805 = vset.pattern.permute.xlu1 %v8589_v47  ;;  %v4749_v47 = vld [vmem:[%s8449_s4 + $0x4e0] sm:$0xff] }
 0x3eb   :  { %v1974_v45 = vadd.f32 %v1970_v25, %v1945_v8  ;;  %1240 = vperm.xlu1 %5805, %v6880_v18  }
 0x3ec   :  { %v7245_v51 = vpop.permute.xlu0 %2073 }
 0x3ed   :  { %v7247_v29 = vadd.f32 %v1999_v5, %v1974_v45  ;;  %v2020_v23 = vpop.permute.xlu1 %2019  ;;  %v8593_v45 = vmov 20  }
 0x3ee   :  { %v2028_v5 = vmul.f32 %v4751_v2, %v2020_v23  ;;  %v2026_v23 = vmul.f32 %v4749_v47, %v8594_v48 }
 0x3ef   :  { %5806 = vset.pattern.permute.xlu1 %v8547_v14  ;;  %v4721_v14 = vld [vmem:[%s8449_s4 + $0x400] sm:$0xff] }
 0x3f0   :  { %1269 = vperm.xlu1 %5806, %v6880_v18   ;;  %v1823_v32 = vmul.f32 %v4721_v14, %v6704_v33  ;;  %v4733_v33 = vld [vmem:[%s8449_s4 + $0x460] sm:$0xff]  ;;  %v2032_v43 = vadd.f32 %v2028_v5, %v7247_v29  ;;  %v4758_v29 = vld [vmem:[%s8449_s4 + $0x528] sm:$0xff] }
 0x3f1   :  { %v7260_v35 = vpop.permute.xlu0 %2098  ;;  %v1910_v39 = vmul.f32 %v4733_v33, %v6730_v3  ;;  %v1939_v3 = vmul.f32 %v4737_v24, %v6720_v20  ;;  %v4761_v33 = vld [vmem:[%s8449_s4 + $0x540] sm:$0xff] }
 0x3f2   :  { %v7258_v38 = vpop.permute.xlu1 %892  ;;  %v1827_v21 = vadd.f32 %v1823_v32, %v1798_v54 }
 0x3f4   :  { %5807 = vset.pattern.permute.xlu1 %v8590_v42  ;;  %v1856_v55 = vadd.f32 %v1852_v63, %v1827_v21  ;;  %v2055_v42 = vmul.f32 %v4753_v19, %v7222_v36  ;;  %v8595_v21 = vmov 21   ;;  %v4762_v36 = vld [vmem:[%s8449_s4 + $0x548] sm:$0xff] }
 0x3f5   :  { %1298 = vperm.xlu1 %5807, %v6880_v18   ;;  %v7271_v52 = vpop.permute.xlu0 %2106 }
 0x3f6   :  { %v1885_v40 = vadd.f32 %v1881_v17, %v1856_v55 }
 0x3f7   :  { %v2045_v1 = vpop.permute.xlu1 %2044 }
 0x3f8   :  { %v1914_v31 = vadd.f32 %v1910_v39, %v1885_v40  ;;  %v2056_v14 = vmul.f32 %v4754_v62, %v2045_v1  ;;  %v4763_v1 = vld [vmem:[%s8449_s4 + $0x550] sm:$0xff]  ;;  %v4765_v40 = vld [vmem:[%s8449_s4 + $0x560] sm:$0xff]  ;;  %v2085_v39 = vmul.f32 %v4758_v29, %v7245_v51 }
 0x3f9   :  { %5808 = vset.pattern.permute.xlu1 %v8549_v12  ;;  %v2115_v53 = vmul.f32 %v4763_v1, %v7271_v52  ;;  %v4771_v52 = vld [vmem:[%s8449_s4 + $0x590] sm:$0xff] }
 0x3fa   :  { %1327 = vperm.xlu1 %5808, %v6880_v18   ;;  %v7281_v27 = vpop.permute.xlu0 %2131  ;;  %v1943_v8 = vadd.f32 %v1939_v3, %v1914_v31 }
 0x3fc   :  { %v2070_v44 = vpop.permute.xlu1 %2069  ;;  %v1972_v20 = vadd.f32 %v1968_v61, %v1943_v8  ;;  %v2113_v61 = vmul.f32 %v4761_v33, %v7260_v35  ;;  %v4775_v35 = vld [vmem:[%s8449_s4 + $0x5b0] sm:$0xff] }
 0x3fe   :  { %5809 = vset.pattern.permute.xlu1 %v8591_v41  ;;  %v2084_v41 = vmul.f32 %v4757_v60, %v2070_v44  ;;  %v4767_v44 = vld [vmem:[%s8449_s4 + $0x570] sm:$0xff] }
 0x3ff   :  { %1356 = vperm.xlu1 %5809, %v6880_v18   ;;  %v7291_v6 = vpop.permute.xlu0 %2156 }
 0x400   :  { %v2078_v12 = vpop.permute.xlu1 %2077 }
 0x401   :  { %v2086_v30 = vmul.f32 %v4759_v15, %v2078_v12  ;;  %v2060_v12 = vadd.f32 %v2056_v14, %v6965_v7  ;;  %v4774_v14 = vld [vmem:[%s8449_s4 + $0x5a8] sm:$0xff] }
 0x403   :  { %5810 = vset.pattern.permute.xlu1 %v8551_v9  ;;  %v7302_v28 = vpop.permute.xlu0 %2164  ;;  %v2089_v2 = vadd.f32 %v2085_v39, %v2060_v12  ;;  %v4782_v39 = vld [vmem:[%s8449_s4 + $0x5e8] sm:$0xff] }
 0x404   :  { %1385 = vperm.xlu1 %5810, %v6880_v18  }
 0x405   :  { %v2103_v50 = vpop.permute.xlu1 %2102 }
 0x406   :  { %v2114_v31 = vmul.f32 %v4762_v36, %v2103_v50  ;;  %v4770_v50 = vld [vmem:[%s8449_s4 + $0x588] sm:$0xff] }
 0x408   :  { %5811 = vset.pattern.permute.xlu1 %v8592_v37  ;;  %v7316_v4 = vpop.permute.xlu0 %2189  ;;  %v8596_v37 = vmov 22  }
 0x409   :  { %1414 = vperm.xlu1 %5811, %v6880_v18   ;;  %v2201_v29 = vmul.f32 %v4774_v14, %v7316_v4  ;;  %v8599_v4 = vmov 25  }
 0x40a   :  { %v2128_v9 = vpop.permute.xlu1 %2127 }
 0x40d   :  { %5812 = vset.pattern.permute.xlu1 %v8553_v11  ;;  %v1997_v11 = vmul.f32 %v4745_v57, %v6728_v46  ;;  %v4755_v46 = vld [vmem:[%s8449_s4 + $0x510] sm:$0xff]  ;;  %v7340_v32 = vpop.permute.xlu0 %2214  ;;  %v2142_v57 = vmul.f32 %v4765_v40, %v2128_v9  ;;  %v4769_v9 = vld [vmem:[%s8449_s4 + $0x580] sm:$0xff] }
 0x40e   :  { %1443 = vperm.xlu1 %5812, %v6880_v18   ;;  %v2136_v25 = vpop.permute.xlu1 %2135  ;;  %v2057_v54 = vmul.f32 %v4755_v46, %v7233_v16 }
 0x40f   :  { %v2001_v26 = vadd.f32 %v1997_v11, %v1972_v20  ;;  %v2144_v3 = vmul.f32 %v4767_v44, %v2136_v25  ;;  %v4766_v20 = vld [vmem:[%s8449_s4 + $0x568] sm:$0xff]  ;;  %v2118_v25 = vadd.f32 %v2114_v31, %v2089_v2  ;;  %v4773_v11 = vld [vmem:[%s8449_s4 + $0x5a0] sm:$0xff]  ;;  %v4787_v2 = vld [vmem:[%s8449_s4 + $0x610] sm:$0xff] }
 0x410   :  { %v2061_v55 = vadd.f32 %v2057_v54, %v2032_v43  ;;  %v2143_v62 = vmul.f32 %v4766_v20, %v7281_v27  ;;  %v2171_v43 = vmul.f32 %v4769_v9, %v7291_v6  ;;  %v4778_v27 = vld [vmem:[%s8449_s4 + $0x5c8] sm:$0xff] }
 0x411   :  { %v2030_v63 = vadd.f32 %v2026_v23, %v2001_v26  ;;  %v2223_v8 = vpop.permute.xlu0 %2222  ;;  %v2173_v23 = vmul.f32 %v4771_v52, %v7302_v28 }
 0x412   :  { %5813 = vset.pattern.permute.xlu1 %v8593_v45  ;;  %v2090_v17 = vadd.f32 %v2086_v30, %v2061_v55  ;;  %v8597_v45 = vmov 23   ;;  %v2147_v60 = vadd.f32 %v2143_v62, %v2118_v25  ;;  %v8600_v25 = vmov 26  }
 0x413   :  { %1472 = vperm.xlu1 %5813, %v6880_v18   ;;  %v2161_v22 = vpop.permute.xlu1 %2160  ;;  %v2059_v16 = vadd.f32 %v2055_v42, %v2030_v63  ;;  %v4777_v63 = vld [vmem:[%s8449_s4 + $0x5c0] sm:$0xff] }
 0x414   :  { %v2119_v51 = vadd.f32 %v2115_v53, %v2090_v17  ;;  %v2172_v48 = vmul.f32 %v4770_v50, %v2161_v22  ;;  %v4779_v22 = vld [vmem:[%s8449_s4 + $0x5d0] sm:$0xff]  ;;  %v2229_v44 = vmul.f32 %v4777_v63, %v7340_v32  ;;  %v4785_v53 = vld [vmem:[%s8449_s4 + $0x600] sm:$0xff]  ;;  %v4616_v63 = vld [vmem:[%s8449_s4 + $0xb8] sm:$0xff] }
 0x415   :  { %v2088_v24 = vadd.f32 %v2084_v41, %v2059_v16  ;;  %v4783_v16 = vld [vmem:[%s8449_s4 + $0x5f0] sm:$0xff]  ;;  %v2231_v1 = vmul.f32 %v4779_v22, %v2223_v8 }
 0x416   :  { %v2148_v5 = vadd.f32 %v2144_v3, %v2119_v51  ;;  %v2248_v46 = vpop.permute.xlu0 %2247  ;;  %v2176_v28 = vadd.f32 %v2172_v48, %v2147_v60  ;;  %v4786_v3 = vld [vmem:[%s8449_s4 + $0x608] sm:$0xff]  ;;  %v4608_v60 = vld [vmem:[%s8449_s4 + $0x78] sm:$0xff] }
 0x417   :  { %5814 = vset.pattern.permute.xlu1 %v8595_v21  ;;  %v2117_v47 = vadd.f32 %v2113_v61, %v2088_v24  ;;  %v8598_v21 = vmov 24   ;;  %v2259_v8 = vmul.f32 %v4782_v39, %v2248_v46  ;;  %v8606_v39 = vmov 32  }
 0x418   :  { %1501 = vperm.xlu1 %5814, %v6880_v18   ;;  %v2186_v34 = vpop.permute.xlu1 %2185  ;;  %v2177_v54 = vadd.f32 %v2173_v23, %v2148_v5  ;;  %v2205_v33 = vadd.f32 %v2201_v29, %v2176_v28  ;;  %v8601_v23 = vmov 27   ;;  %v8604_v29 = vmov 30  }
 0x419   :  { %v2146_v26 = vadd.f32 %v2142_v57, %v2117_v47  ;;  %v2200_v42 = vmul.f32 %v4773_v11, %v2186_v34  ;;  %v4781_v34 = vld [vmem:[%s8449_s4 + $0x5e0] sm:$0xff]  ;;  %v874_v47 = vld [vmem:[%s8449_s4 + $0x18] sm:$0xff] }
 0x41a   :  { %v4600_v11 = vld [vmem:[%s8449_s4 + $0x38] sm:$0xff] }
 0x41b   :  { %v2175_v30 = vadd.f32 %v2171_v43, %v2146_v26  ;;  %v2273_v12 = vpop.permute.xlu0 %2272  ;;  %v927_v46 = vmul.f32 %v4600_v11, %v7205_v49  ;;  %v4612_v49 = vld [vmem:[%s8449_s4 + $0x98] sm:$0xff] }
 0x41c   :  { %5815 = vset.pattern.permute.xlu1 %v8596_v37  ;;  %v2194_v7 = vpop.permute.xlu1 %2193  ;;  %v2287_v51 = vmul.f32 %v4785_v53, %v2273_v12  ;;  %v8605_v12 = vmov 31   ;;  %v4644_v11 = vld [vmem:[%s8449_s4 + $0x198] sm:$0xff] }
 0x41d   :  { %1530 = vperm.xlu1 %5815, %v6880_v18   ;;  %v2202_v15 = vmul.f32 %v4775_v35, %v2194_v7  ;;  %v2204_v55 = vadd.f32 %v2200_v42, %v2175_v30 }
 0x41f   :  { %v2206_v41 = vadd.f32 %v2202_v15, %v2177_v54  ;;  %v2233_v7 = vadd.f32 %v2229_v44, %v2204_v55  ;;  %v2281_v57 = vpop.permute.xlu0 %2280 }
 0x420   :  { %v2289_v35 = vmul.f32 %v4787_v2, %v2281_v57  ;;  %v4636_v57 = vld [vmem:[%s8449_s4 + $0x158] sm:$0xff] }
 0x421   :  { %5816 = vset.pattern.permute.xlu1 %v8597_v45  ;;  %v2219_v19 = vpop.permute.xlu1 %2218  ;;  %v2235_v24 = vadd.f32 %v2231_v1, %v2206_v41  ;;  %v4604_v45 = vld [vmem:[%s8449_s4 + $0x58] sm:$0xff] }
 0x422   :  { %1559 = vperm.xlu1 %5816, %v6880_v18   ;;  %v2230_v36 = vmul.f32 %v4778_v27, %v2219_v19  ;;  %v898_v19 = vmul.f32 %v7258_v38, %v874_v47  ;;  %v8602_v27 = vmov 28  }
 0x424   :  { %v2234_v37 = vadd.f32 %v2230_v36, %v2205_v33  ;;  %v931_v42 = vadd.f32 %v927_v46, %v898_v19  ;;  %v4620_v36 = vld [vmem:[%s8449_s4 + $0xd8] sm:$0xff] }
 0x425   :  { %v4624_v33 = vld [vmem:[%s8449_s4 + $0xf8] sm:$0xff] }
 0x426   :  { %5817 = vset.pattern.permute.xlu1 %v8598_v21  ;;  %v2244_v6 = vpop.permute.xlu1 %2243  ;;  %v2263_v50 = vadd.f32 %v2259_v8, %v2234_v37  ;;  %v8603_v21 = vmov 29  }
 0x427   :  { %1588 = vperm.xlu1 %5817, %v6880_v18   ;;  %v2258_v17 = vmul.f32 %v4781_v34, %v2244_v6 }
 0x429   :  { %v2262_v61 = vadd.f32 %v2258_v17, %v2233_v7  ;;  %v8607_v7 = vmov 33  }
 0x42a   :  { %v2252_v40 = vpop.permute.xlu1 %2251 }
 0x42b   :  { %v2260_v31 = vmul.f32 %v4783_v16, %v2252_v40  ;;  %5818 = vset.pattern.permute.xlu1 %v8599_v4  ;;  %v2291_v9 = vadd.f32 %v2287_v51, %v2262_v61  ;;  %v8608_v61 = vmov 34  }
 0x42c   :  { %1617 = vperm.xlu1 %5818, %v6880_v18  }
 0x42d   :  { %v2264_v32 = vadd.f32 %v2260_v31, %v2235_v24  ;;  %v4628_v31 = vld [vmem:[%s8449_s4 + $0x118] sm:$0xff] }
 0x42f   :  { %v2277_v20 = vpop.permute.xlu1 %2276  ;;  %v2293_v62 = vadd.f32 %v2289_v35, %v2264_v32  ;;  %v4632_v32 = vld [vmem:[%s8449_s4 + $0x138] sm:$0xff] }
 0x430   :  { %v2288_v52 = vmul.f32 %v4786_v3, %v2277_v20  ;;  %5819 = vset.pattern.permute.xlu1 %v8600_v25  ;;  %v4640_v25 = vld [vmem:[%s8449_s4 + $0x178] sm:$0xff] }
 0x431   :  { %1646 = vperm.xlu1 %5819, %v6880_v18  }
 0x432   :  { %v2292_v5 = vadd.f32 %v2288_v52, %v2263_v50  ;;  %v8609_v50 = vmov 35  }
 0x434   :  { %v2295_v26 = vadd.f32 %v2292_v5, %v2291_v9  ;;  %v951_v48 = vpop.permute.xlu1 %950  ;;  %v8610_v9 = vmov 36  }
 0x435   :  { %5820 = vset.pattern.permute.xlu1 %v8601_v23  ;;  %v956_v15 = vmul.f32 %v4604_v45, %v951_v48  ;;  %v4648_v48 = vld [vmem:[%s8449_s4 + $0x1b8] sm:$0xff] }
 0x436   :  { %1675 = vperm.xlu1 %5820, %v6880_v18   ;;  %v7442_v43 = vadd.f32 %v2295_v26, %v2293_v62  ;;  %v8611_v62 = vmov 37  }
 0x437   :  { %v960_v54 = vadd.f32 %v956_v15, %v931_v42  ;;  %v8612_v15 = vmov 38   ;;  %v4652_v42 = vld [vmem:[%s8449_s4 + $0x1d8] sm:$0xff] }
 0x439   :  { %v980_v14 = vpop.permute.xlu1 %979 }
 0x43a   :  { %v985_v38 = vmul.f32 %v4608_v60, %v980_v14  ;;  %5821 = vset.pattern.permute.xlu1 %v8602_v27 }
 0x43b   :  { %1704 = vperm.xlu1 %5821, %v6880_v18  }
 0x43c   :  { %v989_v22 = vadd.f32 %v985_v38, %v960_v54  ;;  %v8613_v38 = vmov 39  }
 0x43e   :  { %v1009_v28 = vpop.permute.xlu1 %1008 }
 0x43f   :  { %v1014_v30 = vmul.f32 %v4612_v49, %v1009_v28  ;;  %5822 = vset.pattern.permute.xlu1 %v8603_v21 }
 0x440   :  { %1733 = vperm.xlu1 %5822, %v6880_v18  }
 0x441   :  { %v1018_v6 = vadd.f32 %v1014_v30, %v989_v22  ;;  %v4656_v22 = vld [vmem:[%s8449_s4 + $0x1f8] sm:$0xff]  ;;  %v8614_v30 = vmov 40  }
 0x443   :  { %v1038_v41 = vpop.permute.xlu1 %1037 }
 0x444   :  { %v1043_v34 = vmul.f32 %v4616_v63, %v1038_v41  ;;  %5823 = vset.pattern.permute.xlu1 %v8604_v29 }
 0x445   :  { %1762 = vperm.xlu1 %5823, %v6880_v18  }
 0x446   :  { %v1047_v55 = vadd.f32 %v1043_v34, %v1018_v6  ;;  %v4660_v6 = vld [vmem:[%s8449_s4 + $0x218] sm:$0xff] }
 0x448   :  { %v1067_v16 = vpop.permute.xlu1 %1066 }
 0x449   :  { %v1072_v1 = vmul.f32 %v4620_v36, %v1067_v16  ;;  %5824 = vset.pattern.permute.xlu1 %v8605_v12  ;;  %v8616_v16 = vmov 43   ;;  %v5912_v12 = vld [vmem:[%s8450_s9 + $0x38] sm:$0xff]  }
 0x44a   :  { %1791 = vperm.xlu1 %5824, %v6880_v18  }
 0x44b   :  { %v1076_v44 = vadd.f32 %v1072_v1, %v1047_v55  ;;  %v8615_v55 = vmov 42  }
 0x44d   :  { %v1096_v17 = vpop.permute.xlu1 %1095 }
 0x44e   :  { %v1101_v40 = vmul.f32 %v4624_v33, %v1096_v17  ;;  %5825 = vset.pattern.permute.xlu1 %v8606_v39  ;;  %v5914_v17 = vld [vmem:[%s8450_s9 + $0x28] sm:$0xff]  }
 0x44f   :  { %1820 = vperm.xlu1 %5825, %v6880_v18  }
 0x450   :  { %v1105_v24 = vadd.f32 %v1101_v40, %v1076_v44  ;;  %v6124_v44 = vmov 0.0  }
 0x451   :  { %5223 = vmatprep.subr.bf16.mxu0 %v6124_v44  ;;  %5239 = vmatprep.mubr.msk.bf16.mxu0 %vm6125_vm4, %v6124_v44 }
 0x452   :  { %v1125_v4 = vpop.permute.xlu1 %1124  ;;  %5224 = vmatpush3.bf16.msra.mxu0 %v5912_v12 }
 0x453   :  { %v1130_v37 = vmul.f32 %v4628_v31, %v1125_v4  ;;  %5826 = vset.pattern.permute.xlu1 %v8607_v7  ;;  %5225 = vmatprep.subr.bf16.mxu0 %v6124_v44  ;;  %v5920_v7 = vld [vmem:[%s8450_s9 + $0x8] sm:$0xff]  }
 0x454   :  { %1849 = vperm.xlu1 %5826, %v6880_v18  }
 0x455   :  { %v1134_v53 = vadd.f32 %v1130_v37, %v1105_v24  ;;  %v5917_v24 = vld [vmem:[%s8450_s9 + $0x10] sm:$0xff]  }
 0x457   :  { %v1154_v3 = vpop.permute.xlu1 %1153 }
 0x458   :  { %v1159_v8 = vmul.f32 %v4632_v32, %v1154_v3  ;;  %5827 = vset.pattern.permute.xlu1 %v8608_v61  ;;  %v5921_v32 = vld [vmem:[%s8450_s9] sm:$0xff]   ;;  %v5922_v61 = vld [vmem:[%s8451_s7 + $0x8] ss:$0 sps:$4 sm:$0x77]  }
 0x459   :  { %1878 = vperm.xlu1 %5827, %v6880_v18  }
 0x45a   :  { %v1163_v2 = vadd.f32 %v1159_v8, %v1134_v53  ;;  %v2306_v53 = vld [vmem:[%s8452_s6] sm:$0x7] }
 0x45c   :  { %v1183_v20 = vpop.permute.xlu1 %1182 }
 0x45d   :  { %v1188_v51 = vmul.f32 %v4636_v57, %v1183_v20  ;;  %5828 = vset.pattern.permute.xlu1 %v8609_v50  ;;  %v5923_v57 = vld [vmem:[%s8453_s11 + $0x38] sm:$0xff]   ;;  %v5925_v50 = vld [vmem:[%s8453_s11 + $0x28] sm:$0xff]  }
 0x45e   :  { %1907 = vperm.xlu1 %5828, %v6880_v18  }
 0x45f   :  { %v1192_v52 = vadd.f32 %v1188_v51, %v1163_v2  ;;  %v2346_v2 = vsel %vm2338_vm2, %v5922_v61, 0  ;;  %v5924_v51 = vld [vmem:[%s8453_s11 + $0x30] sm:$0xff]   ;;  %v4724_v61 = vld [vmem:[%s8449_s4 + $0x418] sm:$0xff] }
 0x461   :  { %v1212_v47 = vpop.permute.xlu1 %1211 }
 0x462   :  { %v1217_v35 = vmul.f32 %v4640_v25, %v1212_v47  ;;  %5829 = vset.pattern.permute.xlu1 %v8610_v9  ;;  %v5926_v25 = vld [vmem:[%s8453_s11 + $0x20] sm:$0xff]  }
 0x463   :  { %1936 = vperm.xlu1 %5829, %v6880_v18  }
 0x464   :  { %v1221_v5 = vadd.f32 %v1217_v35, %v1192_v52 }
 0x466   :  { %v1241_v45 = vpop.permute.xlu1 %1240 }
 0x467   :  { %v1246_v19 = vmul.f32 %v4644_v11, %v1241_v45  ;;  %5830 = vset.pattern.permute.xlu1 %v8611_v62  ;;  %v4664_v45 = vld [vmem:[%s8449_s4 + $0x238] sm:$0xff] }
 0x468   :  { %1965 = vperm.xlu1 %5830, %v6880_v18   ;;  %v4668_v62 = vld [vmem:[%s8449_s4 + $0x258] sm:$0xff] }
 0x469   :  { %v1250_v26 = vadd.f32 %v1246_v19, %v1221_v5 }
 0x46b   :  { %v1270_v23 = vpop.permute.xlu1 %1269 }
 0x46c   :  { %v1275_v46 = vmul.f32 %v4648_v48, %v1270_v23  ;;  %5831 = vset.pattern.permute.xlu1 %v8612_v15  ;;  %v4672_v48 = vld [vmem:[%s8449_s4 + $0x278] sm:$0xff] }
 0x46d   :  { %1994 = vperm.xlu1 %5831, %v6880_v18  }
 0x46e   :  { %v1279_v60 = vadd.f32 %v1275_v46, %v1250_v26  ;;  %v4676_v46 = vld [vmem:[%s8449_s4 + $0x298] sm:$0xff] }
 0x470   :  { %v1299_v14 = vpop.permute.xlu1 %1298 }
 0x471   :  { %v1304_v54 = vmul.f32 %v4652_v42, %v1299_v14  ;;  %5832 = vset.pattern.permute.xlu1 %v8613_v38  ;;  %v4680_v14 = vld [vmem:[%s8449_s4 + $0x2b8] sm:$0xff] }
 0x472   :  { %2023 = vperm.xlu1 %5832, %v6880_v18  }
 0x473   :  { %v1308_v27 = vadd.f32 %v1304_v54, %v1279_v60 }
 0x475   :  { %v1328_v49 = vpop.permute.xlu1 %1327 }
 0x476   :  { %v1333_v28 = vmul.f32 %v4656_v22, %v1328_v49  ;;  %5833 = vset.pattern.permute.xlu1 %v8614_v30  ;;  %v4688_v30 = vld [vmem:[%s8449_s4 + $0x2f8] sm:$0xff] }
 0x477   :  { %2052 = vperm.xlu1 %5833, %v6880_v18  }
 0x478   :  { %v1337_v21 = vadd.f32 %v1333_v28, %v1308_v27  ;;  %v4684_v27 = vld [vmem:[%s8449_s4 + $0x2d8] sm:$0xff] }
 0x47a   :  { %v1357_v63 = vpop.permute.xlu1 %1356 }
 0x47b   :  { %v1362_v41 = vmul.f32 %v4660_v6, %v1357_v63  ;;  %5834 = vset.pattern.permute.xlu1 %v8573_v0  ;;  %v4692_v63 = vld [vmem:[%s8449_s4 + $0x318] sm:$0xff] }
 0x47c   :  { %2081 = vperm.xlu1 %5834, %v6880_v18  }
 0x47d   :  { %v7514_v34 = vadd.f32 %v1362_v41, %v1337_v21 }
 0x47f   :  { %v7516_v29 = vpop.permute.xlu1 %1385 }
 0x480   :  { %5835 = vset.pattern.permute.xlu1 %v8615_v55  ;;  %v1391_v26 = vmul.f32 %v4664_v45, %v7516_v29  ;;  %v4696_v29 = vld [vmem:[%s8449_s4 + $0x338] sm:$0xff] }
 0x481   :  { %2110 = vperm.xlu1 %5835, %v6880_v18  }
 0x482   :  { %v1395_v60 = vadd.f32 %v1391_v26, %v7514_v34 }
 0x484   :  { %v7520_v36 = vpop.permute.xlu1 %1414 }
 0x485   :  { %5836 = vset.pattern.permute.xlu1 %v8616_v16  ;;  %v1420_v23 = vmul.f32 %v4668_v62, %v7520_v36  ;;  %v4736_v62 = vld [vmem:[%s8449_s4 + $0x478] sm:$0xff] }
 0x486   :  { %2139 = vperm.xlu1 %5836, %v6880_v18  }
 0x487   :  { %v1424_v54 = vadd.f32 %v1420_v23, %v1395_v60  ;;  %v4740_v23 = vld [vmem:[%s8449_s4 + $0x498] sm:$0xff] }
 0x488   :  { %v4744_v60 = vld [vmem:[%s8449_s4 + $0x4b8] sm:$0xff] }
 0x489   :  { %v7524_v1 = vpop.permute.xlu1 %1443 }
 0x48a   :  { %5837 = vset.pattern.permute.xlu1 %v8576_v56  ;;  %v5913_v56 = vld [vmem:[%s8450_s9 + $0x30] sm:$0xff]   ;;  %v1449_v42 = vmul.f32 %v4672_v48, %v7524_v1  ;;  %v4700_v1 = vld [vmem:[%s8449_s4 + $0x358] sm:$0xff] }
 0x48b   :  { %2168 = vperm.xlu1 %5837, %v6880_v18   ;;  %5226 = vmatpush3.bf16.msra.mxu0 %v5913_v56  ;;  %v5927_v56 = vld [vmem:[%s8453_s11 + $0x18] sm:$0xff]  }
 0x48c   :  { %5227 = vmatprep.subr.bf16.mxu0 %v6124_v44  ;;  %v1453_v22 = vadd.f32 %v1449_v42, %v1424_v54  ;;  %v4748_v54 = vld [vmem:[%s8449_s4 + $0x4d8] sm:$0xff] }
 0x48e   :  { %v7528_v0 = vpop.permute.xlu1 %1472 }
 0x48f   :  { %5838 = vset.pattern.permute.xlu1 %v8577_v13  ;;  %5228 = vmatpush3.bf16.msra.mxu0 %v5914_v17  ;;  %v1478_v38 = vmul.f32 %v4676_v46, %v7528_v0 }
 0x490   :  { %2197 = vperm.xlu1 %5838, %v6880_v18   ;;  %5229 = vmatprep.subr.bf16.mxu0 %v6124_v44 }
 0x491   :  { %v1482_v21 = vadd.f32 %v1478_v38, %v1453_v22 }
 0x493   :  { %v7536_v33 = vpop.permute.xlu1 %1501 }
 0x494   :  { %5839 = vset.pattern.permute.xlu1 %v8578_v59  ;;  %v5915_v59 = vld [vmem:[%s8450_s9 + $0x20] sm:$0xff]   ;;  %v1507_v49 = vmul.f32 %v4680_v14, %v7536_v33  ;;  %v4704_v33 = vld [vmem:[%s8449_s4 + $0x378] sm:$0xff] }
 0x495   :  { %2226 = vperm.xlu1 %5839, %v6880_v18   ;;  %5230 = vmatpush3.bf16.msra.mxu0 %v5915_v59 }
 0x496   :  { %5231 = vmatprep.subr.bf16.mxu0 %v6124_v44  ;;  %v1511_v41 = vadd.f32 %v1507_v49, %v1482_v21  ;;  %v4756_v49 = vld [vmem:[%s8449_s4 + $0x518] sm:$0xff] }
 0x498   :  { %v7545_v13 = vpop.permute.xlu1 %1530 }
 0x499   :  { %5840 = vset.pattern.permute.xlu1 %v6122_v10  ;;  %v5916_v10 = vld [vmem:[%s8450_s9 + $0x18] sm:$0xff]   ;;  %v1536_v6 = vmul.f32 %v4684_v27, %v7545_v13 }
 0x49a   :  { %2255 = vperm.xlu1 %5840, %v6880_v18   ;;  %5232 = vmatpush3.bf16.msra.mxu0 %v5916_v10  ;;  %v4752_v27 = vld [vmem:[%s8449_s4 + $0x4f8] sm:$0xff] }
 0x49b   :  { %5233 = vmatprep.subr.bf16.mxu0 %v6124_v44  ;;  %v1540_v36 = vadd.f32 %v1536_v6, %v1511_v41  ;;  %v4760_v6 = vld [vmem:[%s8449_s4 + $0x538] sm:$0xff] }
 0x49d   :  { %v7556_v40 = vpop.permute.xlu1 %1559 }
 0x49e   :  { %5841 = vset.pattern.permute.xlu1 %v6123_v58  ;;  %v2307_v58 = vld [vmem:[%s8451_s7] sm:$0x77]  ;;  %5234 = vmatpush3.bf16.msra.mxu0 %v5917_v24  ;;  %v1565_v34 = vmul.f32 %v4688_v30, %v7556_v40  ;;  %v4708_v40 = vld [vmem:[%s8449_s4 + $0x398] sm:$0xff]  ;;  %v5928_v24 = vld [vmem:[%s8453_s11 + $0x10] sm:$0xff]  }
 0x49f   :  { %2284 = vperm.xlu1 %5841, %v6880_v18   ;;  %v4790_v18 = vcombine.high %v2307_v58, %v2307_v58  ;;  %v4789_v31 = vcombine.low %v2307_v58, %v2307_v58  ;;  %5235 = vmatprep.subr.bf16.mxu0 %v6124_v44  ;;  %v4712_v58 = vld [vmem:[%s8449_s4 + $0x3b8] sm:$0xff] }
 0x4a0   :  { %v1569_v0 = vadd.f32 %v1565_v34, %v1540_v36  ;;  %v4768_v36 = vld [vmem:[%s8449_s4 + $0x578] sm:$0xff] }
 0x4a1   :  { %4792 = vmatprep.subr.msk.bf16.mxu1 %vm2338_vm2, %v4790_v18  ;;  %v2340_v37 = vsel %vm2338_vm2, %v4789_v31, 0 }
 0x4a2   :  { %v7564_v39 = vpop.permute.xlu1 %1588  ;;  %2363 = vmatpush1.bf16.msra.mxu1 %v2340_v37  ;;  %5236 = vmatpush3.bf16.msra.mxu0 %v5920_v7 }
 0x4a3   :  { %5217 = vmatprep.subr.bf16.mxu1 %v6124_v44  ;;  %5237 = vmatprep.subr.bf16.mxu0 %v6124_v44  ;;  %v1594_v16 = vmul.f32 %v4692_v63, %v7564_v39 }
 0x4a5   :  { %4793 = vmatmul.mubr.msk.bf16.vlgmr.msra.gmra.mxu1 %vm2334_vm3, %v2306_v53  ;;  %v1598_v13 = vadd.f32 %v1594_v16, %v1569_v0  ;;  %v4772_v0 = vld [vmem:[%s8449_s4 + $0x598] sm:$0xff] }
 0x4a6   :  { %5219 = vmatprep.mubr.msk.bf16.mxu1 %vm6125_vm4, %v6124_v44  ;;  %5238 = vmatpush3.bf16.msra.mxu0 %v5921_v32  ;;  %v4720_v32 = vld [vmem:[%s8449_s4 + $0x3f8] sm:$0xff] }
 0x4a7   :  { %v7573_v4 = vpop.permute.xlu1 %1617  ;;  %5263 = vmatprep.subr.bf16.mxu0 %v6124_v44  ;;  %5218 = vmatpush3.bf16.msra.mxu1 %v2346_v2 }
 0x4a8   :  { %5243 = vmatprep.subr.bf16.mxu1 %v6124_v44  ;;  %v1623_v12 = vmul.f32 %v4696_v29, %v7573_v4  ;;  %v4716_v4 = vld [vmem:[%s8449_s4 + $0x3d8] sm:$0xff] }
 0x4aa   :  { %v1627_v10 = vadd.f32 %v1623_v12, %v1598_v13 }
 0x4ac   :  { %v7590_v3 = vpop.permute.xlu1 %1646 }
 0x4ad   :  { %5220 = vmatmul.mubr.msk.bf16.vlgmr.msra.gmra.mxu1 %vm2334_vm3, %v2306_v53  ;;  %v1652_v17 = vmul.f32 %v4700_v1, %v7590_v3 }
 0x4ae   :  { %5244 = vmatpush3.bf16.msra.mxu1 %v5923_v57  ;;  %5259 = vmatprep.mubr.msk.bf16.mxu1 %vm6125_vm4, %v6124_v44 }
 0x4af   :  { %5245 = vmatprep.subr.bf16.mxu1 %v6124_v44  ;;  %v1656_v18 = vadd.f32 %v1652_v17, %v1627_v10 }
 0x4b1   :  { %v7597_v8 = vpop.permute.xlu1 %1675 }
 0x4b2   :  { %5246 = vmatpush3.bf16.msra.mxu1 %v5924_v51  ;;  %v1681_v39 = vmul.f32 %v4704_v33, %v7597_v8  ;;  %v4728_v51 = vld [vmem:[%s8449_s4 + $0x438] sm:$0xff] }
 0x4b3   :  { %5247 = vmatprep.subr.bf16.mxu1 %v6124_v44 }
 0x4b4   :  { %v1685_v7 = vadd.f32 %v1681_v39, %v1656_v18 }
 0x4b6   :  { %v7607_v20 = vpop.permute.xlu1 %1704  ;;  %5248 = vmatpush3.bf16.msra.mxu1 %v5925_v50 }
 0x4b7   :  { %5249 = vmatprep.subr.bf16.mxu1 %v6124_v44  ;;  %v1710_v31 = vmul.f32 %v4708_v40, %v7607_v20  ;;  %v4780_v40 = vld [vmem:[%s8449_s4 + $0x5d8] sm:$0xff] }
 0x4b9   :  { %v1714_v3 = vadd.f32 %v1710_v31, %v1685_v7  ;;  %v4788_v7 = vld [vmem:[%s8449_s4 + $0x618] sm:$0xff] }
 0x4ba   :  { %5250 = vmatpush3.bf16.msra.mxu1 %v5926_v25  ;;  %v4732_v25 = vld [vmem:[%s8449_s4 + $0x458] sm:$0xff] }
 0x4bb   :  { %v1734_v52 = vpop.permute.xlu1 %1733  ;;  %5251 = vmatprep.subr.bf16.mxu1 %v6124_v44 }
 0x4bc   :  { %v1739_v53 = vmul.f32 %v4712_v58, %v1734_v52 }
 0x4be   :  { %5252 = vmatpush3.bf16.msra.mxu1 %v5927_v56  ;;  %v1743_v2 = vadd.f32 %v1739_v53, %v1714_v3  ;;  %v4776_v56 = vld [vmem:[%s8449_s4 + $0x5b8] sm:$0xff] }
 0x4bf   :  { %5253 = vmatprep.subr.bf16.mxu1 %v6124_v44 }
 0x4c0   :  { %v1763_v47 = vpop.permute.xlu1 %1762 }
 0x4c1   :  { %v1768_v8 = vmul.f32 %v4716_v4, %v1763_v47 }
 0x4c2   :  { %5254 = vmatpush3.bf16.msra.mxu1 %v5928_v24  ;;  %v4784_v24 = vld [vmem:[%s8449_s4 + $0x5f8] sm:$0xff] }
 0x4c3   :  { %5255 = vmatprep.subr.bf16.mxu1 %v6124_v44  ;;  %v1772_v50 = vadd.f32 %v1768_v8, %v1743_v2 }
 0x4c5   :  { %v1792_v35 = vpop.permute.xlu1 %1791 }
 0x4c6   :  { %v1797_v57 = vmul.f32 %v4720_v32, %v1792_v35 }
 0x4c8   :  { %v1801_v45 = vadd.f32 %v1797_v57, %v1772_v50 }
 0x4ca   :  { %v1821_v9 = vpop.permute.xlu1 %1820 }
 0x4cb   :  { %v1826_v52 = vmul.f32 %v4724_v61, %v1821_v9 }
 0x4cd   :  { %v1830_v35 = vadd.f32 %v1826_v52, %v1801_v45 }
 0x4cf   :  { %v7625_v5 = vpop.permute.xlu1 %1849 }
 0x4d0   :  { %v1855_v47 = vmul.f32 %v4728_v51, %v7625_v5 }
 0x4d2   :  { %v1859_v9 = vadd.f32 %v1855_v47, %v1830_v35 }
 0x4d4   :  { %v7627_v11 = vpop.permute.xlu1 %1878 }
 0x4d5   :  { %v1884_v48 = vmul.f32 %v4732_v25, %v7627_v11  ;;  %v2304_v25 = vld [vmem:[%s8454_s5] sm:$0x1] }
 0x4d7   :  { %v1888_v5 = vadd.f32 %v1884_v48, %v1859_v9  ;;  %v5930_v9 = vld [vmem:[%s8453_s11] sm:$0xff]  }
 0x4d9   :  { %v7632_v19 = vpop.permute.xlu1 %1907 }
 0x4da   :  { %v1913_v46 = vmul.f32 %v4736_v62, %v7632_v19 }
 0x4dc   :  { %v1917_v11 = vadd.f32 %v1913_v46, %v1888_v5 }
 0x4de   :  { %v7645_v15 = vpop.permute.xlu1 %1936 }
 0x4df   :  { %v1942_v42 = vmul.f32 %v4740_v23, %v7645_v15  ;;  %v5929_v23 = vld [vmem:[%s8453_s11 + $0x8] sm:$0xff]  }
 0x4e0   :  { %5256 = vmatpush3.bf16.msra.mxu1 %v5929_v23 }
 0x4e1   :  { %v1946_v22 = vadd.f32 %v1942_v42, %v1917_v11  ;;  %5257 = vmatprep.subr.bf16.mxu1 %v6124_v44  ;;  %v5932_v42 = vld [vmem:[%s8455_s13 + $0x30] sm:$0xff]   ;;  %v5933_v11 = vld [vmem:[%s8455_s13 + $0x28] sm:$0xff]  }
 0x4e3   :  { %v1966_v28 = vpop.permute.xlu1 %1965 }
 0x4e4   :  { %v1971_v38 = vmul.f32 %v4744_v60, %v1966_v28  ;;  %v4764_v28 = vld [vmem:[%s8449_s4 + $0x558] sm:$0xff]  ;;  %5258 = vmatpush3.bf16.msra.mxu1 %v5930_v9 }
 0x4e5   :  { %5283 = vmatprep.subr.bf16.mxu1 %v6124_v44  ;;  %v5931_v60 = vld [vmem:[%s8455_s13 + $0x38] sm:$0xff]  }
 0x4e6   :  { %v1975_v21 = vadd.f32 %v1971_v38, %v1946_v22  ;;  %v5934_v38 = vld [vmem:[%s8455_s13 + $0x20] sm:$0xff]   ;;  %v5936_v22 = vld [vmem:[%s8455_s13 + $0x10] sm:$0xff]  }
 0x4e8   :  { %v1995_v55 = vpop.permute.xlu1 %1994 }
 0x4e9   :  { %v2000_v19 = vmul.f32 %v4748_v54, %v1995_v55 }
 0x4eb   :  { %v2004_v63 = vadd.f32 %v2000_v19, %v1975_v21  ;;  %v2311_v19 = vlaneseq  ;;  %v7802_v21 = vld [vmem:[%s8456_s8] sm:$0x7] }
 0x4ed   :  { %v2024_v59 = vpop.permute.xlu1 %2023 }
 0x4ee   :  { %v2029_v15 = vmul.f32 %v4752_v27, %v2024_v59  ;;  %v5935_v27 = vld [vmem:[%s8455_s13 + $0x18] sm:$0xff]  }
 0x4f0   :  { %v2033_v34 = vadd.f32 %v2029_v15, %v2004_v63 }
 0x4f2   :  { %v2053_v37 = vpop.permute.xlu1 %2052 }
 0x4f3   :  { %v2058_v41 = vmul.f32 %v4756_v49, %v2053_v37  ;;  %v7796_v49 = vshrl.u32 %v2311_v19, 7  ;;  %v2771_v19 = vld [vmem:[%s8457_s10] sm:$0x1] }
 0x4f5   :  { %v2062_v16 = vadd.f32 %v2058_v41, %v2033_v34 }
 0x4f7   :  { %v2082_v20 = vpop.permute.xlu1 %2081 }
 0x4f8   :  { %v2087_v29 = vmul.f32 %v4760_v6, %v2082_v20  ;;  %v2446_v6 = vld [vmem:[%s8457_s10] sm:$0x1] }
 0x4fa   :  { %v2091_v12 = vadd.f32 %v2087_v29, %v2062_v16 }
 0x4fc   :  { %v2111_v26 = vpop.permute.xlu1 %2110 }
 0x4fd   :  { %v2116_v1 = vmul.f32 %v4764_v28, %v2111_v26 }
 0x4ff   :  { %v2120_v17 = vadd.f32 %v2116_v1, %v2091_v12  ;;  %v5938_v12 = vld [vmem:[%s8455_s13] sm:$0xff]  }
 0x501   :  { %v2140_v14 = vpop.permute.xlu1 %2139 }
 0x502   :  { %v2145_v33 = vmul.f32 %v4768_v36, %v2140_v14 }
 0x504   :  { %v2149_v10 = vadd.f32 %v2145_v33, %v2120_v17  ;;  %v5939_v33 = vld [vmem:[%s8450_s9 + $0x38] sm:$0xff]   ;;  %v5942_v17 = vld [vmem:[%s8450_s9 + $0x20] sm:$0xff]  }
 0x506   :  { %v2169_v30 = vpop.permute.xlu1 %2168 }
 0x507   :  { %v2174_v59 = vmul.f32 %v4772_v0, %v2169_v30  ;;  %v2313_v30 = vsub.s32 0, %v7796_v49  ;;  %v5937_v0 = vld [vmem:[%s8455_s13 + $0x8] sm:$0xff]  }
 0x509   :  { %v2178_v58 = vadd.f32 %v2174_v59, %v2149_v10  ;;  %v2314_v15 = vrot.slane %v7802_v21, %v2313_v30  ;;  %v5943_v59 = vld [vmem:[%s8450_s9 + $0x18] sm:$0xff]   ;;  %v2317_v10 = vsub.s32 1, %v7796_v49 }
 0x50b   :  { %v2198_v55 = vpop.permute.xlu1 %2197 }
 0x50c   :  { %v2203_v39 = vmul.f32 %v4776_v56, %v2198_v55  ;;  %v5940_v56 = vld [vmem:[%s8450_s9 + $0x30] sm:$0xff]  }
 0x50e   :  { %v2207_v4 = vadd.f32 %v2203_v39, %v2178_v58  ;;  %v2318_v39 = vrot.slane %v7802_v21, %v2317_v10 }
 0x510   :  { %v2227_v13 = vpop.permute.xlu1 %2226 }
 0x511   :  { %v2232_v18 = vmul.f32 %v4780_v40, %v2227_v13  ;;  %v5941_v13 = vld [vmem:[%s8450_s9 + $0x28] sm:$0xff]   ;;  %v5944_v40 = vld [vmem:[%s8450_s9 + $0x10] sm:$0xff]  }
 0x513   :  { %v2236_v53 = vadd.f32 %v2232_v18, %v2207_v4 }
 0x515   :  { %v2256_v31 = vpop.permute.xlu1 %2255 }
 0x516   :  { %v2261_v37 = vmul.f32 %v4784_v24, %v2256_v31  ;;  %v2554_v24 = vld [vmem:[%s8458_s12] sm:$0x1] }
 0x518   :  { %v2265_v3 = vadd.f32 %v2261_v37, %v2236_v53 }
 0x51a   :  { %v2285_v32 = vpop.permute.xlu1 %2284 }
 0x51b   :  { %v2290_v8 = vmul.f32 %v4788_v7, %v2285_v32 }
 0x51d   :  { %v2294_v61 = vadd.f32 %v2290_v8, %v2265_v3  ;;  %v5945_v8 = vld [vmem:[%s8450_s9 + $0x8] sm:$0xff]  }
 0x51f   :  { %v2297_v2 = vadd.f32 %v7442_v43, %v2294_v61  ;;  %v5946_v61 = vld [vmem:[%s8450_s9] sm:$0xff]  }
 0x521   :  { %v2298_v57 = vrot.slane %v2297_v2, 4 }
 0x523   :  { %v2299_v20 = vadd.f32 %v2298_v57, %v2297_v2  ;;  %v5947_v2 = vld [vmem:[%s8453_s11 + $0x38] sm:$0xff]   ;;  %v5948_v57 = vld [vmem:[%s8453_s11 + $0x30] sm:$0xff]  }
 0x525   :  { %v2300_v51 = vrot.slane %v2299_v20, 2 }
 0x527   :  { %v2301_v50 = vadd.f32 %v2300_v51, %v2299_v20  ;;  %v5949_v20 = vld [vmem:[%s8453_s11 + $0x28] sm:$0xff]   ;;  %v5950_v51 = vld [vmem:[%s8453_s11 + $0x20] sm:$0xff]  }
 0x529   :  { %v2302_v52 = vrot.slane %v2301_v50, 1 }
 0x52b   :  { %v2303_v45 = vadd.f32 %v2302_v52, %v2301_v50  ;;  %v5951_v50 = vld [vmem:[%s8453_s11 + $0x18] sm:$0xff]   ;;  %v5952_v52 = vld [vmem:[%s8453_s11 + $0x10] sm:$0xff]  }
 0x52d   :  { %v2305_v47 = vadd.f32 %v2304_v25, %v2303_v45  ;;  %v2321_v25 = vsub.s32 2, %v7796_v49 }
 0x52f   :  { %v2429_v62 = vpack.c.bf16 %v2305_v47, %v2305_v47  ;;  %v2322_v45 = vrot.slane %v7802_v21, %v2321_v25  ;;  %v2662_v47 = vld [vmem:[%s8459_s14] sm:$0x1] }
 0x531   :  { %5240 = vmatmul.mubr.bf16.vlgmr.msra.gmra.mxu0 %v2429_v62 }
 0x532   :  { %5279 = vmatprep.mubr.msk.bf16.mxu0 %vm6125_vm4, %v6124_v44  ;;  %5264 = vmatpush3.bf16.msra.mxu0 %v5931_v60 }
 0x533   :  { %5265 = vmatprep.subr.bf16.mxu0 %v6124_v44 }
 0x536   :  { %5266 = vmatpush3.bf16.msra.mxu0 %v5932_v42  ;;  %v5953_v42 = vld [vmem:[%s8453_s11 + $0x8] sm:$0xff]  }
 0x537   :  { %5267 = vmatprep.subr.bf16.mxu0 %v6124_v44 }
 0x53a   :  { %5268 = vmatpush3.bf16.msra.mxu0 %v5933_v11  ;;  %v5957_v11 = vld [vmem:[%s8455_s13 + $0x28] sm:$0xff]  }
 0x53b   :  { %5269 = vmatprep.subr.bf16.mxu0 %v6124_v44 }
 0x53e   :  { %5270 = vmatpush3.bf16.msra.mxu0 %v5934_v38  ;;  %v5958_v38 = vld [vmem:[%s8455_s13 + $0x20] sm:$0xff]  }
 0x53f   :  { %5271 = vmatprep.subr.bf16.mxu0 %v6124_v44 }
 0x542   :  { %5272 = vmatpush3.bf16.msra.mxu0 %v5935_v27  ;;  %v5959_v27 = vld [vmem:[%s8455_s13 + $0x18] sm:$0xff]  }
 0x543   :  { %5273 = vmatprep.subr.bf16.mxu0 %v6124_v44 }
 0x546   :  { %5274 = vmatpush3.bf16.msra.mxu0 %v5936_v22  ;;  %v5960_v22 = vld [vmem:[%s8455_s13 + $0x10] sm:$0xff]  }
 0x547   :  { %5275 = vmatprep.subr.bf16.mxu0 %v6124_v44 }
 0x54a   :  { %5276 = vmatpush3.bf16.msra.mxu0 %v5937_v0  ;;  %v5965_v0 = vld [vmem:[%s8450_s9 + $0x28] sm:$0xff]  }
 0x54b   :  { %5277 = vmatprep.subr.bf16.mxu0 %v6124_v44 }
 0x54e   :  { %5278 = vmatpush3.bf16.msra.mxu0 %v5938_v12  ;;  %v5966_v12 = vld [vmem:[%s8450_s9 + $0x20] sm:$0xff]  }
 0x54f   :  { %5303 = vmatprep.subr.bf16.mxu0 %v6124_v44 }
 0x565   :  { %v2382_v26 = vpop.f32.mrf.mxu1 }
 0x566   :  { %v7808_v63 = vadd.f32 %v2382_v26, %v2314_v15 }
 0x567   :  { %v7760_v35 = vpop.f32.mrf.mxu1 }
 0x568   :  { %v7851_v18 = vadd.f32 %v7760_v35, %v2318_v39  ;;  %v2861_v21 = vrot.slane %v7808_v63, 1 }
 0x569   :  { %v2386_v43 = vpop.f32.mrf.mxu1 }
 0x56b   :  { %v2387_v48 = vpop.f32.mrf.mxu1 }
 0x56d   :  { %v7770_v46 = vpop.f32.mrf.mxu1 }
 0x56e   :  { %v7894_v26 = vadd.f32 %v7770_v46, %v2322_v45  ;;  %v5954_v46 = vld [vmem:[%s8453_s11] sm:$0xff]  }
 0x56f   :  { %v5221_v5 = vpop.f32.mrf.mxu1 }
 0x571   :  { %v2426_v14 = vpop.f32.mrf.mxu1 }
 0x572   :  { %v5955_v14 = vld [vmem:[%s8455_s13 + $0x38] sm:$0xff]  }
 0x573   :  { %v5222_v54 = vpop.f32.mrf.mxu1 }
 0x574   :  { %v5956_v54 = vld [vmem:[%s8455_s13 + $0x30] sm:$0xff]  }
 0x5f1   :  { %v2529_v41 = vpop.f32.mrf.mxu0 }
 0x5f2   :  { %v2530_v28 = vadd.f32 %v2529_v41, %v2446_v6 }
 0x5f3   :  { %v5241_v34 = vpop.f32.mrf.mxu0 }
 0x5f4   :  { %v2535_v29 = vadd.f32 %v2530_v28, %v7808_v63 }
 0x5f5   :  { %v2532_v55 = vpop.f32.mrf.mxu0 }
 0x5f6   :  { %v2536_v36 = vmax.f32 %v2535_v29, 0.0  ;;  %v5961_v55 = vld [vmem:[%s8455_s13 + $0x8] sm:$0xff]  }
 0x5f7   :  { %v5242_v16 = vpop.f32.mrf.mxu0 }
 0x5f8   :  { %v2537_v1 = vpack.c.bf16 %v2536_v36, %v2536_v36  ;;  %v5962_v36 = vld [vmem:[%s8455_s13] sm:$0xff]   ;;  %v5963_v16 = vld [vmem:[%s8450_s9 + $0x38] sm:$0xff]  }
 0x5fa   :  { %5260 = vmatmul.mubr.bf16.vlgmr.msra.gmra.mxu1 %v2537_v1  ;;  %v5964_v1 = vld [vmem:[%s8450_s9 + $0x30] sm:$0xff]  }
 0x5fb   :  { %5299 = vmatprep.mubr.msk.bf16.mxu1 %vm6125_vm4, %v6124_v44  ;;  %5284 = vmatpush3.bf16.msra.mxu1 %v5939_v33  ;;  %v5967_v33 = vld [vmem:[%s8450_s9 + $0x18] sm:$0xff]  }
 0x5fc   :  { %5285 = vmatprep.subr.bf16.mxu1 %v6124_v44 }
 0x5ff   :  { %5286 = vmatpush3.bf16.msra.mxu1 %v5940_v56  ;;  %v5968_v56 = vld [vmem:[%s8450_s9 + $0x10] sm:$0xff]  }
 0x600   :  { %5287 = vmatprep.subr.bf16.mxu1 %v6124_v44 }
 0x603   :  { %5288 = vmatpush3.bf16.msra.mxu1 %v5941_v13  ;;  %v2882_v13 = vld [vmem:[%s8458_s12] sm:$0x1] }
 0x604   :  { %5289 = vmatprep.subr.bf16.mxu1 %v6124_v44 }
 0x607   :  { %5290 = vmatpush3.bf16.msra.mxu1 %v5942_v17 }
 0x608   :  { %5291 = vmatprep.subr.bf16.mxu1 %v6124_v44 }
 0x60b   :  { %5292 = vmatpush3.bf16.msra.mxu1 %v5943_v59 }
 0x60c   :  { %5293 = vmatprep.subr.bf16.mxu1 %v6124_v44 }
 0x60f   :  { %5294 = vmatpush3.bf16.msra.mxu1 %v5944_v40  ;;  %v2972_v40 = vrot.slane %v7851_v18, 1 }
 0x610   :  { %5295 = vmatprep.subr.bf16.mxu1 %v6124_v44 }
 0x613   :  { %5296 = vmatpush3.bf16.msra.mxu1 %v5945_v8  ;;  %v5974_v8 = vld [vmem:[%s8453_s11 + $0x20] sm:$0xff]  }
 0x614   :  { %5297 = vmatprep.subr.bf16.mxu1 %v6124_v44 }
 0x617   :  { %5298 = vmatpush3.bf16.msra.mxu1 %v5946_v61  ;;  %v5975_v61 = vld [vmem:[%s8453_s11 + $0x18] sm:$0xff]  }
 0x618   :  { %5323 = vmatprep.subr.bf16.mxu1 %v6124_v44 }
 0x6ba   :  { %v2637_v58 = vpop.f32.mrf.mxu1 }
 0x6bb   :  { %v2638_v31 = vadd.f32 %v2637_v58, %v2554_v24 }
 0x6bc   :  { %v5261_v4 = vpop.f32.mrf.mxu1 }
 0x6bd   :  { %v2643_v37 = vadd.f32 %v2638_v31, %v7851_v18 }
 0x6be   :  { %v2640_v7 = vpop.f32.mrf.mxu1 }
 0x6bf   :  { %v2644_v53 = vmax.f32 %v2643_v37, 0.0  ;;  %v5969_v37 = vld [vmem:[%s8450_s9 + $0x8] sm:$0xff]   ;;  %v5970_v7 = vld [vmem:[%s8450_s9] sm:$0xff]  }
 0x6c0   :  { %v5262_v32 = vpop.f32.mrf.mxu1 }
 0x6c1   :  { %v2645_v3 = vpack.c.bf16 %v2644_v53, %v2644_v53  ;;  %v5971_v53 = vld [vmem:[%s8453_s11 + $0x38] sm:$0xff]   ;;  %v5972_v32 = vld [vmem:[%s8453_s11 + $0x30] sm:$0xff]  }
 0x6c3   :  { %5280 = vmatmul.mubr.bf16.vlgmr.msra.gmra.mxu0 %v2645_v3  ;;  %v5973_v3 = vld [vmem:[%s8453_s11 + $0x28] sm:$0xff]  }
 0x6c4   :  { %5319 = vmatprep.mubr.msk.bf16.mxu0 %vm6125_vm4, %v6124_v44  ;;  %5304 = vmatpush3.bf16.msra.mxu0 %v5947_v2  ;;  %v5976_v2 = vld [vmem:[%s8453_s11 + $0x10] sm:$0xff]  }
 0x6c5   :  { %5305 = vmatprep.subr.bf16.mxu0 %v6124_v44 }
 0x6c8   :  { %5306 = vmatpush3.bf16.msra.mxu0 %v5948_v57  ;;  %v2993_v57 = vld [vmem:[%s8459_s14] sm:$0x1] }
 0x6c9   :  { %5307 = vmatprep.subr.bf16.mxu0 %v6124_v44 }
 0x6cc   :  { %5308 = vmatpush3.bf16.msra.mxu0 %v5949_v20 }
 0x6cd   :  { %5309 = vmatprep.subr.bf16.mxu0 %v6124_v44 }
 0x6d0   :  { %5310 = vmatpush3.bf16.msra.mxu0 %v5950_v51 }
 0x6d1   :  { %5311 = vmatprep.subr.bf16.mxu0 %v6124_v44 }
 0x6d4   :  { %5312 = vmatpush3.bf16.msra.mxu0 %v5951_v50  ;;  %v3083_v50 = vrot.slane %v7894_v26, 1 }
 0x6d5   :  { %5313 = vmatprep.subr.bf16.mxu0 %v6124_v44 }
 0x6d8   :  { %5314 = vmatpush3.bf16.msra.mxu0 %v5952_v52 }
 0x6d9   :  { %5315 = vmatprep.subr.bf16.mxu0 %v6124_v44 }
 0x6dc   :  { %5316 = vmatpush3.bf16.msra.mxu0 %v5953_v42  ;;  %v5983_v42 = vld [vmem:[%s8455_s13 + $0x18] sm:$0xff]  }
 0x6dd   :  { %5317 = vmatprep.subr.bf16.mxu0 %v6124_v44 }
 0x6e0   :  { %5318 = vmatpush3.bf16.msra.mxu0 %v5954_v46  ;;  %v5984_v46 = vld [vmem:[%s8455_s13 + $0x10] sm:$0xff]  }
 0x6e1   :  { %5343 = vmatprep.subr.bf16.mxu0 %v6124_v44 }
 0x783   :  { %v2745_v62 = vpop.f32.mrf.mxu0 }
 0x784   :  { %v2746_v35 = vadd.f32 %v2745_v62, %v2662_v47 }
 0x785   :  { %v5281_v43 = vpop.f32.mrf.mxu0 }
 0x786   :  { %v2751_v48 = vadd.f32 %v2746_v35, %v7894_v26  ;;  %v5977_v43 = vld [vmem:[%s8453_s11 + $0x8] sm:$0xff]  }
 0x787   :  { %v2748_v23 = vpop.f32.mrf.mxu0 }
 0x788   :  { %v2752_v9 = vmax.f32 %v2751_v48, 0.0  ;;  %v5978_v48 = vld [vmem:[%s8453_s11] sm:$0xff]   ;;  %v5979_v23 = vld [vmem:[%s8455_s13 + $0x38] sm:$0xff]  }
 0x789   :  { %v5282_v60 = vpop.f32.mrf.mxu0 }
 0x78a   :  { %2753 = vst [vmem:[#allocation2] sm:$0x1] %v2752_v9  ;;  %v2754_v5 = vpack.c.bf16 %v2752_v9, %v2752_v9  ;;  %v5980_v9 = vld [vmem:[%s8455_s13 + $0x30] sm:$0xff]   ;;  %v5981_v60 = vld [vmem:[%s8455_s13 + $0x28] sm:$0xff]  }
 0x78c   :  { %5300 = vmatmul.mubr.bf16.vlgmr.msra.gmra.mxu1 %v2754_v5  ;;  %v5982_v5 = vld [vmem:[%s8455_s13 + $0x20] sm:$0xff]  }
 0x78d   :  { %5339 = vmatprep.mubr.msk.bf16.mxu1 %vm6125_vm4, %v6124_v44  ;;  %5324 = vmatpush3.bf16.msra.mxu1 %v5955_v14  ;;  %v3105_v14 = vld [vmem:[%s8457_s10] sm:$0x1] }
 0x78e   :  { %5325 = vmatprep.subr.bf16.mxu1 %v6124_v44 }
 0x791   :  { %5326 = vmatpush3.bf16.msra.mxu1 %v5956_v54 }
 0x792   :  { %5327 = vmatprep.subr.bf16.mxu1 %v6124_v44 }
 0x795   :  { %5328 = vmatpush3.bf16.msra.mxu1 %v5957_v11 }
 0x796   :  { %5329 = vmatprep.subr.bf16.mxu1 %v6124_v44 }
 0x799   :  { %5330 = vmatpush3.bf16.msra.mxu1 %v5958_v38  ;;  %v3194_v38 = vrot.slane %v7808_v63, 2 }
 0x79a   :  { %5331 = vmatprep.subr.bf16.mxu1 %v6124_v44 }
 0x79d   :  { %5332 = vmatpush3.bf16.msra.mxu1 %v5959_v27 }
 0x79e   :  { %5333 = vmatprep.subr.bf16.mxu1 %v6124_v44 }
 0x7a1   :  { %5334 = vmatpush3.bf16.msra.mxu1 %v5960_v22 }
 0x7a2   :  { %5335 = vmatprep.subr.bf16.mxu1 %v6124_v44 }
 0x7a5   :  { %5336 = vmatpush3.bf16.msra.mxu1 %v5961_v55  ;;  %v5991_v55 = vld [vmem:[%s8450_s9 + $0x18] sm:$0xff]  }
 0x7a6   :  { %5337 = vmatprep.subr.bf16.mxu1 %v6124_v44 }
 0x7a9   :  { %5338 = vmatpush3.bf16.msra.mxu1 %v5962_v36  ;;  %v5992_v36 = vld [vmem:[%s8450_s9 + $0x10] sm:$0xff]  }
 0x7aa   :  { %5363 = vmatprep.subr.bf16.mxu1 %v6124_v44 }
 0x84c   :  { %v2854_v49 = vpop.f32.mrf.mxu1 }
 0x84d   :  { %v2855_v30 = vadd.f32 %v2854_v49, %v2771_v19 }
 0x84e   :  { %v5301_v15 = vpop.f32.mrf.mxu1 }
 0x84f   :  { %v2863_v6 = vadd.f32 %v2861_v21, %v2855_v30  ;;  %v5985_v15 = vld [vmem:[%s8455_s13 + $0x8] sm:$0xff]  }
 0x850   :  { %v2857_v41 = vpop.f32.mrf.mxu1 }
 0x851   :  { %v2864_v28 = vmax.f32 %v2863_v6, 0.0  ;;  %v5986_v6 = vld [vmem:[%s8455_s13] sm:$0xff]   ;;  %v5987_v41 = vld [vmem:[%s8450_s9 + $0x38] sm:$0xff]  }
 0x852   :  { %v5302_v34 = vpop.f32.mrf.mxu1 }
 0x853   :  { %v2865_v29 = vpack.c.bf16 %v2864_v28, %v2864_v28  ;;  %v5988_v28 = vld [vmem:[%s8450_s9 + $0x30] sm:$0xff]   ;;  %v5989_v34 = vld [vmem:[%s8450_s9 + $0x28] sm:$0xff]  }
 0x855   :  { %5320 = vmatmul.mubr.bf16.vlgmr.msra.gmra.mxu0 %v2865_v29  ;;  %v5990_v29 = vld [vmem:[%s8450_s9 + $0x20] sm:$0xff]  }
 0x856   :  { %5359 = vmatprep.mubr.msk.bf16.mxu0 %vm6125_vm4, %v6124_v44  ;;  %5344 = vmatpush3.bf16.msra.mxu0 %v5963_v16  ;;  %v3215_v16 = vld [vmem:[%s8458_s12] sm:$0x1] }
 0x857   :  { %5345 = vmatprep.subr.bf16.mxu0 %v6124_v44 }
 0x85a   :  { %5346 = vmatpush3.bf16.msra.mxu0 %v5964_v1 }
 0x85b   :  { %5347 = vmatprep.subr.bf16.mxu0 %v6124_v44 }
 0x85e   :  { %5348 = vmatpush3.bf16.msra.mxu0 %v5965_v0 }
 0x85f   :  { %5349 = vmatprep.subr.bf16.mxu0 %v6124_v44 }
 0x862   :  { %5350 = vmatpush3.bf16.msra.mxu0 %v5966_v12  ;;  %v3304_v12 = vrot.slane %v7851_v18, 2 }
 0x863   :  { %5351 = vmatprep.subr.bf16.mxu0 %v6124_v44 }
 0x866   :  { %5352 = vmatpush3.bf16.msra.mxu0 %v5967_v33 }
 0x867   :  { %5353 = vmatprep.subr.bf16.mxu0 %v6124_v44 }
 0x86a   :  { %5354 = vmatpush3.bf16.msra.mxu0 %v5968_v56 }
 0x86b   :  { %5355 = vmatprep.subr.bf16.mxu0 %v6124_v44 }
 0x86e   :  { %5356 = vmatpush3.bf16.msra.mxu0 %v5969_v37  ;;  %v5999_v37 = vld [vmem:[%s8453_s11 + $0x18] sm:$0xff]  }
 0x86f   :  { %5357 = vmatprep.subr.bf16.mxu0 %v6124_v44 }
 0x872   :  { %5358 = vmatpush3.bf16.msra.mxu0 %v5970_v7  ;;  %v6000_v7 = vld [vmem:[%s8453_s11 + $0x10] sm:$0xff]  }
 0x873   :  { %5383 = vmatprep.subr.bf16.mxu0 %v6124_v44 }
 0x915   :  { %v2965_v17 = vpop.f32.mrf.mxu0 }
 0x916   :  { %v2966_v59 = vadd.f32 %v2965_v17, %v2882_v13 }
 0x917   :  { %v5321_v10 = vpop.f32.mrf.mxu0 }
 0x918   :  { %v2974_v39 = vadd.f32 %v2972_v40, %v2966_v59  ;;  %v5993_v10 = vld [vmem:[%s8450_s9 + $0x8] sm:$0xff]  }
 0x919   :  { %v2968_v24 = vpop.f32.mrf.mxu0 }
 0x91a   :  { %v2975_v58 = vmax.f32 %v2974_v39, 0.0  ;;  %v5994_v39 = vld [vmem:[%s8450_s9] sm:$0xff]   ;;  %v5995_v24 = vld [vmem:[%s8453_s11 + $0x38] sm:$0xff]  }
 0x91b   :  { %v5322_v31 = vpop.f32.mrf.mxu0 }
 0x91c   :  { %v2976_v4 = vpack.c.bf16 %v2975_v58, %v2975_v58  ;;  %v5996_v58 = vld [vmem:[%s8453_s11 + $0x30] sm:$0xff]   ;;  %v5997_v31 = vld [vmem:[%s8453_s11 + $0x28] sm:$0xff]  }
 0x91e   :  { %5340 = vmatmul.mubr.bf16.vlgmr.msra.gmra.mxu1 %v2976_v4  ;;  %v5998_v4 = vld [vmem:[%s8453_s11 + $0x20] sm:$0xff]  }
 0x91f   :  { %5379 = vmatprep.mubr.msk.bf16.mxu1 %vm6125_vm4, %v6124_v44  ;;  %5364 = vmatpush3.bf16.msra.mxu1 %v5971_v53  ;;  %v3325_v53 = vld [vmem:[%s8459_s14] sm:$0x1] }
 0x920   :  { %5365 = vmatprep.subr.bf16.mxu1 %v6124_v44 }
 0x923   :  { %5366 = vmatpush3.bf16.msra.mxu1 %v5972_v32 }
 0x924   :  { %5367 = vmatprep.subr.bf16.mxu1 %v6124_v44 }
 0x927   :  { %5368 = vmatpush3.bf16.msra.mxu1 %v5973_v3 }
 0x928   :  { %5369 = vmatprep.subr.bf16.mxu1 %v6124_v44 }
 0x92b   :  { %5370 = vmatpush3.bf16.msra.mxu1 %v5974_v8  ;;  %v3414_v8 = vrot.slane %v7894_v26, 2 }
 0x92c   :  { %5371 = vmatprep.subr.bf16.mxu1 %v6124_v44 }
 0x92f   :  { %5372 = vmatpush3.bf16.msra.mxu1 %v5975_v61 }
 0x930   :  { %5373 = vmatprep.subr.bf16.mxu1 %v6124_v44 }
 0x933   :  { %5374 = vmatpush3.bf16.msra.mxu1 %v5976_v2 }
 0x934   :  { %5375 = vmatprep.subr.bf16.mxu1 %v6124_v44 }
 0x937   :  { %5376 = vmatpush3.bf16.msra.mxu1 %v5977_v43  ;;  %v6007_v43 = vld [vmem:[%s8455_s13 + $0x18] sm:$0xff]  }
 0x938   :  { %5377 = vmatprep.subr.bf16.mxu1 %v6124_v44 }
 0x93b   :  { %5378 = vmatpush3.bf16.msra.mxu1 %v5978_v48  ;;  %v6008_v48 = vld [vmem:[%s8455_s13 + $0x10] sm:$0xff]  }
 0x93c   :  { %5403 = vmatprep.subr.bf16.mxu1 %v6124_v44 }
 0x9de   :  { %v3076_v20 = vpop.f32.mrf.mxu1 }
 0x9df   :  { %v3077_v51 = vadd.f32 %v3076_v20, %v2993_v57 }
 0x9e0   :  { %v5341_v52 = vpop.f32.mrf.mxu1 }
 0x9e1   :  { %v3085_v25 = vadd.f32 %v3083_v50, %v3077_v51  ;;  %v6001_v52 = vld [vmem:[%s8453_s11 + $0x8] sm:$0xff]  }
 0x9e2   :  { %v3079_v45 = vpop.f32.mrf.mxu1 }
 0x9e3   :  { %v3086_v47 = vmax.f32 %v3085_v25, 0.0  ;;  %v6002_v25 = vld [vmem:[%s8453_s11] sm:$0xff]   ;;  %v6003_v45 = vld [vmem:[%s8455_s13 + $0x38] sm:$0xff]  }
 0x9e4   :  { %v5342_v62 = vpop.f32.mrf.mxu1 }
 0x9e5   :  { %3087 = vst [vmem:[#allocation2 + $0x1] sm:$0x1] %v3086_v47  ;;  %v3088_v35 = vpack.c.bf16 %v3086_v47, %v3086_v47  ;;  %v6004_v47 = vld [vmem:[%s8455_s13 + $0x30] sm:$0xff]   ;;  %v6005_v62 = vld [vmem:[%s8455_s13 + $0x28] sm:$0xff]  }
 0x9e7   :  { %5360 = vmatmul.mubr.bf16.vlgmr.msra.gmra.mxu0 %v3088_v35  ;;  %v6006_v35 = vld [vmem:[%s8455_s13 + $0x20] sm:$0xff]  }
 0x9e8   :  { %5399 = vmatprep.mubr.msk.bf16.mxu0 %vm6125_vm4, %v6124_v44  ;;  %5384 = vmatpush3.bf16.msra.mxu0 %v5979_v23  ;;  %v3436_v23 = vld [vmem:[%s8457_s10] sm:$0x1] }
 0x9e9   :  { %5385 = vmatprep.subr.bf16.mxu0 %v6124_v44 }
 0x9ec   :  { %5386 = vmatpush3.bf16.msra.mxu0 %v5980_v9 }
 0x9ed   :  { %5387 = vmatprep.subr.bf16.mxu0 %v6124_v44 }
 0x9f0   :  { %5388 = vmatpush3.bf16.msra.mxu0 %v5981_v60 }
 0x9f1   :  { %5389 = vmatprep.subr.bf16.mxu0 %v6124_v44 }
 0x9f4   :  { %5390 = vmatpush3.bf16.msra.mxu0 %v5982_v5  ;;  %v3525_v5 = vrot.slane %v7808_v63, 3 }
 0x9f5   :  { %5391 = vmatprep.subr.bf16.mxu0 %v6124_v44 }
 0x9f8   :  { %5392 = vmatpush3.bf16.msra.mxu0 %v5983_v42 }
 0x9f9   :  { %5393 = vmatprep.subr.bf16.mxu0 %v6124_v44 }
 0x9fc   :  { %5394 = vmatpush3.bf16.msra.mxu0 %v5984_v46 }
 0x9fd   :  { %5395 = vmatprep.subr.bf16.mxu0 %v6124_v44 }
 0xa00   :  { %5396 = vmatpush3.bf16.msra.mxu0 %v5985_v15  ;;  %v6015_v15 = vld [vmem:[%s8450_s9 + $0x18] sm:$0xff]  }
 0xa01   :  { %5397 = vmatprep.subr.bf16.mxu0 %v6124_v44 }
 0xa04   :  { %5398 = vmatpush3.bf16.msra.mxu0 %v5986_v6  ;;  %v6016_v6 = vld [vmem:[%s8450_s9 + $0x10] sm:$0xff]  }
 0xa05   :  { %5423 = vmatprep.subr.bf16.mxu0 %v6124_v44 }
 0xaa7   :  { %v3188_v54 = vpop.f32.mrf.mxu0 }
 0xaa8   :  { %v3189_v11 = vadd.f32 %v3188_v54, %v3105_v14 }
 0xaa9   :  { %v5361_v27 = vpop.f32.mrf.mxu0 }
 0xaaa   :  { %v3196_v22 = vadd.f32 %v3194_v38, %v3189_v11  ;;  %v6009_v27 = vld [vmem:[%s8455_s13 + $0x8] sm:$0xff]  }
 0xaab   :  { %v3191_v19 = vpop.f32.mrf.mxu0 }
 0xaac   :  { %v3197_v49 = vmax.f32 %v3196_v22, 0.0  ;;  %v6010_v22 = vld [vmem:[%s8455_s13] sm:$0xff]   ;;  %v6011_v19 = vld [vmem:[%s8450_s9 + $0x38] sm:$0xff]  }
 0xaad   :  { %v5362_v30 = vpop.f32.mrf.mxu0 }
 0xaae   :  { %v3198_v21 = vpack.c.bf16 %v3197_v49, %v3197_v49  ;;  %v6012_v49 = vld [vmem:[%s8450_s9 + $0x30] sm:$0xff]   ;;  %v6013_v30 = vld [vmem:[%s8450_s9 + $0x28] sm:$0xff]  }
 0xab0   :  { %5380 = vmatmul.mubr.bf16.vlgmr.msra.gmra.mxu1 %v3198_v21  ;;  %v6014_v21 = vld [vmem:[%s8450_s9 + $0x20] sm:$0xff]  }
 0xab1   :  { %5419 = vmatprep.mubr.msk.bf16.mxu1 %vm6125_vm4, %v6124_v44  ;;  %5404 = vmatpush3.bf16.msra.mxu1 %v5987_v41  ;;  %v3546_v41 = vld [vmem:[%s8458_s12] sm:$0x1] }
 0xab2   :  { %5405 = vmatprep.subr.bf16.mxu1 %v6124_v44 }
 0xab5   :  { %5406 = vmatpush3.bf16.msra.mxu1 %v5988_v28 }
 0xab6   :  { %5407 = vmatprep.subr.bf16.mxu1 %v6124_v44 }
 0xab9   :  { %5408 = vmatpush3.bf16.msra.mxu1 %v5989_v34 }
 0xaba   :  { %5409 = vmatprep.subr.bf16.mxu1 %v6124_v44 }
 0xabd   :  { %5410 = vmatpush3.bf16.msra.mxu1 %v5990_v29  ;;  %v3635_v29 = vrot.slane %v7851_v18, 3 }
 0xabe   :  { %5411 = vmatprep.subr.bf16.mxu1 %v6124_v44 }
 0xac1   :  { %5412 = vmatpush3.bf16.msra.mxu1 %v5991_v55 }
 0xac2   :  { %5413 = vmatprep.subr.bf16.mxu1 %v6124_v44 }
 0xac5   :  { %5414 = vmatpush3.bf16.msra.mxu1 %v5992_v36 }
 0xac6   :  { %5415 = vmatprep.subr.bf16.mxu1 %v6124_v44 }
 0xac9   :  { %5416 = vmatpush3.bf16.msra.mxu1 %v5993_v10  ;;  %v6023_v10 = vld [vmem:[%s8453_s11 + $0x18] sm:$0xff]  }
 0xaca   :  { %5417 = vmatprep.subr.bf16.mxu1 %v6124_v44 }
 0xacd   :  { %5418 = vmatpush3.bf16.msra.mxu1 %v5994_v39  ;;  %v6024_v39 = vld [vmem:[%s8453_s11 + $0x10] sm:$0xff]  }
 0xace   :  { %5443 = vmatprep.subr.bf16.mxu1 %v6124_v44 }
 0xb70   :  { %v3298_v1 = vpop.f32.mrf.mxu1 }
 0xb71   :  { %v3299_v0 = vadd.f32 %v3298_v1, %v3215_v16 }
 0xb72   :  { %v5381_v33 = vpop.f32.mrf.mxu1 }
 0xb73   :  { %v3306_v56 = vadd.f32 %v3304_v12, %v3299_v0  ;;  %v6017_v33 = vld [vmem:[%s8450_s9 + $0x8] sm:$0xff]  }
 0xb74   :  { %v3301_v13 = vpop.f32.mrf.mxu1 }
 0xb75   :  { %v3307_v17 = vmax.f32 %v3306_v56, 0.0  ;;  %v6018_v56 = vld [vmem:[%s8450_s9] sm:$0xff]   ;;  %v6019_v13 = vld [vmem:[%s8453_s11 + $0x38] sm:$0xff]  }
 0xb76   :  { %v5382_v59 = vpop.f32.mrf.mxu1 }
 0xb77   :  { %v3308_v40 = vpack.c.bf16 %v3307_v17, %v3307_v17  ;;  %v6020_v17 = vld [vmem:[%s8453_s11 + $0x30] sm:$0xff]   ;;  %v6021_v59 = vld [vmem:[%s8453_s11 + $0x28] sm:$0xff]  }
 0xb79   :  { %5400 = vmatmul.mubr.bf16.vlgmr.msra.gmra.mxu0 %v3308_v40  ;;  %v6022_v40 = vld [vmem:[%s8453_s11 + $0x20] sm:$0xff]  }
 0xb7a   :  { %5439 = vmatprep.mubr.msk.bf16.mxu0 %vm6125_vm4, %v6124_v44  ;;  %5424 = vmatpush3.bf16.msra.mxu0 %v5995_v24  ;;  %v3656_v24 = vld [vmem:[%s8459_s14] sm:$0x1] }
 0xb7b   :  { %5425 = vmatprep.subr.bf16.mxu0 %v6124_v44 }
 0xb7e   :  { %5426 = vmatpush3.bf16.msra.mxu0 %v5996_v58 }
 0xb7f   :  { %5427 = vmatprep.subr.bf16.mxu0 %v6124_v44 }
 0xb82   :  { %5428 = vmatpush3.bf16.msra.mxu0 %v5997_v31 }
 0xb83   :  { %5429 = vmatprep.subr.bf16.mxu0 %v6124_v44 }
 0xb86   :  { %5430 = vmatpush3.bf16.msra.mxu0 %v5998_v4  ;;  %v3745_v4 = vrot.slane %v7894_v26, 3 }
 0xb87   :  { %5431 = vmatprep.subr.bf16.mxu0 %v6124_v44 }
 0xb8a   :  { %5432 = vmatpush3.bf16.msra.mxu0 %v5999_v37 }
 0xb8b   :  { %5433 = vmatprep.subr.bf16.mxu0 %v6124_v44 }
 0xb8e   :  { %5434 = vmatpush3.bf16.msra.mxu0 %v6000_v7 }
 0xb8f   :  { %5435 = vmatprep.subr.bf16.mxu0 %v6124_v44 }
 0xb92   :  { %5436 = vmatpush3.bf16.msra.mxu0 %v6001_v52  ;;  %v6031_v52 = vld [vmem:[%s8455_s13 + $0x18] sm:$0xff]  }
 0xb93   :  { %5437 = vmatprep.subr.bf16.mxu0 %v6124_v44 }
 0xb96   :  { %5438 = vmatpush3.bf16.msra.mxu0 %v6002_v25  ;;  %v6032_v25 = vld [vmem:[%s8455_s13 + $0x10] sm:$0xff]  }
 0xb97   :  { %5463 = vmatprep.subr.bf16.mxu0 %v6124_v44 }
 0xc39   :  { %v3408_v32 = vpop.f32.mrf.mxu0 }
 0xc3a   :  { %v3409_v3 = vadd.f32 %v3408_v32, %v3325_v53 }
 0xc3b   :  { %v5401_v61 = vpop.f32.mrf.mxu0 }
 0xc3c   :  { %v3416_v2 = vadd.f32 %v3414_v8, %v3409_v3  ;;  %v6025_v61 = vld [vmem:[%s8453_s11 + $0x8] sm:$0xff]  }
 0xc3d   :  { %v3411_v57 = vpop.f32.mrf.mxu0 }
 0xc3e   :  { %v3417_v20 = vmax.f32 %v3416_v2, 0.0  ;;  %v6026_v2 = vld [vmem:[%s8453_s11] sm:$0xff]   ;;  %v6027_v57 = vld [vmem:[%s8455_s13 + $0x38] sm:$0xff]  }
 0xc3f   :  { %v5402_v51 = vpop.f32.mrf.mxu0 }
 0xc40   :  { %3418 = vst [vmem:[#allocation2 + $0x2] sm:$0x1] %v3417_v20  ;;  %v3419_v50 = vpack.c.bf16 %v3417_v20, %v3417_v20  ;;  %v6028_v20 = vld [vmem:[%s8455_s13 + $0x30] sm:$0xff]   ;;  %v6029_v51 = vld [vmem:[%s8455_s13 + $0x28] sm:$0xff]  }
 0xc42   :  { %5420 = vmatmul.mubr.bf16.vlgmr.msra.gmra.mxu1 %v3419_v50  ;;  %v6030_v50 = vld [vmem:[%s8455_s13 + $0x20] sm:$0xff]  }
 0xc43   :  { %5459 = vmatprep.mubr.msk.bf16.mxu1 %vm6125_vm4, %v6124_v44  ;;  %5444 = vmatpush3.bf16.msra.mxu1 %v6003_v45  ;;  %v3767_v45 = vld [vmem:[%s8457_s10] sm:$0x1] }
 0xc44   :  { %5445 = vmatprep.subr.bf16.mxu1 %v6124_v44 }
 0xc47   :  { %5446 = vmatpush3.bf16.msra.mxu1 %v6004_v47 }
 0xc48   :  { %5447 = vmatprep.subr.bf16.mxu1 %v6124_v44 }
 0xc4b   :  { %5448 = vmatpush3.bf16.msra.mxu1 %v6005_v62 }
 0xc4c   :  { %5449 = vmatprep.subr.bf16.mxu1 %v6124_v44 }
 0xc4f   :  { %5450 = vmatpush3.bf16.msra.mxu1 %v6006_v35  ;;  %v3856_v35 = vrot.slane %v7808_v63, 4 }
 0xc50   :  { %5451 = vmatprep.subr.bf16.mxu1 %v6124_v44 }
 0xc53   :  { %5452 = vmatpush3.bf16.msra.mxu1 %v6007_v43 }
 0xc54   :  { %5453 = vmatprep.subr.bf16.mxu1 %v6124_v44 }
 0xc57   :  { %5454 = vmatpush3.bf16.msra.mxu1 %v6008_v48 }
 0xc58   :  { %5455 = vmatprep.subr.bf16.mxu1 %v6124_v44 }
 0xc5b   :  { %5456 = vmatpush3.bf16.msra.mxu1 %v6009_v27  ;;  %v6039_v27 = vld [vmem:[%s8450_s9 + $0x18] sm:$0xff]  }
 0xc5c   :  { %5457 = vmatprep.subr.bf16.mxu1 %v6124_v44 }
 0xc5f   :  { %5458 = vmatpush3.bf16.msra.mxu1 %v6010_v22  ;;  %v6040_v22 = vld [vmem:[%s8450_s9 + $0x10] sm:$0xff]  }
 0xc60   :  { %5483 = vmatprep.subr.bf16.mxu1 %v6124_v44 }
 0xd02   :  { %v3519_v9 = vpop.f32.mrf.mxu1 }
 0xd03   :  { %v3520_v60 = vadd.f32 %v3519_v9, %v3436_v23 }
 0xd04   :  { %v5421_v42 = vpop.f32.mrf.mxu1 }
 0xd05   :  { %v3527_v46 = vadd.f32 %v3525_v5, %v3520_v60  ;;  %v6033_v42 = vld [vmem:[%s8455_s13 + $0x8] sm:$0xff]  }
 0xd06   :  { %v3522_v14 = vpop.f32.mrf.mxu1 }
 0xd07   :  { %v3528_v54 = vmax.f32 %v3527_v46, 0.0  ;;  %v6034_v46 = vld [vmem:[%s8455_s13] sm:$0xff]   ;;  %v6035_v14 = vld [vmem:[%s8450_s9 + $0x38] sm:$0xff]  }
 0xd08   :  { %v5422_v11 = vpop.f32.mrf.mxu1 }
 0xd09   :  { %v3529_v38 = vpack.c.bf16 %v3528_v54, %v3528_v54  ;;  %v6036_v54 = vld [vmem:[%s8450_s9 + $0x30] sm:$0xff]   ;;  %v6037_v11 = vld [vmem:[%s8450_s9 + $0x28] sm:$0xff]  }
 0xd0b   :  { %5440 = vmatmul.mubr.bf16.vlgmr.msra.gmra.mxu0 %v3529_v38  ;;  %v6038_v38 = vld [vmem:[%s8450_s9 + $0x20] sm:$0xff]  }
 0xd0c   :  { %5479 = vmatprep.mubr.msk.bf16.mxu0 %vm6125_vm4, %v6124_v44  ;;  %5464 = vmatpush3.bf16.msra.mxu0 %v6011_v19  ;;  %v3877_v19 = vld [vmem:[%s8458_s12] sm:$0x1] }
 0xd0d   :  { %5465 = vmatprep.subr.bf16.mxu0 %v6124_v44 }
 0xd10   :  { %5466 = vmatpush3.bf16.msra.mxu0 %v6012_v49 }
 0xd11   :  { %5467 = vmatprep.subr.bf16.mxu0 %v6124_v44 }
 0xd14   :  { %5468 = vmatpush3.bf16.msra.mxu0 %v6013_v30 }
 0xd15   :  { %5469 = vmatprep.subr.bf16.mxu0 %v6124_v44 }
 0xd18   :  { %5470 = vmatpush3.bf16.msra.mxu0 %v6014_v21  ;;  %v3966_v21 = vrot.slane %v7851_v18, 4 }
 0xd19   :  { %5471 = vmatprep.subr.bf16.mxu0 %v6124_v44 }
 0xd1c   :  { %5472 = vmatpush3.bf16.msra.mxu0 %v6015_v15 }
 0xd1d   :  { %5473 = vmatprep.subr.bf16.mxu0 %v6124_v44 }
 0xd20   :  { %5474 = vmatpush3.bf16.msra.mxu0 %v6016_v6 }
 0xd21   :  { %5475 = vmatprep.subr.bf16.mxu0 %v6124_v44 }
 0xd24   :  { %5476 = vmatpush3.bf16.msra.mxu0 %v6017_v33  ;;  %v6047_v33 = vld [vmem:[%s8453_s11 + $0x18] sm:$0xff]  }
 0xd25   :  { %5477 = vmatprep.subr.bf16.mxu0 %v6124_v44 }
 0xd28   :  { %5478 = vmatpush3.bf16.msra.mxu0 %v6018_v56  ;;  %v6048_v56 = vld [vmem:[%s8453_s11 + $0x10] sm:$0xff]  }
 0xd29   :  { %5503 = vmatprep.subr.bf16.mxu0 %v6124_v44 }
 0xdcb   :  { %v3629_v28 = vpop.f32.mrf.mxu0 }
 0xdcc   :  { %v3630_v34 = vadd.f32 %v3629_v28, %v3546_v41 }
 0xdcd   :  { %v5441_v55 = vpop.f32.mrf.mxu0 }
 0xdce   :  { %v3637_v36 = vadd.f32 %v3635_v29, %v3630_v34  ;;  %v6041_v55 = vld [vmem:[%s8450_s9 + $0x8] sm:$0xff]  }
 0xdcf   :  { %v3632_v16 = vpop.f32.mrf.mxu0 }
 0xdd0   :  { %v3638_v1 = vmax.f32 %v3637_v36, 0.0  ;;  %v6042_v36 = vld [vmem:[%s8450_s9] sm:$0xff]   ;;  %v6043_v16 = vld [vmem:[%s8453_s11 + $0x38] sm:$0xff]  }
 0xdd1   :  { %v5442_v0 = vpop.f32.mrf.mxu0 }
 0xdd2   :  { %v3639_v12 = vpack.c.bf16 %v3638_v1, %v3638_v1  ;;  %v6044_v1 = vld [vmem:[%s8453_s11 + $0x30] sm:$0xff]   ;;  %v6045_v0 = vld [vmem:[%s8453_s11 + $0x28] sm:$0xff]  }
 0xdd4   :  { %5460 = vmatmul.mubr.bf16.vlgmr.msra.gmra.mxu1 %v3639_v12  ;;  %v6046_v12 = vld [vmem:[%s8453_s11 + $0x20] sm:$0xff]  }
 0xdd5   :  { %5499 = vmatprep.mubr.msk.bf16.mxu1 %vm6125_vm4, %v6124_v44  ;;  %5484 = vmatpush3.bf16.msra.mxu1 %v6019_v13  ;;  %v3987_v13 = vld [vmem:[%s8459_s14] sm:$0x1] }
 0xdd6   :  { %5485 = vmatprep.subr.bf16.mxu1 %v6124_v44 }
 0xdd9   :  { %5486 = vmatpush3.bf16.msra.mxu1 %v6020_v17 }
 0xdda   :  { %5487 = vmatprep.subr.bf16.mxu1 %v6124_v44 }
 0xddd   :  { %5488 = vmatpush3.bf16.msra.mxu1 %v6021_v59 }
 0xdde   :  { %5489 = vmatprep.subr.bf16.mxu1 %v6124_v44 }
 0xde1   :  { %5490 = vmatpush3.bf16.msra.mxu1 %v6022_v40  ;;  %v4076_v40 = vrot.slane %v7894_v26, 4 }
 0xde2   :  { %5491 = vmatprep.subr.bf16.mxu1 %v6124_v44 }
 0xde5   :  { %5492 = vmatpush3.bf16.msra.mxu1 %v6023_v10 }
 0xde6   :  { %5493 = vmatprep.subr.bf16.mxu1 %v6124_v44 }
 0xde9   :  { %5494 = vmatpush3.bf16.msra.mxu1 %v6024_v39 }
 0xdea   :  { %5495 = vmatprep.subr.bf16.mxu1 %v6124_v44 }
 0xded   :  { %5496 = vmatpush3.bf16.msra.mxu1 %v6025_v61  ;;  %v6055_v61 = vld [vmem:[%s8455_s13 + $0x18] sm:$0xff]  }
 0xdee   :  { %5497 = vmatprep.subr.bf16.mxu1 %v6124_v44 }
 0xdf1   :  { %5498 = vmatpush3.bf16.msra.mxu1 %v6026_v2  ;;  %v6056_v2 = vld [vmem:[%s8455_s13 + $0x10] sm:$0xff]  }
 0xdf2   :  { %5523 = vmatprep.subr.bf16.mxu1 %v6124_v44 }
 0xe94   :  { %v3739_v58 = vpop.f32.mrf.mxu1 }
 0xe95   :  { %v3740_v31 = vadd.f32 %v3739_v58, %v3656_v24 }
 0xe96   :  { %v5461_v37 = vpop.f32.mrf.mxu1 }
 0xe97   :  { %v3747_v7 = vadd.f32 %v3745_v4, %v3740_v31  ;;  %v6049_v37 = vld [vmem:[%s8453_s11 + $0x8] sm:$0xff]  }
 0xe98   :  { %v3742_v53 = vpop.f32.mrf.mxu1 }
 0xe99   :  { %v3748_v32 = vmax.f32 %v3747_v7, 0.0  ;;  %v6050_v7 = vld [vmem:[%s8453_s11] sm:$0xff]   ;;  %v6051_v53 = vld [vmem:[%s8455_s13 + $0x38] sm:$0xff]  }
 0xe9a   :  { %v5462_v3 = vpop.f32.mrf.mxu1 }
 0xe9b   :  { %3749 = vst [vmem:[#allocation2 + $0x3] sm:$0x1] %v3748_v32  ;;  %v3750_v8 = vpack.c.bf16 %v3748_v32, %v3748_v32  ;;  %v6052_v32 = vld [vmem:[%s8455_s13 + $0x30] sm:$0xff]   ;;  %v6053_v3 = vld [vmem:[%s8455_s13 + $0x28] sm:$0xff]  }
 0xe9d   :  { %5480 = vmatmul.mubr.bf16.vlgmr.msra.gmra.mxu0 %v3750_v8  ;;  %v6054_v8 = vld [vmem:[%s8455_s13 + $0x20] sm:$0xff]  }
 0xe9e   :  { %5519 = vmatprep.mubr.msk.bf16.mxu0 %vm6125_vm4, %v6124_v44  ;;  %5504 = vmatpush3.bf16.msra.mxu0 %v6027_v57  ;;  %v4098_v57 = vld [vmem:[%s8457_s10] sm:$0x1] }
 0xe9f   :  { %5505 = vmatprep.subr.bf16.mxu0 %v6124_v44 }
 0xea2   :  { %5506 = vmatpush3.bf16.msra.mxu0 %v6028_v20 }
 0xea3   :  { %5507 = vmatprep.subr.bf16.mxu0 %v6124_v44 }
 0xea6   :  { %5508 = vmatpush3.bf16.msra.mxu0 %v6029_v51 }
 0xea7   :  { %5509 = vmatprep.subr.bf16.mxu0 %v6124_v44 }
 0xeaa   :  { %5510 = vmatpush3.bf16.msra.mxu0 %v6030_v50  ;;  %v4187_v50 = vrot.slane %v7808_v63, 5  ;;  %v6058_v63 = vld [vmem:[%s8455_s13] sm:$0xff]  }
 0xeab   :  { %5511 = vmatprep.subr.bf16.mxu0 %v6124_v44 }
 0xeae   :  { %5512 = vmatpush3.bf16.msra.mxu0 %v6031_v52 }
 0xeaf   :  { %5513 = vmatprep.subr.bf16.mxu0 %v6124_v44 }
 0xeb2   :  { %5514 = vmatpush3.bf16.msra.mxu0 %v6032_v25 }
 0xeb3   :  { %5515 = vmatprep.subr.bf16.mxu0 %v6124_v44 }
 0xeb6   :  { %5516 = vmatpush3.bf16.msra.mxu0 %v6033_v42 }
 0xeb7   :  { %5517 = vmatprep.subr.bf16.mxu0 %v6124_v44 }
 0xeba   :  { %5518 = vmatpush3.bf16.msra.mxu0 %v6034_v46 }
 0xebb   :  { %5543 = vmatprep.subr.bf16.mxu0 %v6124_v44 }
 0xf5d   :  { %v3850_v47 = vpop.f32.mrf.mxu0 }
 0xf5e   :  { %v3851_v62 = vadd.f32 %v3850_v47, %v3767_v45 }
 0xf5f   :  { %v5481_v43 = vpop.f32.mrf.mxu0 }
 0xf60   :  { %v3858_v48 = vadd.f32 %v3856_v35, %v3851_v62  ;;  %v6057_v43 = vld [vmem:[%s8455_s13 + $0x8] sm:$0xff]  }
 0xf61   :  { %v3853_v23 = vpop.f32.mrf.mxu0 }
 0xf62   :  { %v3859_v9 = vmax.f32 %v3858_v48, 0.0  ;;  %v6059_v48 = vld [vmem:[%s8460_s15 + $0x38] sm:$0xff]   ;;  %v6060_v23 = vld [vmem:[%s8460_s15 + $0x30] sm:$0xff]  }
 0xf63   :  { %v5482_v60 = vpop.f32.mrf.mxu0 }
 0xf64   :  { %v3860_v5 = vpack.c.bf16 %v3859_v9, %v3859_v9  ;;  %v6061_v9 = vld [vmem:[%s8460_s15 + $0x28] sm:$0xff]   ;;  %v6062_v60 = vld [vmem:[%s8460_s15 + $0x20] sm:$0xff]  }
 0xf66   :  { %5500 = vmatmul.mubr.bf16.vlgmr.msra.gmra.mxu1 %v3860_v5  ;;  %v4208_v5 = vld [vmem:[%s8458_s12] sm:$0x1] }
 0xf67   :  { %5539 = vmatprep.mubr.msk.bf16.mxu1 %vm6125_vm4, %v6124_v44  ;;  %5524 = vmatpush3.bf16.msra.mxu1 %v6035_v14  ;;  %v4297_v14 = vrot.slane %v7851_v18, 5  ;;  %v6065_v18 = vld [vmem:[%s8460_s15 + $0x8] sm:$0xff]  }
 0xf68   :  { %5525 = vmatprep.subr.bf16.mxu1 %v6124_v44 }
 0xf6b   :  { %5526 = vmatpush3.bf16.msra.mxu1 %v6036_v54 }
 0xf6c   :  { %5527 = vmatprep.subr.bf16.mxu1 %v6124_v44 }
 0xf6f   :  { %5528 = vmatpush3.bf16.msra.mxu1 %v6037_v11 }
 0xf70   :  { %5529 = vmatprep.subr.bf16.mxu1 %v6124_v44 }
 0xf73   :  { %5530 = vmatpush3.bf16.msra.mxu1 %v6038_v38 }
 0xf74   :  { %5531 = vmatprep.subr.bf16.mxu1 %v6124_v44 }
 0xf77   :  { %5532 = vmatpush3.bf16.msra.mxu1 %v6039_v27 }
 0xf78   :  { %5533 = vmatprep.subr.bf16.mxu1 %v6124_v44 }
 0xf7b   :  { %5534 = vmatpush3.bf16.msra.mxu1 %v6040_v22 }
 0xf7c   :  { %5535 = vmatprep.subr.bf16.mxu1 %v6124_v44 }
 0xf7f   :  { %5536 = vmatpush3.bf16.msra.mxu1 %v6041_v55 }
 0xf80   :  { %5537 = vmatprep.subr.bf16.mxu1 %v6124_v44 }
 0xf83   :  { %5538 = vmatpush3.bf16.msra.mxu1 %v6042_v36 }
 0xf84   :  { %5563 = vmatprep.subr.bf16.mxu1 %v6124_v44 }
0x1026   :  { %v3960_v49 = vpop.f32.mrf.mxu1 }
0x1027   :  { %v3961_v30 = vadd.f32 %v3960_v49, %v3877_v19  ;;  %v6063_v49 = vld [vmem:[%s8460_s15 + $0x18] sm:$0xff]  }
0x1028   :  { %v5501_v15 = vpop.f32.mrf.mxu1 }
0x1029   :  { %v3968_v6 = vadd.f32 %v3966_v21, %v3961_v30  ;;  %v6064_v30 = vld [vmem:[%s8460_s15 + $0x10] sm:$0xff]   ;;  %v6066_v21 = vld [vmem:[%s8460_s15] sm:$0xff]  }
0x102a   :  { %v3963_v41 = vpop.f32.mrf.mxu1  ;;  %v4318_v15 = vld [vmem:[%s8459_s14] sm:$0x1] }
0x102b   :  { %v3969_v28 = vmax.f32 %v3968_v6, 0.0 }
0x102c   :  { %v5502_v34 = vpop.f32.mrf.mxu1 }
0x102d   :  { %v3970_v29 = vpack.c.bf16 %v3969_v28, %v3969_v28  ;;  %v4407_v28 = vrot.slane %v7894_v26, 5 }
0x102f   :  { %5520 = vmatmul.mubr.bf16.vlgmr.msra.gmra.mxu0 %v3970_v29 }
0x1030   :  { %5559 = vmatprep.mubr.msk.bf16.mxu0 %vm6125_vm4, %v6124_v44  ;;  %5544 = vmatpush3.bf16.msra.mxu0 %v6043_v16 }
0x1031   :  { %5545 = vmatprep.subr.bf16.mxu0 %v6124_v44 }
0x1034   :  { %5546 = vmatpush3.bf16.msra.mxu0 %v6044_v1 }
0x1035   :  { %5547 = vmatprep.subr.bf16.mxu0 %v6124_v44 }
0x1038   :  { %5548 = vmatpush3.bf16.msra.mxu0 %v6045_v0 }
0x1039   :  { %5549 = vmatprep.subr.bf16.mxu0 %v6124_v44 }
0x103c   :  { %5550 = vmatpush3.bf16.msra.mxu0 %v6046_v12 }
0x103d   :  { %5551 = vmatprep.subr.bf16.mxu0 %v6124_v44 }
0x1040   :  { %5552 = vmatpush3.bf16.msra.mxu0 %v6047_v33 }
0x1041   :  { %5553 = vmatprep.subr.bf16.mxu0 %v6124_v44 }
0x1044   :  { %5554 = vmatpush3.bf16.msra.mxu0 %v6048_v56 }
0x1045   :  { %5555 = vmatprep.subr.bf16.mxu0 %v6124_v44 }
0x1048   :  { %5556 = vmatpush3.bf16.msra.mxu0 %v6049_v37 }
0x1049   :  { %5557 = vmatprep.subr.bf16.mxu0 %v6124_v44 }
0x104c   :  { %5558 = vmatpush3.bf16.msra.mxu0 %v6050_v7 }
0x104d   :  { %5583 = vmatprep.subr.bf16.mxu0 %v6124_v44 }
0x10ef   :  { %v4070_v17 = vpop.f32.mrf.mxu0 }
0x10f0   :  { %v4071_v59 = vadd.f32 %v4070_v17, %v3987_v13 }
0x10f1   :  { %v5521_v10 = vpop.f32.mrf.mxu0 }
0x10f2   :  { %v4078_v39 = vadd.f32 %v4076_v40, %v4071_v59 }
0x10f3   :  { %v4073_v24 = vpop.f32.mrf.mxu0 }
0x10f4   :  { %v4079_v58 = vmax.f32 %v4078_v39, 0.0 }
0x10f5   :  { %v5522_v31 = vpop.f32.mrf.mxu0 }
0x10f6   :  { %4080 = vst [vmem:[#allocation2 + $0x4] sm:$0x1] %v4079_v58  ;;  %v4081_v4 = vpack.c.bf16 %v4079_v58, %v4079_v58 }
0x10f8   :  { %5540 = vmatmul.mubr.bf16.vlgmr.msra.gmra.mxu1 %v4081_v4 }
0x10f9   :  { %5579 = vmatprep.mubr.msk.bf16.mxu1 %vm6125_vm4, %v6124_v44  ;;  %5564 = vmatpush3.bf16.msra.mxu1 %v6051_v53 }
0x10fa   :  { %5565 = vmatprep.subr.bf16.mxu1 %v6124_v44 }
0x10fd   :  { %5566 = vmatpush3.bf16.msra.mxu1 %v6052_v32 }
0x10fe   :  { %5567 = vmatprep.subr.bf16.mxu1 %v6124_v44 }
0x1101   :  { %5568 = vmatpush3.bf16.msra.mxu1 %v6053_v3 }
0x1102   :  { %5569 = vmatprep.subr.bf16.mxu1 %v6124_v44 }
0x1105   :  { %5570 = vmatpush3.bf16.msra.mxu1 %v6054_v8 }
0x1106   :  { %5571 = vmatprep.subr.bf16.mxu1 %v6124_v44 }
0x1109   :  { %5572 = vmatpush3.bf16.msra.mxu1 %v6055_v61 }
0x110a   :  { %5573 = vmatprep.subr.bf16.mxu1 %v6124_v44 }
0x110d   :  { %5574 = vmatpush3.bf16.msra.mxu1 %v6056_v2 }
0x110e   :  { %5575 = vmatprep.subr.bf16.mxu1 %v6124_v44 }
0x1111   :  { %5576 = vmatpush3.bf16.msra.mxu1 %v6057_v43 }
0x1112   :  { %5577 = vmatprep.subr.bf16.mxu1 %v6124_v44 }
0x1115   :  { %5578 = vmatpush3.bf16.msra.mxu1 %v6058_v63 }
0x11b8   :  { %v4181_v20 = vpop.f32.mrf.mxu1 }
0x11b9   :  { %v4182_v51 = vadd.f32 %v4181_v20, %v4098_v57 }
0x11ba   :  { %v5541_v52 = vpop.f32.mrf.mxu1 }
0x11bb   :  { %v4189_v25 = vadd.f32 %v4187_v50, %v4182_v51 }
0x11bc   :  { %v4184_v45 = vpop.f32.mrf.mxu1 }
0x11bd   :  { %v4190_v47 = vmax.f32 %v4189_v25, 0.0 }
0x11be   :  { %v5542_v62 = vpop.f32.mrf.mxu1 }
0x11bf   :  { %v4191_v35 = vpack.c.bf16 %v4190_v47, %v4190_v47 }
0x11c1   :  { %5560 = vmatmul.mubr.bf16.vlgmr.msra.gmra.mxu0 %v4191_v35 }
0x11c2   :  { %5599 = vmatprep.mubr.msk.bf16.mxu0 %vm6125_vm4, %v6124_v44  ;;  %5584 = vmatpush3.bf16.msra.mxu0 %v6059_v48 }
0x11c3   :  { %5585 = vmatprep.subr.bf16.mxu0 %v6124_v44 }
0x11c6   :  { %5586 = vmatpush3.bf16.msra.mxu0 %v6060_v23 }
0x11c7   :  { %5587 = vmatprep.subr.bf16.mxu0 %v6124_v44 }
0x11ca   :  { %5588 = vmatpush3.bf16.msra.mxu0 %v6061_v9 }
0x11cb   :  { %5589 = vmatprep.subr.bf16.mxu0 %v6124_v44 }
0x11ce   :  { %5590 = vmatpush3.bf16.msra.mxu0 %v6062_v60 }
0x11cf   :  { %5591 = vmatprep.subr.bf16.mxu0 %v6124_v44 }
0x11d2   :  { %5592 = vmatpush3.bf16.msra.mxu0 %v6063_v49 }
0x11d3   :  { %5593 = vmatprep.subr.bf16.mxu0 %v6124_v44 }
0x11d6   :  { %5594 = vmatpush3.bf16.msra.mxu0 %v6064_v30 }
0x11d7   :  { %5595 = vmatprep.subr.bf16.mxu0 %v6124_v44 }
0x11da   :  { %5596 = vmatpush3.bf16.msra.mxu0 %v6065_v18 }
0x11db   :  { %5597 = vmatprep.subr.bf16.mxu0 %v6124_v44  ;;  %v4939_v44 = vld [vmem:[%s8461_s16] ss:$0 sm:$0xff] }
0x11de   :  { %5598 = vmatpush3.bf16.msra.mxu0 %v6066_v21 }
0x1281   :  { %v4291_v42 = vpop.f32.mrf.mxu0 }
0x1282   :  { %v4292_v46 = vadd.f32 %v4291_v42, %v4208_v5 }
0x1283   :  { %v5561_v54 = vpop.f32.mrf.mxu0 }
0x1284   :  { %v4299_v11 = vadd.f32 %v4297_v14, %v4292_v46 }
0x1285   :  { %v4294_v38 = vpop.f32.mrf.mxu0 }
0x1286   :  { %v4300_v27 = vmax.f32 %v4299_v11, 0.0 }
0x1287   :  { %v5562_v22 = vpop.f32.mrf.mxu0 }
0x1288   :  { %v4301_v19 = vpack.c.bf16 %v4300_v27, %v4300_v27 }
0x128a   :  { %5580 = vmatmul.mubr.bf16.vlgmr.msra.gmra.mxu1 %v4301_v19 }
0x134a   :  { %v4401_v6 = vpop.f32.mrf.mxu1 }
0x134b   :  { %v4402_v41 = vadd.f32 %v4401_v6, %v4318_v15 }
0x134c   :  { %v5581_v34 = vpop.f32.mrf.mxu1 }
0x134d   :  { %v4409_v29 = vadd.f32 %v4407_v28, %v4402_v41 }
0x134e   :  { %v4404_v55 = vpop.f32.mrf.mxu1 }
0x134f   :  { %v4410_v36 = vmax.f32 %v4409_v29, 0.0 }
0x1350   :  { %v5582_v16 = vpop.f32.mrf.mxu1 }
0x1351   :  { %4411 = vst [vmem:[#allocation2 + $0x5] sm:$0x1] %v4410_v36 }
0x1358   :  { %v4412_v1 = vld [vmem:[#allocation2] sm:$0x3f] }
0x1359   :  { %v4413_v0 = vpack.c.bf16 %v4412_v1, %v4412_v1 }
0x135b   :  { %5600 = vmatmul.mubr.bf16.vlgmr.msra.gmra.mxu0 %v4413_v0 }
0x141b   :  { %v4519_v12 = vpop.f32.mrf.mxu0 }
0x141c   :  { %v4520_v33 = vadd.f32 %v4939_v44, %v4519_v12 }
0x141d   :  { %v5601_v56 = vpop.f32.mrf.mxu0 }
0x141e   :  { %4526 = vst.msk [vmem:[%s8462_s17] sm:$0x3f] %vm4525_vm5, %v4520_v33 }
0x141f   :  { %v4522_v26 = vpop.f32.mrf.mxu0 }
0x1421   :  { %v5602_v13 = vpop.f32.mrf.mxu0 }

</bundles_post_ra>
